<compile_context>
chip_gen: v5e
topology: v5e:2x2
jax: 0.10.0
libtpu: 0.0.40
codegen_flags: <defaults>
</compile_context>

<pallas_src>
import numpy as np

import jax
import jax.numpy as jnp
from jax.experimental import pallas as pl
from jax.experimental.pallas import tpu as pltpu


# ----------------------------------------------------------------------------
# Fused Pallas kernel: the whole encoder + decoder forward in one call.
# Packed weights (~5.4 MB f32 total) + activations live entirely in VMEM.
# ----------------------------------------------------------------------------
def _netd_fused_kernel(x_ref,
                       w1_ref, b1_ref, w2_ref, b2_ref, w3_ref, b3_ref,
                       w4_ref, b4_ref, w5_ref, b5_ref, w6_ref, b6_ref,
                       enc_ref, dec_ref):
    def layer(h, w_ref, b_ref, act):
        y = jnp.dot(h, w_ref[...], preferred_element_type=jnp.float32)  # MXU
        y = y + b_ref[...]                      # (1, M) broadcast over rows
        if act == "lrelu":
            y = jnp.where(y > 0, y, 0.2 * y)    # VPU
        elif act == "relu":
            y = jnp.maximum(y, 0.0)             # VPU
        elif act == "tanh":
            y = jnp.tanh(y)                     # EUP (own VLIW slot)
        return y

    h = x_ref[...]                                         # (N, 4*16*16)
    h = layer(h, w1_ref, b1_ref, "lrelu")                  # (N, 8*8*8)
    h = layer(h, w2_ref, b2_ref, "lrelu")                  # (N, 16*4*4)
    z = layer(h, w3_ref, b3_ref, "none")                   # (N, 32) latent
    enc_ref[...] = z.astype(enc_ref.dtype)
    g = layer(z, w4_ref, b4_ref, "relu")                   # (N, 16*4*4)
    g = layer(g, w5_ref, b5_ref, "relu")                   # (N, 8*8*8)
    dec_ref[...] = layer(g, w6_ref, b6_ref, "tanh").astype(dec_ref.dtype)


def netd_forward(packed, x):
    """x: (N, 4, 16, 16) NCHW -> (f_enc (N, 32), f_dec (N, 1024))."""
    n = x.shape[0]
    x2 = x.reshape(n, -1)          # contiguous NCHW flatten (metadata only)
    mats, biases = packed["mats"], packed["biases"]
    enc_dim = mats[2].shape[1]
    dec_dim = mats[5].shape[1]

    args = [x2]
    for w, b in zip(mats, biases):
        args.append(w)
        args.append(b)

    vmem = pl.BlockSpec(memory_space=pltpu.MemorySpace.VMEM)
    # No grid: the whole problem fits VMEM on v5e/v6e/v7x, so a single
    # invocation with everything resident avoids launch overhead and
    # pipelining machinery.  At large batch, add a batch-tiled "parallel"
    # grid axis to use both v7x TensorCores; at batch=2 one TC is correct.
    f_enc, f_dec = pl.pallas_call(
        _netd_fused_kernel,
        out_shape=(jax.ShapeDtypeStruct((n, enc_dim), jnp.float32),
                   jax.ShapeDtypeStruct((n, dec_dim), jnp.float32)),
        in_specs=[vmem] * len(args),
        out_specs=(vmem, vmem),
    )(*args)
    return f_enc, f_dec


# ----------------------------------------------------------------------------
# One-time weight packing (init-time, off the per-step critical path):
# fold each conv / conv-transpose into an exact dense matrix + bias so the
# kernel needs zero data-shuffling.
# ----------------------------------------------------------------------------
def _conv2d_matrix(w, b, H, W, stride, pad):
    """PyTorch Conv2d(w:(Cout,Cin,kh,kw)) as (Cin*H*W, Cout*OH*OW) matrix."""
    w = np.asarray(w, np.float32)
    b = np.asarray(b, np.float32)
    Cout, Cin, kh, kw = w.shape
    OH = (H + 2 * pad - kh) // stride + 1
    OW = (W + 2 * pad - kw) // stride + 1
    M = np.zeros((Cin * H * W, Cout * OH * OW), np.float32)
    ci = np.arange(Cin)
    co = np.arange(Cout)
    for oh in range(OH):
        for ow in range(OW):
            for i in range(kh):
                for j in range(kw):
                    ih = oh * stride + i - pad
                    iw = ow * stride + j - pad
                    if 0 <= ih < H and 0 <= iw < W:
                        rows = ci * (H * W) + ih * W + iw
                        cols = co * (OH * OW) + oh * OW + ow
                        M[np.ix_(rows, cols)] += w[:, :, i, j].T  # (Cin,Cout)
    bias = np.repeat(b, OH * OW)[None, :]                        # (1, Cout*OH*OW)
    return M, bias, OH, OW


def _conv_transpose2d_matrix(w, b, H, W, stride, pad):
    """PyTorch ConvTranspose2d(w:(Cin,Cout,kh,kw)) as a dense matrix.
    y[co, s*ih+i-p, s*iw+j-p] += x[ci, ih, iw] * w[ci, co, i, j]."""
    w = np.asarray(w, np.float32)
    b = np.asarray(b, np.float32)
    Cin, Cout, kh, kw = w.shape
    OH = (H - 1) * stride - 2 * pad + kh
    OW = (W - 1) * stride - 2 * pad + kw
    M = np.zeros((Cin * H * W, Cout * OH * OW), np.float32)
    ci = np.arange(Cin)
    co = np.arange(Cout)
    for ih in range(H):
        for iw in range(W):
            for i in range(kh):
                for j in range(kw):
                    oh = ih * stride + i - pad
                    ow = iw * stride + j - pad
                    if 0 <= oh < OH and 0 <= ow < OW:
                        rows = ci * (H * W) + ih * W + iw
                        cols = co * (OH * OW) + oh * OW + ow
                        M[np.ix_(rows, cols)] += w[:, :, i, j]    # (Cin,Cout)
    bias = np.repeat(b, OH * OW)[None, :]
    return M, bias, OH, OW


def pack_params(params, in_hw=(16, 16)):
    H, W = in_hw
    mats, biases = [], []

    m, b, H, W = _conv2d_matrix(params["e1_w"], params["e1_b"], H, W, 2, 1)
    mats.append(m); biases.append(b)
    m, b, H, W = _conv2d_matrix(params["e2_w"], params["e2_b"], H, W, 2, 1)
    mats.append(m); biases.append(b)
    m, b, H, W = _conv2d_matrix(params["e3_w"], params["e3_b"], H, W, 1, 0)
    mats.append(m); biases.append(b)

    m, b, H, W = _conv_transpose2d_matrix(params["d1_w"], params["d1_b"], H, W, 1, 0)
    mats.append(m); biases.append(b)
    m, b, H, W = _conv_transpose2d_matrix(params["d2_w"], params["d2_b"], H, W, 2, 1)
    mats.append(m); biases.append(b)
    m, b, H, W = _conv_transpose2d_matrix(params["d3_w"], params["d3_b"], H, W, 2, 1)
    mats.append(m); biases.append(b)

    return {"mats": [jnp.asarray(m) for m in mats],
            "biases": [jnp.asarray(b) for b in biases]}


def init_params(key):
    ks = jax.random.split(key, 6)
    std = 0.02
    return {
        # encoder (Conv2d weight layout: (Cout, Cin, kh, kw))
        "e1_w": jax.random.normal(ks[0], (8, 4, 4, 4), jnp.float32) * std,
        "e1_b": jnp.zeros((8,), jnp.float32),
        "e2_w": jax.random.normal(ks[1], (16, 8, 4, 4), jnp.float32) * std,
        "e2_b": jnp.zeros((16,), jnp.float32),
        "e3_w": jax.random.normal(ks[2], (32, 16, 4, 4), jnp.float32) * std,
        "e3_b": jnp.zeros((32,), jnp.float32),
        # decoder (ConvTranspose2d weight layout: (Cin, Cout, kh, kw))
        "d1_w": jax.random.normal(ks[3], (32, 16, 4, 4), jnp.float32) * std,
        "d1_b": jnp.zeros((16,), jnp.float32),
        "d2_w": jax.random.normal(ks[4], (16, 8, 4, 4), jnp.float32) * std,
        "d2_b": jnp.zeros((8,), jnp.float32),
        "d3_w": jax.random.normal(ks[5], (8, 4, 4, 4), jnp.float32) * std,
        "d3_b": jnp.zeros((4,), jnp.float32),
    }


# ----------------------------------------------------------------------------
# Pure-JAX (XLA conv) reference — used only to cross-check the fused kernel.
# ----------------------------------------------------------------------------
def _reference_forward(params, x):
    dn = ("NCHW", "OIHW", "NCHW")
    hi = jax.lax.Precision.HIGHEST

    def conv(h, w, b, stride, pad):
        y = jax.lax.conv_general_dilated(
            h, w, window_strides=(stride, stride),
            padding=[(pad, pad), (pad, pad)], dimension_numbers=dn,
            precision=hi)
        return y + b[None, :, None, None]

    def convt(h, w, b, stride, pad):
        kh = w.shape[2]
        w_conv = jnp.flip(w, (2, 3)).transpose(1, 0, 2, 3)   # (Cout,Cin,kh,kw)
        y = jax.lax.conv_general_dilated(
            h, w_conv, window_strides=(1, 1),
            padding=[(kh - 1 - pad, kh - 1 - pad)] * 2,
            lhs_dilation=(stride, stride), dimension_numbers=dn,
            precision=hi)
        return y + b[None, :, None, None]

    lrelu = lambda t: jnp.where(t > 0, t, 0.2 * t)
    h = lrelu(conv(x, params["e1_w"], params["e1_b"], 2, 1))
    h = lrelu(conv(h, params["e2_w"], params["e2_b"], 2, 1))
    z = conv(h, params["e3_w"], params["e3_b"], 1, 0)
    g = jnp.maximum(convt(z, params["d1_w"], params["d1_b"], 1, 0), 0.0)
    g = jnp.maximum(convt(g, params["d2_w"], params["d2_b"], 2, 1), 0.0)
    d = jnp.tanh(convt(g, params["d3_w"], params["d3_b"], 2, 1))
    n = x.shape[0]
    return z.reshape(n, -1), d.reshape(n, -1)


if __name__ == "__main__":
    key = jax.random.PRNGKey(0)
    k_param, k_x = jax.random.split(key)
    params = init_params(k_param)
    packed = pack_params(params)                    # one-time weight packing
    x = jax.random.normal(k_x, (2, 4, 16, 16), jnp.float32)

    fwd = jax.jit(netd_forward)
    f_enc, f_dec = fwd(packed, x)
    jax.block_until_ready((f_enc, f_dec))

    assert f_enc.shape == (2, 32), f_enc.shape
    assert f_dec.shape == (2, 4 * 16 * 16), f_dec.shape
    assert bool(jnp.all(jnp.isfinite(f_enc))) and bool(jnp.all(jnp.isfinite(f_dec)))

    # Correctness cross-check against an XLA conv reference.
    r_enc, r_dec = _reference_forward(params, x)
    assert jnp.allclose(f_enc, r_enc, atol=1e-4, rtol=1e-2), "encoder mismatch"
    assert jnp.allclose(f_dec, r_dec, atol=1e-5, rtol=1e-2), "decoder mismatch"

    print("KERNEL_OK")
</pallas_src>

<mosaic_0001>
module attributes {stable_mosaic.version = 11 : i64} {
  func.func @_netd_fused_kernel(%arg0: memref<2x1024xf32, #tpu.memory_space<vmem>>, %arg1: memref<1024x512xf32, #tpu.memory_space<vmem>>, %arg2: memref<1x512xf32, #tpu.memory_space<vmem>>, %arg3: memref<512x256xf32, #tpu.memory_space<vmem>>, %arg4: memref<1x256xf32, #tpu.memory_space<vmem>>, %arg5: memref<256x32xf32, #tpu.memory_space<vmem>>, %arg6: memref<1x32xf32, #tpu.memory_space<vmem>>, %arg7: memref<32x256xf32, #tpu.memory_space<vmem>>, %arg8: memref<1x256xf32, #tpu.memory_space<vmem>>, %arg9: memref<256x512xf32, #tpu.memory_space<vmem>>, %arg10: memref<1x512xf32, #tpu.memory_space<vmem>>, %arg11: memref<512x1024xf32, #tpu.memory_space<vmem>>, %arg12: memref<1x1024xf32, #tpu.memory_space<vmem>>, %arg13: memref<2x32xf32, #tpu.memory_space<vmem>>, %arg14: memref<2x1024xf32, #tpu.memory_space<vmem>>) attributes {dimension_semantics = [], scalar_prefetch = 0 : i64, scratch_operands = 0 : i64, tpu.core_type = #tpu.core_type<tc>} {
    %c0 = arith.constant 0 : index
    %c0_0 = arith.constant 0 : index
    %0 = vector.load %arg0[%c0, %c0_0] : memref<2x1024xf32, #tpu.memory_space<vmem>>, vector<2x1024xf32>
    %c0_1 = arith.constant 0 : index
    %c0_2 = arith.constant 0 : index
    %1 = vector.load %arg1[%c0_1, %c0_2] : memref<1024x512xf32, #tpu.memory_space<vmem>>, vector<1024x512xf32>
    %cst = arith.constant dense<0.000000e+00> : vector<2x512xf32>
    %2 = tpu.matmul %0, %1, %cst {dimension_numbers = #tpu.dot_dimension_numbers<[1], [0], [0], [1], [0, 0, 1, 1], [], []>} : vector<2x1024xf32>, vector<1024x512xf32>, vector<2x512xf32> -> vector<2x512xf32>
    %c0_3 = arith.constant 0 : index
    %c0_4 = arith.constant 0 : index
    %3 = vector.load %arg2[%c0_3, %c0_4] : memref<1x512xf32, #tpu.memory_space<vmem>>, vector<1x512xf32>
    %4 = vector.broadcast %3 : vector<1x512xf32> to vector<2x512xf32>
    %5 = arith.addf %2, %4 : vector<2x512xf32>
    %cst_5 = arith.constant 0.000000e+00 : f32
    %6 = vector.broadcast %cst_5 : f32 to vector<2x512xf32>
    %7 = arith.cmpf ogt, %5, %6 : vector<2x512xf32>
    %cst_6 = arith.constant 2.000000e-01 : f32
    %8 = vector.broadcast %cst_6 : f32 to vector<2x512xf32>
    %9 = arith.mulf %8, %5 : vector<2x512xf32>
    %10 = arith.select %7, %5, %9 : vector<2x512xi1>, vector<2x512xf32>
    %c0_7 = arith.constant 0 : index
    %c0_8 = arith.constant 0 : index
    %11 = vector.load %arg3[%c0_7, %c0_8] : memref<512x256xf32, #tpu.memory_space<vmem>>, vector<512x256xf32>
    %cst_9 = arith.constant dense<0.000000e+00> : vector<2x256xf32>
    %12 = tpu.matmul %10, %11, %cst_9 {dimension_numbers = #tpu.dot_dimension_numbers<[1], [0], [0], [1], [0, 0, 1, 1], [], []>} : vector<2x512xf32>, vector<512x256xf32>, vector<2x256xf32> -> vector<2x256xf32>
    %c0_10 = arith.constant 0 : index
    %c0_11 = arith.constant 0 : index
    %13 = vector.load %arg4[%c0_10, %c0_11] : memref<1x256xf32, #tpu.memory_space<vmem>>, vector<1x256xf32>
    %14 = vector.broadcast %13 : vector<1x256xf32> to vector<2x256xf32>
    %15 = arith.addf %12, %14 : vector<2x256xf32>
    %cst_12 = arith.constant 0.000000e+00 : f32
    %16 = vector.broadcast %cst_12 : f32 to vector<2x256xf32>
    %17 = arith.cmpf ogt, %15, %16 : vector<2x256xf32>
    %cst_13 = arith.constant 2.000000e-01 : f32
    %18 = vector.broadcast %cst_13 : f32 to vector<2x256xf32>
    %19 = arith.mulf %18, %15 : vector<2x256xf32>
    %20 = arith.select %17, %15, %19 : vector<2x256xi1>, vector<2x256xf32>
    %c0_14 = arith.constant 0 : index
    %c0_15 = arith.constant 0 : index
    %21 = vector.load %arg5[%c0_14, %c0_15] : memref<256x32xf32, #tpu.memory_space<vmem>>, vector<256x32xf32>
    %cst_16 = arith.constant dense<0.000000e+00> : vector<2x32xf32>
    %22 = tpu.matmul %20, %21, %cst_16 {dimension_numbers = #tpu.dot_dimension_numbers<[1], [0], [0], [1], [0, 0, 1, 1], [], []>} : vector<2x256xf32>, vector<256x32xf32>, vector<2x32xf32> -> vector<2x32xf32>
    %c0_17 = arith.constant 0 : index
    %c0_18 = arith.constant 0 : index
    %23 = vector.load %arg6[%c0_17, %c0_18] : memref<1x32xf32, #tpu.memory_space<vmem>>, vector<1x32xf32>
    %24 = vector.broadcast %23 : vector<1x32xf32> to vector<2x32xf32>
    %25 = arith.addf %22, %24 : vector<2x32xf32>
    %c0_19 = arith.constant 0 : index
    %c0_20 = arith.constant 0 : index
    %26 = vector.load %arg13[%c0_19, %c0_20] : memref<2x32xf32, #tpu.memory_space<vmem>>, vector<2x32xf32>
    tpu.vector_store %arg13[%c0_19, %c0_20], %25 {strides = array<i32>} : memref<2x32xf32, #tpu.memory_space<vmem>>, vector<2x32xf32>,
    %c0_21 = arith.constant 0 : index
    %c0_22 = arith.constant 0 : index
    %27 = vector.load %arg7[%c0_21, %c0_22] : memref<32x256xf32, #tpu.memory_space<vmem>>, vector<32x256xf32>
    %cst_23 = arith.constant dense<0.000000e+00> : vector<2x256xf32>
    %28 = tpu.matmul %25, %27, %cst_23 {dimension_numbers = #tpu.dot_dimension_numbers<[1], [0], [0], [1], [0, 0, 1, 1], [], []>} : vector<2x32xf32>, vector<32x256xf32>, vector<2x256xf32> -> vector<2x256xf32>
    %c0_24 = arith.constant 0 : index
    %c0_25 = arith.constant 0 : index
    %29 = vector.load %arg8[%c0_24, %c0_25] : memref<1x256xf32, #tpu.memory_space<vmem>>, vector<1x256xf32>
    %30 = vector.broadcast %29 : vector<1x256xf32> to vector<2x256xf32>
    %31 = arith.addf %28, %30 : vector<2x256xf32>
    %cst_26 = arith.constant 0.000000e+00 : f32
    %32 = vector.broadcast %cst_26 : f32 to vector<2x256xf32>
    %33 = arith.maximumf %31, %32 : vector<2x256xf32>
    %c0_27 = arith.constant 0 : index
    %c0_28 = arith.constant 0 : index
    %34 = vector.load %arg9[%c0_27, %c0_28] : memref<256x512xf32, #tpu.memory_space<vmem>>, vector<256x512xf32>
    %cst_29 = arith.constant dense<0.000000e+00> : vector<2x512xf32>
    %35 = tpu.matmul %33, %34, %cst_29 {dimension_numbers = #tpu.dot_dimension_numbers<[1], [0], [0], [1], [0, 0, 1, 1], [], []>} : vector<2x256xf32>, vector<256x512xf32>, vector<2x512xf32> -> vector<2x512xf32>
    %c0_30 = arith.constant 0 : index
    %c0_31 = arith.constant 0 : index
    %36 = vector.load %arg10[%c0_30, %c0_31] : memref<1x512xf32, #tpu.memory_space<vmem>>, vector<1x512xf32>
    %37 = vector.broadcast %36 : vector<1x512xf32> to vector<2x512xf32>
    %38 = arith.addf %35, %37 : vector<2x512xf32>
    %cst_32 = arith.constant 0.000000e+00 : f32
    %39 = vector.broadcast %cst_32 : f32 to vector<2x512xf32>
    %40 = arith.maximumf %38, %39 : vector<2x512xf32>
    %c0_33 = arith.constant 0 : index
    %c0_34 = arith.constant 0 : index
    %41 = vector.load %arg11[%c0_33, %c0_34] : memref<512x1024xf32, #tpu.memory_space<vmem>>, vector<512x1024xf32>
    %cst_35 = arith.constant dense<0.000000e+00> : vector<2x1024xf32>
    %42 = tpu.matmul %40, %41, %cst_35 {dimension_numbers = #tpu.dot_dimension_numbers<[1], [0], [0], [1], [0, 0, 1, 1], [], []>} : vector<2x512xf32>, vector<512x1024xf32>, vector<2x1024xf32> -> vector<2x1024xf32>
    %c0_36 = arith.constant 0 : index
    %c0_37 = arith.constant 0 : index
    %43 = vector.load %arg12[%c0_36, %c0_37] : memref<1x1024xf32, #tpu.memory_space<vmem>>, vector<1x1024xf32>
    %44 = vector.broadcast %43 : vector<1x1024xf32> to vector<2x1024xf32>
    %45 = arith.addf %42, %44 : vector<2x1024xf32>
    %46 = math.tanh %45 : vector<2x1024xf32>
    %c0_38 = arith.constant 0 : index
    %c0_39 = arith.constant 0 : index
    %47 = vector.load %arg14[%c0_38, %c0_39] : memref<2x1024xf32, #tpu.memory_space<vmem>>, vector<2x1024xf32>
    tpu.vector_store %arg14[%c0_38, %c0_39], %46 {strides = array<i32>} : memref<2x1024xf32, #tpu.memory_space<vmem>>, vector<2x1024xf32>,
    return
  }
}

</mosaic_0001>

<bundles_post_ra>
// kernel: netd_forward.1
= control target key start
LH: loop header
LB: loop body
LE: loop exit
PB: predicated region body
PF: predicated region fallthrough
CT: control target
= control target key end

     0   :  { %20 = vsyncpa [#allocation3], 0  ;;  %s4172_s0 = inlined_call_operand.vmem [shape: f32[2,1024], index: 0, kind: input, shape index: {}]   ;;  %s4173_s1 = inlined_call_operand.hbm [shape: f32[1024,512], index: 1, kind: input, shape index: {}]   ;;  %s4174_s2 = inlined_call_operand.hbm [shape: f32[1,512], index: 2, kind: input, shape index: {}]   ;;  %s4175_s3 = inlined_call_operand.hbm [shape: f32[512,256], index: 3, kind: input, shape index: {}]   ;;  %s4176_s4 = inlined_call_operand.hbm [shape: f32[1,256], index: 4, kind: input, shape index: {}]   ;;  %s4177_s5 = inlined_call_operand.vmem [shape: f32[256,32], index: 5, kind: input, shape index: {}]   ;;  %s4178_s6 = inlined_call_operand.hbm [shape: f32[1,32], index: 6, kind: input, shape index: {}]   ;;  %s4179_s7 = inlined_call_operand.hbm [shape: f32[32,256], index: 7, kind: input, shape index: {}]   ;;  %s4180_s8 = inlined_call_operand.hbm [shape: f32[1,256], index: 8, kind: input, shape index: {}]   ;;  %s4181_s9 = inlined_call_operand.hbm [shape: f32[256,512], index: 9, kind: input, shape index: {}]   ;;  %s4182_s10 = inlined_call_operand.hbm [shape: f32[1,512], index: 10, kind: input, shape index: {}]   ;;  %s4183_s11 = inlined_call_operand.hbm [shape: f32[512,1024], index: 11, kind: input, shape index: {}]   ;;  %s4184_s12 = inlined_call_operand.hbm [shape: f32[1,1024], index: 12, kind: input, shape index: {}]   ;;  %s4185_s13 = inlined_call_operand.hbm [shape: f32[2,32], index: 13, kind: output, shape index: {0}]   ;;  %s4186_s14 = inlined_call_operand.hbm [shape: f32[2,1024], index: 14, kind: output, shape index: {1}]  }
   0x1   :  { %21 = vsyncpa [#allocation6], 0 }
   0x2   :  { %22 = vsyncpa [#allocation9], 0 }
   0x3   :  { %23 = vsyncpa [#allocation12], 0 }
   0x4   :  { %24 = vsyncpa [#allocation15], 0 }
   0x5   :  { %25 = vsyncpa [#allocation18], 0 }
   0x6   :  { %26 = vsyncpa [#allocation4], 0  ;;  %s48_s15 = sshll.u32 %s4174_s2, 4  ;;  %s49_s15 = int_to_ptr.hbm [resolvable:$true] %s48_s15 }
   0x7   :  { %27 = vsyncpa [#allocation22], 0  ;;  %s3761_s16 = smov [#allocation5]   ;;  %s72_s20 = sshll.u32 %s4176_s4, 4  ;;  %s73_s20 = int_to_ptr.hbm [resolvable:$true] %s72_s20 }
   0x8   :  { %s50_s17 = sshll.u32 %s3761_s16, 4  ;;  %s3762_s21 = smov [#allocation8]   ;;  %s51_s17 = int_to_ptr.vmem [resolvable:$true] %s50_s17 }
   0x9   :  { %53 = dma.hbm_to_vmem [thread:$0]  %s49_s15, 64, %s51_s17, [#allocation6]  }
   0xa   :  { %s74_s22 = sshll.u32 %s3762_s21, 4  ;;  %s95_s25 = sshll.u32 %s4179_s7, 4  ;;  %s75_s22 = int_to_ptr.vmem [resolvable:$true] %s74_s22  ;;  %s96_s25 = int_to_ptr.hbm [resolvable:$true] %s95_s25 }
   0xb   :  { %77 = dma.hbm_to_vmem [thread:$0]  %s73_s20, 32, %s75_s22, [#allocation9]  }
   0xc   :  { %s3763_s2 = smov [#allocation11]   ;;  %s3764_s27 = smov 256  }
   0xd   :  { %s97_s26 = sshll.u32 %s3763_s2, 4  ;;  %s3765_s28 = smov 16   ;;  %s98_s26 = int_to_ptr.vmem [resolvable:$true] %s97_s26 }
   0xe   :  { %103 = dma.hbm_to_vmem [thread:$0]  %s96_s25, 1024, %s98_s26, [#allocation12], %s3764_s27, %s3764_s27, %s3765_s28  }
   0xf   :  { %s119_s30 = sshll.u32 %s4181_s9, 4  ;;  %s3766_s15 = smov [#allocation14]   ;;  %s120_s30 = int_to_ptr.hbm [resolvable:$true] %s119_s30 }
  0x10   :  { %s121_s16 = sshll.u32 %s3766_s15, 4  ;;  %s143_s7 = sshll.u32 %s4183_s11, 4  ;;  %s122_s16 = int_to_ptr.vmem [resolvable:$true] %s121_s16  ;;  %s144_s7 = int_to_ptr.hbm [resolvable:$true] %s143_s7 }
  0x11   :  { %s3767_s19 = smov 512   ;;  %s3768_s20 = smov 32  }
  0x12   :  { %127 = dma.hbm_to_vmem [thread:$0]  %s120_s30, 16384, %s122_s16, [#allocation15], %s3767_s19, %s3767_s19, %s3768_s20  }
  0x13   :  { %s3769_s21 = smov [#allocation17]   ;;  %s34_s25 = sshll.u32 %s4173_s1, 4  ;;  %s35_s25 = int_to_ptr.hbm [resolvable:$true] %s34_s25 }
  0x14   :  { %s145_s22 = sshll.u32 %s3769_s21, 4  ;;  %s3770_s9 = smov 1024   ;;  %s146_s22 = int_to_ptr.vmem [resolvable:$true] %s145_s22 }
  0x15   :  { %s3771_s2 = smov 64   ;;  %s3772_s26 = smov [#allocation2]  }
  0x16   :  { %151 = dma.hbm_to_vmem [thread:$0]  %s144_s7, 65536, %s146_s22, [#allocation18], %s3770_s9, %s3770_s9, %s3771_s2  }
  0x17   :  { %s36_s4 = sshll.u32 %s3772_s26, 4  ;;  %s58_s15 = sshll.u32 %s4175_s3, 4  ;;  %s37_s4 = int_to_ptr.vmem [resolvable:$true] %s36_s4  ;;  %s59_s15 = int_to_ptr.hbm [resolvable:$true] %s58_s15 }
  0x18   :  { %42 = dma.hbm_to_vmem [thread:$0]  %s35_s25, 65536, %s37_s4, [#allocation3], %s3767_s19, %s3767_s19, %s3768_s20  }
  0x19   :  { %s85_s17 = sshll.u32 %s4178_s6, 4  ;;  %s3773_s18 = smov [#allocation7]   ;;  %s86_s17 = int_to_ptr.hbm [resolvable:$true] %s85_s17 }
  0x1a   :  { %s60_s21 = sshll.u32 %s3773_s18, 4  ;;  %s3774_s1 = smov [#allocation10]   ;;  %s61_s21 = int_to_ptr.vmem [resolvable:$true] %s60_s21 }
  0x1b   :  { %66 = dma.hbm_to_vmem [thread:$0]  %s59_s15, 16384, %s61_s21, [#allocation6], %s3764_s27, %s3764_s27, %s3765_s28  }
  0x1c   :  { %s87_s7 = sshll.u32 %s3774_s1, 4  ;;  %s109_s3 = sshll.u32 %s4180_s8, 4  ;;  %s88_s7 = int_to_ptr.vmem [resolvable:$true] %s87_s7  ;;  %s110_s3 = int_to_ptr.hbm [resolvable:$true] %s109_s3 }
  0x1d   :  { %90 = dma.hbm_to_vmem [thread:$0]  %s86_s17, 16, %s88_s7, [#allocation9]  }
  0x1e   :  { %s133_s6 = sshll.u32 %s4182_s10, 4  ;;  %s3775_s24 = smov [#allocation13]   ;;  %s134_s6 = int_to_ptr.hbm [resolvable:$true] %s133_s6 }
  0x1f   :  { %s111_s25 = sshll.u32 %s3775_s24, 4  ;;  %s3776_s9 = smov [#allocation16]   ;;  %s112_s25 = int_to_ptr.vmem [resolvable:$true] %s111_s25 }
  0x20   :  { %114 = dma.hbm_to_vmem [thread:$0]  %s110_s3, 32, %s112_s25, [#allocation12]  }
  0x21   :  { %s135_s27 = sshll.u32 %s3776_s9, 4  ;;  %s157_s26 = sshll.u32 %s4184_s12, 4  ;;  %s136_s27 = int_to_ptr.vmem [resolvable:$true] %s135_s27  ;;  %s158_s26 = int_to_ptr.hbm [resolvable:$true] %s157_s26 }
  0x22   :  { %138 = dma.hbm_to_vmem [thread:$0]  %s134_s6, 64, %s136_s27, [#allocation15]  }
  0x23   :  { %s3777_s8 = smov [#allocation19]  }
  0x24   :  { %s159_s4 = sshll.u32 %s3777_s8, 4  ;;  %s160_s4 = int_to_ptr.vmem [resolvable:$true] %s159_s4 }
  0x25   :  { %162 = dma.hbm_to_vmem [thread:$0]  %s158_s26, 128, %s160_s4, [#allocation18]  }
  0x26   :  { %3745 = dma.done.wait [#allocation3], 65536  }
  0x27   :  { %3746 = vsyncadd [#allocation3], 4294901760 }
  0x28   :  { %3747 = dma.done.wait [#allocation6], 16448  }
  0x29   :  { %3748 = vsyncadd [#allocation6], 4294950848 }
  0x2a   :  { %3749 = dma.done.wait [#allocation9], 48  }
  0x2b   :  { %3750 = vsyncadd [#allocation9], 4294967248 }
  0x2c   :  { %3751 = dma.done.wait [#allocation12], 1056  }
  0x2d   :  { %3752 = vsyncadd [#allocation12], 4294966240 }
  0x2e   :  { %3753 = dma.done.wait [#allocation15], 16448  }
  0x2f   :  { %3754 = vsyncadd [#allocation15], 4294950848 }
  0x30   :  { %3755 = dma.done.wait [#allocation18], 65664  }
  0x31   :  { %3756 = vsyncadd [#allocation18], 4294901632  ;;  %v269_v0 = vld [vmem:[#allocation2 + $0x1e0] sm:$0xff]  ;;  %vm1796_vm6 = vcmask 261120   ;;  %vm1780_vm7 = vcmask 254976   ;;  %vm3336_vm8 = vcmask 1041408  }
  0x32   :  { %v333_v1 = vld [vmem:[#allocation2 + $0x3e0] sm:$0xff]  ;;  %752 = vmatpush.msra.mxu0 %v269_v0  ;;  %vm3338_vm9 = vcmask 1045508   ;;  %vm3340_vm10 = vcmask 1043456   ;;  %s3356_s22 = sshll.u32 %s4185_s13, 4  ;;  %s3778_s23 = smov [#allocation20]   ;;  %s3357_s22 = int_to_ptr.hbm [resolvable:$true] %s3356_s22 }
  0x33   :  { %v397_v2 = vld [vmem:[#allocation2 + $0x5e0] sm:$0xff]  ;;  %772 = vmatpush.msra.mxu1 %v333_v1  ;;  %s3354_s3 = sshll.u32 %s3778_s23, 4  ;;  %s3779_s13 = smov [#allocation21]   ;;  %s3355_s3 = int_to_ptr.vmem [resolvable:$true] %s3354_s3 }
  0x34   :  { %v265_v3 = vld [vmem:[#allocation2 + $0x1c0] sm:$0xff]  ;;  %792 = vmatpush.msra.mxu2 %v397_v2  ;;  %s3365_s19 = sshll.u32 %s3779_s13, 4  ;;  %s3367_s24 = sshll.u32 %s4186_s14, 4  ;;  %s3366_s19 = int_to_ptr.vmem [resolvable:$true] %s3365_s19  ;;  %s3368_s24 = int_to_ptr.hbm [resolvable:$true] %s3367_s24 }
  0x35   :  { %v329_v4 = vld [vmem:[#allocation2 + $0x3c0] sm:$0xff]  ;;  %753 = vmatpush.msra.mxu0 %v265_v3 }
  0x36   :  { %v393_v5 = vld [vmem:[#allocation2 + $0x5c0] sm:$0xff]  ;;  %773 = vmatpush.msra.mxu1 %v329_v4 }
  0x37   :  { %v461_v6 = vld [vmem:[#allocation2 + $0x7e0] sm:$0xff]  ;;  %793 = vmatpush.msra.mxu2 %v393_v5 }
  0x38   :  { %v261_v7 = vld [vmem:[#allocation2 + $0x1a0] sm:$0xff]  ;;  %812 = vmatpush.msra.mxu3 %v461_v6 }
  0x39   :  { %v325_v8 = vld [vmem:[#allocation2 + $0x3a0] sm:$0xff]  ;;  %754 = vmatpush.msra.mxu0 %v261_v7 }
  0x3a   :  { %v389_v9 = vld [vmem:[#allocation2 + $0x5a0] sm:$0xff]  ;;  %774 = vmatpush.msra.mxu1 %v325_v8 }
  0x3b   :  { %v457_v10 = vld [vmem:[#allocation2 + $0x7c0] sm:$0xff]  ;;  %794 = vmatpush.msra.mxu2 %v389_v9 }
  0x3c   :  { %v257_v11 = vld [vmem:[#allocation2 + $0x180] sm:$0xff]  ;;  %813 = vmatpush.msra.mxu3 %v457_v10 }
  0x3d   :  { %v321_v12 = vld [vmem:[#allocation2 + $0x380] sm:$0xff]  ;;  %755 = vmatpush.msra.mxu0 %v257_v11 }
  0x3e   :  { %v385_v13 = vld [vmem:[#allocation2 + $0x580] sm:$0xff]  ;;  %775 = vmatpush.msra.mxu1 %v321_v12 }
  0x3f   :  { %v453_v14 = vld [vmem:[#allocation2 + $0x7a0] sm:$0xff]  ;;  %795 = vmatpush.msra.mxu2 %v385_v13 }
  0x40   :  { %v253_v15 = vld [vmem:[#allocation2 + $0x160] sm:$0xff]  ;;  %814 = vmatpush.msra.mxu3 %v453_v14 }
  0x41   :  { %v317_v16 = vld [vmem:[#allocation2 + $0x360] sm:$0xff]  ;;  %756 = vmatpush.msra.mxu0 %v253_v15 }
  0x42   :  { %v381_v17 = vld [vmem:[#allocation2 + $0x560] sm:$0xff]  ;;  %776 = vmatpush.msra.mxu1 %v317_v16 }
  0x43   :  { %v449_v18 = vld [vmem:[#allocation2 + $0x780] sm:$0xff]  ;;  %796 = vmatpush.msra.mxu2 %v381_v17 }
  0x44   :  { %v249_v19 = vld [vmem:[#allocation2 + $0x140] sm:$0xff]  ;;  %815 = vmatpush.msra.mxu3 %v449_v18 }
  0x45   :  { %v313_v20 = vld [vmem:[#allocation2 + $0x340] sm:$0xff]  ;;  %757 = vmatpush.msra.mxu0 %v249_v19 }
  0x46   :  { %v377_v21 = vld [vmem:[#allocation2 + $0x540] sm:$0xff]  ;;  %777 = vmatpush.msra.mxu1 %v313_v20 }
  0x47   :  { %v445_v22 = vld [vmem:[#allocation2 + $0x760] sm:$0xff]  ;;  %797 = vmatpush.msra.mxu2 %v377_v21 }
  0x48   :  { %v245_v23 = vld [vmem:[#allocation2 + $0x120] sm:$0xff]  ;;  %816 = vmatpush.msra.mxu3 %v445_v22 }
  0x49   :  { %v309_v24 = vld [vmem:[#allocation2 + $0x320] sm:$0xff]  ;;  %758 = vmatpush.msra.mxu0 %v245_v23  ;;  %v207_v23 = vld [vmem:[%s4172_s0] sm:$0xff] }
  0x4a   :  { %v373_v25 = vld [vmem:[#allocation2 + $0x520] sm:$0xff]  ;;  %778 = vmatpush.msra.mxu1 %v309_v24  ;;  %733 = vst [vmem:[#allocation1] ss:$4 sm:$0xff] %v207_v23 }
  0x4b   :  { %v441_v26 = vld [vmem:[#allocation2 + $0x740] sm:$0xff]  ;;  %798 = vmatpush.msra.mxu2 %v373_v25 }
  0x4c   :  { %v241_v27 = vld [vmem:[#allocation2 + $0x100] sm:$0xff]  ;;  %817 = vmatpush.msra.mxu3 %v441_v26 }
  0x4d   :  { %v305_v28 = vld [vmem:[#allocation2 + $0x300] sm:$0xff]  ;;  %759 = vmatpush.msra.mxu0 %v241_v27 }
  0x4e   :  { %v369_v29 = vld [vmem:[#allocation2 + $0x500] sm:$0xff]  ;;  %779 = vmatpush.msra.mxu1 %v305_v28 }
  0x4f   :  { %v437_v30 = vld [vmem:[#allocation2 + $0x720] sm:$0xff]  ;;  %799 = vmatpush.msra.mxu2 %v369_v29 }
  0x50   :  { %v237_v31 = vld [vmem:[#allocation2 + $0xe0] sm:$0xff]  ;;  %818 = vmatpush.msra.mxu3 %v437_v30 }
  0x51   :  { %v301_v32 = vld [vmem:[#allocation2 + $0x2e0] sm:$0xff]  ;;  %760 = vmatpush.msra.mxu0 %v237_v31 }
  0x52   :  { %v365_v33 = vld [vmem:[#allocation2 + $0x4e0] sm:$0xff]  ;;  %780 = vmatpush.msra.mxu1 %v301_v32 }
  0x53   :  { %v433_v34 = vld [vmem:[#allocation2 + $0x700] sm:$0xff]  ;;  %800 = vmatpush.msra.mxu2 %v365_v33 }
  0x54   :  { %v233_v35 = vld [vmem:[#allocation2 + $0xc0] sm:$0xff]  ;;  %819 = vmatpush.msra.mxu3 %v433_v34 }
  0x55   :  { %v297_v36 = vld [vmem:[#allocation2 + $0x2c0] sm:$0xff]  ;;  %761 = vmatpush.msra.mxu0 %v233_v35 }
  0x56   :  { %v361_v37 = vld [vmem:[#allocation2 + $0x4c0] sm:$0xff]  ;;  %781 = vmatpush.msra.mxu1 %v297_v36 }
  0x57   :  { %v429_v38 = vld [vmem:[#allocation2 + $0x6e0] sm:$0xff]  ;;  %801 = vmatpush.msra.mxu2 %v361_v37 }
  0x58   :  { %v229_v39 = vld [vmem:[#allocation2 + $0xa0] sm:$0xff]  ;;  %820 = vmatpush.msra.mxu3 %v429_v38 }
  0x59   :  { %v293_v40 = vld [vmem:[#allocation2 + $0x2a0] sm:$0xff]  ;;  %762 = vmatpush.msra.mxu0 %v229_v39 }
  0x5a   :  { %v357_v41 = vld [vmem:[#allocation2 + $0x4a0] sm:$0xff]  ;;  %782 = vmatpush.msra.mxu1 %v293_v40 }
  0x5b   :  { %v425_v42 = vld [vmem:[#allocation2 + $0x6c0] sm:$0xff]  ;;  %802 = vmatpush.msra.mxu2 %v357_v41 }
  0x5c   :  { %v225_v43 = vld [vmem:[#allocation2 + $0x80] sm:$0xff]  ;;  %821 = vmatpush.msra.mxu3 %v425_v42 }
  0x5d   :  { %v289_v44 = vld [vmem:[#allocation2 + $0x280] sm:$0xff]  ;;  %763 = vmatpush.msra.mxu0 %v225_v43 }
  0x5e   :  { %v353_v45 = vld [vmem:[#allocation2 + $0x480] sm:$0xff]  ;;  %783 = vmatpush.msra.mxu1 %v289_v44 }
  0x5f   :  { %v421_v46 = vld [vmem:[#allocation2 + $0x6a0] sm:$0xff]  ;;  %803 = vmatpush.msra.mxu2 %v353_v45 }
  0x60   :  { %v221_v47 = vld [vmem:[#allocation2 + $0x60] sm:$0xff]  ;;  %822 = vmatpush.msra.mxu3 %v421_v46 }
  0x61   :  { %v285_v48 = vld [vmem:[#allocation2 + $0x260] sm:$0xff]  ;;  %764 = vmatpush.msra.mxu0 %v221_v47 }
  0x62   :  { %v349_v49 = vld [vmem:[#allocation2 + $0x460] sm:$0xff]  ;;  %784 = vmatpush.msra.mxu1 %v285_v48 }
  0x63   :  { %v417_v50 = vld [vmem:[#allocation2 + $0x680] sm:$0xff]  ;;  %804 = vmatpush.msra.mxu2 %v349_v49 }
  0x64   :  { %v217_v51 = vld [vmem:[#allocation2 + $0x40] sm:$0xff]  ;;  %823 = vmatpush.msra.mxu3 %v417_v50 }
  0x65   :  { %v281_v52 = vld [vmem:[#allocation2 + $0x240] sm:$0xff]  ;;  %765 = vmatpush.msra.mxu0 %v217_v51 }
  0x66   :  { %v345_v53 = vld [vmem:[#allocation2 + $0x440] sm:$0xff]  ;;  %785 = vmatpush.msra.mxu1 %v281_v52 }
  0x67   :  { %v413_v54 = vld [vmem:[#allocation2 + $0x660] sm:$0xff]  ;;  %805 = vmatpush.msra.mxu2 %v345_v53 }
  0x68   :  { %v213_v55 = vld [vmem:[#allocation2 + $0x20] sm:$0xff]  ;;  %824 = vmatpush.msra.mxu3 %v413_v54 }
  0x69   :  { %v277_v56 = vld [vmem:[#allocation2 + $0x220] sm:$0xff]  ;;  %766 = vmatpush.msra.mxu0 %v213_v55 }
  0x6a   :  { %v341_v57 = vld [vmem:[#allocation2 + $0x420] sm:$0xff]  ;;  %786 = vmatpush.msra.mxu1 %v277_v56 }
  0x6b   :  { %v409_v58 = vld [vmem:[#allocation2 + $0x640] sm:$0xff]  ;;  %806 = vmatpush.msra.mxu2 %v341_v57 }
  0x6c   :  { %v209_v59 = vld [vmem:[#allocation2] sm:$0xff]  ;;  %825 = vmatpush.msra.mxu3 %v409_v58 }
  0x6d   :  { %v273_v60 = vld [vmem:[#allocation2 + $0x200] sm:$0xff]  ;;  %767 = vmatpush.msra.mxu0 %v209_v59 }
  0x6e   :  { %v337_v61 = vld [vmem:[#allocation2 + $0x400] sm:$0xff]  ;;  %787 = vmatpush.msra.mxu1 %v273_v60 }
  0x6f   :  { %v405_v62 = vld [vmem:[#allocation2 + $0x620] sm:$0xff]  ;;  %807 = vmatpush.msra.mxu2 %v337_v61  ;;  %v3900_v61 = vld.sshfl [vmem:[#allocation1 + $0x10] sm:$0xff pattern:$0x73625140] }
  0x70   :  { %v525_v63 = vld [vmem:[#allocation2 + $0x9e0] sm:$0xff]  ;;  %826 = vmatpush.msra.mxu3 %v405_v62  ;;  %808 = vmatmul.f32.vlgmr.msra.gmra.mxu2 %v3900_v61 }
  0x71   :  { %v589_v0 = vld [vmem:[#allocation2 + $0xbe0] sm:$0xff]  ;;  %832 = vmatpush.msrb.mxu0 %v525_v63 }
  0x72   :  { %v653_v1 = vld [vmem:[#allocation2 + $0xde0] sm:$0xff]  ;;  %852 = vmatpush.msrb.mxu1 %v589_v0 }
  0x73   :  { %v401_v2 = vld [vmem:[#allocation2 + $0x600] sm:$0xff]  ;;  %872 = vmatpush.msrb.mxu2 %v653_v1 }
  0x74   :  { %v521_v3 = vld [vmem:[#allocation2 + $0x9c0] sm:$0xff]  ;;  %827 = vmatpush.msra.mxu3 %v401_v2  ;;  %v3902_v2 = vld.sshfl [vmem:[#allocation1] sm:$0xff pattern:$0x73625140] }
  0x75   :  { %v585_v4 = vld [vmem:[#allocation2 + $0xbc0] sm:$0xff]  ;;  %833 = vmatpush.msrb.mxu0 %v521_v3 }
  0x76   :  { %v649_v5 = vld [vmem:[#allocation2 + $0xdc0] sm:$0xff]  ;;  %853 = vmatpush.msrb.mxu1 %v585_v4  ;;  %v3907_v4 = vld.sshfl [vmem:[#allocation1 + $0x18] sm:$0xff pattern:$0x73625140]  ;;  %768 = vmatmul.f32.vlgmr.msra.gmra.mxu0 %v3902_v2 }
  0x77   :  { %v717_v6 = vld [vmem:[#allocation2 + $0xfe0] sm:$0xff]  ;;  %873 = vmatpush.msrb.mxu2 %v649_v5  ;;  %v270_v5 = vld [vmem:[#allocation2 + $0x1e8] sm:$0xff]  ;;  %828 = vmatmul.f32.vlgmr.msra.gmra.mxu3 %v3907_v4 }
  0x78   :  { %v517_v7 = vld [vmem:[#allocation2 + $0x9a0] sm:$0xff]  ;;  %892 = vmatpush.msrb.mxu3 %v717_v6  ;;  %v334_v6 = vld [vmem:[#allocation2 + $0x3e8] sm:$0xff] }
  0x79   :  { %v581_v8 = vld [vmem:[#allocation2 + $0xba0] sm:$0xff]  ;;  %834 = vmatpush.msrb.mxu0 %v517_v7  ;;  %v398_v7 = vld [vmem:[#allocation2 + $0x5e8] sm:$0xff] }
  0x7a   :  { %v645_v9 = vld [vmem:[#allocation2 + $0xda0] sm:$0xff]  ;;  %854 = vmatpush.msrb.mxu1 %v581_v8 }
  0x7b   :  { %v713_v10 = vld [vmem:[#allocation2 + $0xfc0] sm:$0xff]  ;;  %874 = vmatpush.msrb.mxu2 %v645_v9  ;;  %v266_v9 = vld [vmem:[#allocation2 + $0x1c8] sm:$0xff] }
  0x7c   :  { %v513_v11 = vld [vmem:[#allocation2 + $0x980] sm:$0xff]  ;;  %893 = vmatpush.msrb.mxu3 %v713_v10  ;;  %v330_v10 = vld [vmem:[#allocation2 + $0x3c8] sm:$0xff] }
  0x7d   :  { %v577_v12 = vld [vmem:[#allocation2 + $0xb80] sm:$0xff]  ;;  %835 = vmatpush.msrb.mxu0 %v513_v11  ;;  %v394_v11 = vld [vmem:[#allocation2 + $0x5c8] sm:$0xff] }
  0x7e   :  { %v641_v13 = vld [vmem:[#allocation2 + $0xd80] sm:$0xff]  ;;  %855 = vmatpush.msrb.mxu1 %v577_v12  ;;  %v462_v12 = vld [vmem:[#allocation2 + $0x7e8] sm:$0xff] }
  0x7f   :  { %v709_v14 = vld [vmem:[#allocation2 + $0xfa0] sm:$0xff]  ;;  %875 = vmatpush.msrb.mxu2 %v641_v13  ;;  %v262_v13 = vld [vmem:[#allocation2 + $0x1a8] sm:$0xff] }
  0x80   :  { %v509_v15 = vld [vmem:[#allocation2 + $0x960] sm:$0xff]  ;;  %894 = vmatpush.msrb.mxu3 %v709_v14  ;;  %v326_v14 = vld [vmem:[#allocation2 + $0x3a8] sm:$0xff] }
  0x81   :  { %v573_v16 = vld [vmem:[#allocation2 + $0xb60] sm:$0xff]  ;;  %836 = vmatpush.msrb.mxu0 %v509_v15  ;;  %v390_v15 = vld [vmem:[#allocation2 + $0x5a8] sm:$0xff] }
  0x82   :  { %v637_v17 = vld [vmem:[#allocation2 + $0xd60] sm:$0xff]  ;;  %856 = vmatpush.msrb.mxu1 %v573_v16  ;;  %v458_v16 = vld [vmem:[#allocation2 + $0x7c8] sm:$0xff] }
  0x83   :  { %v705_v18 = vld [vmem:[#allocation2 + $0xf80] sm:$0xff]  ;;  %876 = vmatpush.msrb.mxu2 %v637_v17 }
  0x84   :  { %v505_v19 = vld [vmem:[#allocation2 + $0x940] sm:$0xff]  ;;  %895 = vmatpush.msrb.mxu3 %v705_v18  ;;  %v258_v18 = vld [vmem:[#allocation2 + $0x188] sm:$0xff] }
  0x85   :  { %v569_v20 = vld [vmem:[#allocation2 + $0xb40] sm:$0xff]  ;;  %837 = vmatpush.msrb.mxu0 %v505_v19  ;;  %v322_v19 = vld [vmem:[#allocation2 + $0x388] sm:$0xff] }
  0x86   :  { %v633_v21 = vld [vmem:[#allocation2 + $0xd40] sm:$0xff]  ;;  %857 = vmatpush.msrb.mxu1 %v569_v20  ;;  %v386_v20 = vld [vmem:[#allocation2 + $0x588] sm:$0xff] }
  0x87   :  { %v701_v22 = vld [vmem:[#allocation2 + $0xf60] sm:$0xff]  ;;  %877 = vmatpush.msrb.mxu2 %v633_v21  ;;  %v454_v21 = vld [vmem:[#allocation2 + $0x7a8] sm:$0xff] }
  0x88   :  { %v501_v24 = vld [vmem:[#allocation2 + $0x920] sm:$0xff]  ;;  %896 = vmatpush.msrb.mxu3 %v701_v22 }
  0x89   :  { %v565_v25 = vld [vmem:[#allocation2 + $0xb20] sm:$0xff]  ;;  %838 = vmatpush.msrb.mxu0 %v501_v24  ;;  %v254_v24 = vld [vmem:[#allocation2 + $0x168] sm:$0xff] }
  0x8a   :  { %v629_v26 = vld [vmem:[#allocation2 + $0xd20] sm:$0xff]  ;;  %858 = vmatpush.msrb.mxu1 %v565_v25  ;;  %v318_v25 = vld [vmem:[#allocation2 + $0x368] sm:$0xff] }
  0x8b   :  { %v697_v27 = vld [vmem:[#allocation2 + $0xf40] sm:$0xff]  ;;  %878 = vmatpush.msrb.mxu2 %v629_v26  ;;  %v382_v26 = vld [vmem:[#allocation2 + $0x568] sm:$0xff] }
  0x8c   :  { %v497_v28 = vld [vmem:[#allocation2 + $0x900] sm:$0xff]  ;;  %897 = vmatpush.msrb.mxu3 %v697_v27  ;;  %v450_v27 = vld [vmem:[#allocation2 + $0x788] sm:$0xff] }
  0x8d   :  { %v561_v29 = vld [vmem:[#allocation2 + $0xb00] sm:$0xff]  ;;  %839 = vmatpush.msrb.mxu0 %v497_v28 }
  0x8e   :  { %v625_v30 = vld [vmem:[#allocation2 + $0xd00] sm:$0xff]  ;;  %859 = vmatpush.msrb.mxu1 %v561_v29  ;;  %v250_v29 = vld [vmem:[#allocation2 + $0x148] sm:$0xff] }
  0x8f   :  { %v693_v31 = vld [vmem:[#allocation2 + $0xf20] sm:$0xff]  ;;  %879 = vmatpush.msrb.mxu2 %v625_v30  ;;  %v314_v30 = vld [vmem:[#allocation2 + $0x348] sm:$0xff] }
  0x90   :  { %v493_v32 = vld [vmem:[#allocation2 + $0x8e0] sm:$0xff]  ;;  %898 = vmatpush.msrb.mxu3 %v693_v31  ;;  %v378_v31 = vld [vmem:[#allocation2 + $0x548] sm:$0xff] }
  0x91   :  { %v557_v33 = vld [vmem:[#allocation2 + $0xae0] sm:$0xff]  ;;  %840 = vmatpush.msrb.mxu0 %v493_v32  ;;  %v446_v32 = vld [vmem:[#allocation2 + $0x768] sm:$0xff] }
  0x92   :  { %v208_v34 = vld [vmem:[%s4172_s0 + $0x8] sm:$0xff]  ;;  %860 = vmatpush.msrb.mxu1 %v557_v33  ;;  %v246_v33 = vld [vmem:[#allocation2 + $0x128] sm:$0xff] }
  0x93   :  { %v621_v35 = vld [vmem:[#allocation2 + $0xce0] sm:$0xff]  ;;  %735 = vst [vmem:[#allocation1 + $0x20] ss:$4 sm:$0xff] %v208_v34  ;;  %v310_v34 = vld [vmem:[#allocation2 + $0x328] sm:$0xff] }
  0x94   :  { %v689_v36 = vld [vmem:[#allocation2 + $0xf00] sm:$0xff]  ;;  %880 = vmatpush.msrb.mxu2 %v621_v35  ;;  %v374_v35 = vld [vmem:[#allocation2 + $0x528] sm:$0xff] }
  0x95   :  { %v489_v37 = vld [vmem:[#allocation2 + $0x8c0] sm:$0xff]  ;;  %899 = vmatpush.msrb.mxu3 %v689_v36  ;;  %v442_v36 = vld [vmem:[#allocation2 + $0x748] sm:$0xff] }
  0x96   :  { %v553_v38 = vld [vmem:[#allocation2 + $0xac0] sm:$0xff]  ;;  %841 = vmatpush.msrb.mxu0 %v489_v37  ;;  %v242_v37 = vld [vmem:[#allocation2 + $0x108] sm:$0xff] }
  0x97   :  { %v617_v39 = vld [vmem:[#allocation2 + $0xcc0] sm:$0xff]  ;;  %861 = vmatpush.msrb.mxu1 %v553_v38  ;;  %v306_v38 = vld [vmem:[#allocation2 + $0x308] sm:$0xff] }
  0x98   :  { %v685_v40 = vld [vmem:[#allocation2 + $0xee0] sm:$0xff]  ;;  %881 = vmatpush.msrb.mxu2 %v617_v39  ;;  %v370_v39 = vld [vmem:[#allocation2 + $0x508] sm:$0xff] }
  0x99   :  { %v485_v41 = vld [vmem:[#allocation2 + $0x8a0] sm:$0xff]  ;;  %900 = vmatpush.msrb.mxu3 %v685_v40  ;;  %v438_v40 = vld [vmem:[#allocation2 + $0x728] sm:$0xff] }
  0x9a   :  { %v549_v42 = vld [vmem:[#allocation2 + $0xaa0] sm:$0xff]  ;;  %842 = vmatpush.msrb.mxu0 %v485_v41  ;;  %v3912_v17 = vld.sshfl [vmem:[#allocation1 + $0x30] sm:$0xff pattern:$0x73625140] }
  0x9b   :  { %v613_v43 = vld [vmem:[#allocation2 + $0xca0] sm:$0xff]  ;;  %862 = vmatpush.msrb.mxu1 %v549_v42  ;;  %v3914_v22 = vld.sshfl [vmem:[#allocation1 + $0x20] sm:$0xff pattern:$0x73625140]  ;;  %v238_v41 = vld [vmem:[#allocation2 + $0xe8] sm:$0xff] }
  0x9c   :  { %v681_v44 = vld [vmem:[#allocation2 + $0xec0] sm:$0xff]  ;;  %882 = vmatpush.msrb.mxu2 %v613_v43  ;;  %v3917_v23 = vld.sshfl [vmem:[#allocation1 + $0x38] sm:$0xff pattern:$0x73625140]  ;;  %v302_v42 = vld [vmem:[#allocation2 + $0x2e8] sm:$0xff] }
  0x9d   :  { %v481_v45 = vld [vmem:[#allocation2 + $0x880] sm:$0xff]  ;;  %901 = vmatpush.msrb.mxu3 %v681_v44  ;;  %v366_v43 = vld [vmem:[#allocation2 + $0x4e8] sm:$0xff] }
  0x9e   :  { %v545_v46 = vld [vmem:[#allocation2 + $0xa80] sm:$0xff]  ;;  %843 = vmatpush.msrb.mxu0 %v481_v45  ;;  %v434_v44 = vld [vmem:[#allocation2 + $0x708] sm:$0xff] }
  0x9f   :  { %v609_v47 = vld [vmem:[#allocation2 + $0xc80] sm:$0xff]  ;;  %863 = vmatpush.msrb.mxu1 %v545_v46  ;;  %v234_v45 = vld [vmem:[#allocation2 + $0xc8] sm:$0xff] }
  0xa0   :  { %v677_v48 = vld [vmem:[#allocation2 + $0xea0] sm:$0xff]  ;;  %883 = vmatpush.msrb.mxu2 %v609_v47  ;;  %v298_v46 = vld [vmem:[#allocation2 + $0x2c8] sm:$0xff] }
  0xa1   :  { %v477_v49 = vld [vmem:[#allocation2 + $0x860] sm:$0xff]  ;;  %902 = vmatpush.msrb.mxu3 %v677_v48  ;;  %v362_v47 = vld [vmem:[#allocation2 + $0x4c8] sm:$0xff] }
  0xa2   :  { %v541_v50 = vld [vmem:[#allocation2 + $0xa60] sm:$0xff]  ;;  %844 = vmatpush.msrb.mxu0 %v477_v49  ;;  %v430_v48 = vld [vmem:[#allocation2 + $0x6e8] sm:$0xff] }
  0xa3   :  { %v605_v51 = vld [vmem:[#allocation2 + $0xc60] sm:$0xff]  ;;  %864 = vmatpush.msrb.mxu1 %v541_v50  ;;  %v230_v49 = vld [vmem:[#allocation2 + $0xa8] sm:$0xff] }
  0xa4   :  { %v673_v52 = vld [vmem:[#allocation2 + $0xe80] sm:$0xff]  ;;  %884 = vmatpush.msrb.mxu2 %v605_v51  ;;  %v294_v50 = vld [vmem:[#allocation2 + $0x2a8] sm:$0xff] }
  0xa5   :  { %v473_v53 = vld [vmem:[#allocation2 + $0x840] sm:$0xff]  ;;  %903 = vmatpush.msrb.mxu3 %v673_v52  ;;  %v358_v51 = vld [vmem:[#allocation2 + $0x4a8] sm:$0xff] }
  0xa6   :  { %v537_v54 = vld [vmem:[#allocation2 + $0xa40] sm:$0xff]  ;;  %845 = vmatpush.msrb.mxu0 %v473_v53  ;;  %v426_v52 = vld [vmem:[#allocation2 + $0x6c8] sm:$0xff] }
  0xa7   :  { %v601_v55 = vld [vmem:[#allocation2 + $0xc40] sm:$0xff]  ;;  %865 = vmatpush.msrb.mxu1 %v537_v54  ;;  %v226_v53 = vld [vmem:[#allocation2 + $0x88] sm:$0xff] }
  0xa8   :  { %v669_v56 = vld [vmem:[#allocation2 + $0xe60] sm:$0xff]  ;;  %885 = vmatpush.msrb.mxu2 %v601_v55  ;;  %v290_v54 = vld [vmem:[#allocation2 + $0x288] sm:$0xff] }
  0xa9   :  { %v469_v57 = vld [vmem:[#allocation2 + $0x820] sm:$0xff]  ;;  %904 = vmatpush.msrb.mxu3 %v669_v56  ;;  %v354_v55 = vld [vmem:[#allocation2 + $0x488] sm:$0xff] }
  0xaa   :  { %v533_v58 = vld [vmem:[#allocation2 + $0xa20] sm:$0xff]  ;;  %846 = vmatpush.msrb.mxu0 %v469_v57  ;;  %v422_v56 = vld [vmem:[#allocation2 + $0x6a8] sm:$0xff] }
  0xab   :  { %v597_v59 = vld [vmem:[#allocation2 + $0xc20] sm:$0xff]  ;;  %866 = vmatpush.msrb.mxu1 %v533_v58  ;;  %v222_v57 = vld [vmem:[#allocation2 + $0x68] sm:$0xff] }
  0xac   :  { %v665_v60 = vld [vmem:[#allocation2 + $0xe40] sm:$0xff]  ;;  %886 = vmatpush.msrb.mxu2 %v597_v59  ;;  %v286_v58 = vld [vmem:[#allocation2 + $0x268] sm:$0xff] }
  0xad   :  { %v465_v62 = vld [vmem:[#allocation2 + $0x800] sm:$0xff]  ;;  %905 = vmatpush.msrb.mxu3 %v665_v60  ;;  %v350_v59 = vld [vmem:[#allocation2 + $0x468] sm:$0xff] }
  0xae   :  { %v529_v63 = vld [vmem:[#allocation2 + $0xa00] sm:$0xff]  ;;  %847 = vmatpush.msrb.mxu0 %v465_v62  ;;  %v418_v60 = vld [vmem:[#allocation2 + $0x688] sm:$0xff] }
  0xaf   :  { %v593_v0 = vld [vmem:[#allocation2 + $0xc00] sm:$0xff]  ;;  %867 = vmatpush.msrb.mxu1 %v529_v63  ;;  %848 = vmatmul.f32.vlgmr.msrb.gmra.mxu0 %v3914_v22  ;;  %v218_v62 = vld [vmem:[#allocation2 + $0x48] sm:$0xff] }
  0xb0   :  { %v661_v1 = vld [vmem:[#allocation2 + $0xe20] sm:$0xff]  ;;  %887 = vmatpush.msrb.mxu2 %v593_v0  ;;  %912 = vmatpush.msra.mxu0 %v270_v5  ;;  %v282_v63 = vld [vmem:[#allocation2 + $0x248] sm:$0xff] }
  0xb1   :  { %v3905_v3 = vld.sshfl [vmem:[#allocation1 + $0x8] sm:$0xff pattern:$0x73625140]  ;;  %906 = vmatpush.msrb.mxu3 %v661_v1  ;;  %888 = vmatmul.f32.vlgmr.msrb.gmra.mxu2 %v3912_v17  ;;  %v346_v0 = vld [vmem:[#allocation2 + $0x448] sm:$0xff] }
  0xb2   :  { %v657_v8 = vld [vmem:[#allocation2 + $0xe00] sm:$0xff]  ;;  %788 = vmatmul.f32.vlgmr.msra.gmra.mxu1 %v3905_v3  ;;  %952 = vmatpush.msra.mxu2 %v398_v7  ;;  %v414_v1 = vld [vmem:[#allocation2 + $0x668] sm:$0xff] }
  0xb3   :  { %932 = vmatpush.msra.mxu1 %v334_v6  ;;  %907 = vmatpush.msrb.mxu3 %v657_v8  ;;  %v3920_v28 = vld.sshfl [vmem:[#allocation1 + $0x28] sm:$0xff pattern:$0x73625140]  ;;  %v214_v5 = vld [vmem:[#allocation2 + $0x28] sm:$0xff] }
  0xb4   :  { %913 = vmatpush.msra.mxu0 %v266_v9  ;;  %953 = vmatpush.msra.mxu2 %v394_v11  ;;  %v278_v6 = vld [vmem:[#allocation2 + $0x228] sm:$0xff] }
  0xb5   :  { %933 = vmatpush.msra.mxu1 %v330_v10  ;;  %972 = vmatpush.msra.mxu3 %v462_v12  ;;  %v342_v7 = vld [vmem:[#allocation2 + $0x428] sm:$0xff] }
  0xb6   :  { %914 = vmatpush.msra.mxu0 %v262_v13  ;;  %954 = vmatpush.msra.mxu2 %v390_v15  ;;  %v410_v8 = vld [vmem:[#allocation2 + $0x648] sm:$0xff] }
  0xb7   :  { %934 = vmatpush.msra.mxu1 %v326_v14  ;;  %973 = vmatpush.msra.mxu3 %v458_v16  ;;  %v210_v9 = vld [vmem:[#allocation2 + $0x8] sm:$0xff] }
  0xb8   :  { %915 = vmatpush.msra.mxu0 %v258_v18  ;;  %955 = vmatpush.msra.mxu2 %v386_v20  ;;  %v274_v10 = vld [vmem:[#allocation2 + $0x208] sm:$0xff] }
  0xb9   :  { %935 = vmatpush.msra.mxu1 %v322_v19  ;;  %974 = vmatpush.msra.mxu3 %v454_v21  ;;  %v338_v11 = vld [vmem:[#allocation2 + $0x408] sm:$0xff] }
  0xba   :  { %908 = vmatmul.f32.vlgmr.msrb.gmra.mxu3 %v3917_v23  ;;  %916 = vmatpush.msra.mxu0 %v254_v24  ;;  %v406_v12 = vld [vmem:[#allocation2 + $0x628] sm:$0xff] }
  0xbb   :  { %936 = vmatpush.msra.mxu1 %v318_v25  ;;  %956 = vmatpush.msra.mxu2 %v382_v26  ;;  %v526_v13 = vld [vmem:[#allocation2 + $0x9e8] sm:$0xff] }
  0xbc   :  { %975 = vmatpush.msra.mxu3 %v450_v27  ;;  %868 = vmatmul.f32.vlgmr.msrb.gmra.mxu1 %v3920_v28  ;;  %v590_v14 = vld [vmem:[#allocation2 + $0xbe8] sm:$0xff] }
  0xbd   :  { %917 = vmatpush.msra.mxu0 %v250_v29  ;;  %937 = vmatpush.msra.mxu1 %v314_v30  ;;  %v654_v15 = vld [vmem:[#allocation2 + $0xde8] sm:$0xff] }
  0xbe   :  { %957 = vmatpush.msra.mxu2 %v378_v31  ;;  %976 = vmatpush.msra.mxu3 %v446_v32  ;;  %v402_v16 = vld [vmem:[#allocation2 + $0x608] sm:$0xff] }
  0xbf   :  { %918 = vmatpush.msra.mxu0 %v246_v33  ;;  %938 = vmatpush.msra.mxu1 %v310_v34  ;;  %v522_v18 = vld [vmem:[#allocation2 + $0x9c8] sm:$0xff] }
  0xc0   :  { %958 = vmatpush.msra.mxu2 %v374_v35  ;;  %977 = vmatpush.msra.mxu3 %v442_v36  ;;  %v586_v19 = vld [vmem:[#allocation2 + $0xbc8] sm:$0xff] }
  0xc1   :  { %919 = vmatpush.msra.mxu0 %v242_v37  ;;  %939 = vmatpush.msra.mxu1 %v306_v38  ;;  %v650_v20 = vld [vmem:[#allocation2 + $0xdc8] sm:$0xff] }
  0xc2   :  { %959 = vmatpush.msra.mxu2 %v370_v39  ;;  %978 = vmatpush.msra.mxu3 %v438_v40  ;;  %v718_v21 = vld [vmem:[#allocation2 + $0xfe8] sm:$0xff] }
  0xc3   :  { %920 = vmatpush.msra.mxu0 %v238_v41  ;;  %940 = vmatpush.msra.mxu1 %v302_v42  ;;  %v518_v24 = vld [vmem:[#allocation2 + $0x9a8] sm:$0xff] }
  0xc4   :  { %960 = vmatpush.msra.mxu2 %v366_v43  ;;  %979 = vmatpush.msra.mxu3 %v434_v44  ;;  %v582_v25 = vld [vmem:[#allocation2 + $0xba8] sm:$0xff] }
  0xc5   :  { %921 = vmatpush.msra.mxu0 %v234_v45  ;;  %941 = vmatpush.msra.mxu1 %v298_v46  ;;  %v646_v26 = vld [vmem:[#allocation2 + $0xda8] sm:$0xff] }
  0xc6   :  { %961 = vmatpush.msra.mxu2 %v362_v47  ;;  %980 = vmatpush.msra.mxu3 %v430_v48  ;;  %v714_v27 = vld [vmem:[#allocation2 + $0xfc8] sm:$0xff] }
  0xc7   :  { %922 = vmatpush.msra.mxu0 %v230_v49  ;;  %942 = vmatpush.msra.mxu1 %v294_v50  ;;  %v514_v29 = vld [vmem:[#allocation2 + $0x988] sm:$0xff] }
  0xc8   :  { %962 = vmatpush.msra.mxu2 %v358_v51  ;;  %981 = vmatpush.msra.mxu3 %v426_v52  ;;  %v578_v30 = vld [vmem:[#allocation2 + $0xb88] sm:$0xff] }
  0xc9   :  { %923 = vmatpush.msra.mxu0 %v226_v53  ;;  %943 = vmatpush.msra.mxu1 %v290_v54  ;;  %v642_v31 = vld [vmem:[#allocation2 + $0xd88] sm:$0xff] }
  0xca   :  { %963 = vmatpush.msra.mxu2 %v354_v55  ;;  %982 = vmatpush.msra.mxu3 %v422_v56  ;;  %v710_v32 = vld [vmem:[#allocation2 + $0xfa8] sm:$0xff] }
  0xcb   :  { %924 = vmatpush.msra.mxu0 %v222_v57  ;;  %944 = vmatpush.msra.mxu1 %v286_v58  ;;  %v510_v33 = vld [vmem:[#allocation2 + $0x968] sm:$0xff] }
  0xcc   :  { %964 = vmatpush.msra.mxu2 %v350_v59  ;;  %983 = vmatpush.msra.mxu3 %v418_v60  ;;  %v574_v34 = vld [vmem:[#allocation2 + $0xb68] sm:$0xff] }
  0xcd   :  { %925 = vmatpush.msra.mxu0 %v218_v62  ;;  %945 = vmatpush.msra.mxu1 %v282_v63  ;;  %v638_v35 = vld [vmem:[#allocation2 + $0xd68] sm:$0xff] }
  0xce   :  { %965 = vmatpush.msra.mxu2 %v346_v0  ;;  %984 = vmatpush.msra.mxu3 %v414_v1  ;;  %v706_v36 = vld [vmem:[#allocation2 + $0xf88] sm:$0xff] }
  0xcf   :  { %926 = vmatpush.msra.mxu0 %v214_v5  ;;  %946 = vmatpush.msra.mxu1 %v278_v6  ;;  %v506_v37 = vld [vmem:[#allocation2 + $0x948] sm:$0xff] }
  0xd0   :  { %966 = vmatpush.msra.mxu2 %v342_v7  ;;  %985 = vmatpush.msra.mxu3 %v410_v8  ;;  %v570_v38 = vld [vmem:[#allocation2 + $0xb48] sm:$0xff] }
  0xd1   :  { %927 = vmatpush.msra.mxu0 %v210_v9  ;;  %947 = vmatpush.msra.mxu1 %v274_v10  ;;  %v634_v39 = vld [vmem:[#allocation2 + $0xd48] sm:$0xff] }
  0xd2   :  { %967 = vmatpush.msra.mxu2 %v338_v11  ;;  %986 = vmatpush.msra.mxu3 %v406_v12  ;;  %v702_v40 = vld [vmem:[#allocation2 + $0xf68] sm:$0xff] }
  0xd3   :  { %992 = vmatpush.msrb.mxu0 %v526_v13  ;;  %1012 = vmatpush.msrb.mxu1 %v590_v14  ;;  %v502_v41 = vld [vmem:[#allocation2 + $0x928] sm:$0xff] }
  0xd4   :  { %1032 = vmatpush.msrb.mxu2 %v654_v15  ;;  %987 = vmatpush.msra.mxu3 %v402_v16  ;;  %v566_v42 = vld [vmem:[#allocation2 + $0xb28] sm:$0xff] }
  0xd5   :  { %993 = vmatpush.msrb.mxu0 %v522_v18  ;;  %1013 = vmatpush.msrb.mxu1 %v586_v19  ;;  %v630_v43 = vld [vmem:[#allocation2 + $0xd28] sm:$0xff] }
  0xd6   :  { %1033 = vmatpush.msrb.mxu2 %v650_v20  ;;  %1052 = vmatpush.msrb.mxu3 %v718_v21  ;;  %v698_v44 = vld [vmem:[#allocation2 + $0xf48] sm:$0xff] }
  0xd7   :  { %994 = vmatpush.msrb.mxu0 %v518_v24  ;;  %1014 = vmatpush.msrb.mxu1 %v582_v25  ;;  %v498_v45 = vld [vmem:[#allocation2 + $0x908] sm:$0xff]  ;;  %v271_v24 = vld [vmem:[#allocation2 + $0x1f0] sm:$0xff] }
  0xd8   :  { %1034 = vmatpush.msrb.mxu2 %v646_v26  ;;  %1053 = vmatpush.msrb.mxu3 %v714_v27  ;;  %v562_v46 = vld [vmem:[#allocation2 + $0xb08] sm:$0xff]  ;;  %v335_v25 = vld [vmem:[#allocation2 + $0x3f0] sm:$0xff] }
  0xd9   :  { %995 = vmatpush.msrb.mxu0 %v514_v29  ;;  %1015 = vmatpush.msrb.mxu1 %v578_v30  ;;  %v626_v47 = vld [vmem:[#allocation2 + $0xd08] sm:$0xff]  ;;  %v399_v26 = vld [vmem:[#allocation2 + $0x5f0] sm:$0xff] }
  0xda   :  { %1035 = vmatpush.msrb.mxu2 %v642_v31  ;;  %1054 = vmatpush.msrb.mxu3 %v710_v32  ;;  %v694_v48 = vld [vmem:[#allocation2 + $0xf28] sm:$0xff]  ;;  %v267_v29 = vld [vmem:[#allocation2 + $0x1d0] sm:$0xff] }
  0xdb   :  { %996 = vmatpush.msrb.mxu0 %v510_v33  ;;  %1016 = vmatpush.msrb.mxu1 %v574_v34  ;;  %v494_v49 = vld [vmem:[#allocation2 + $0x8e8] sm:$0xff]  ;;  %v331_v30 = vld [vmem:[#allocation2 + $0x3d0] sm:$0xff] }
  0xdc   :  { %1036 = vmatpush.msrb.mxu2 %v638_v35  ;;  %1055 = vmatpush.msrb.mxu3 %v706_v36  ;;  %v558_v50 = vld [vmem:[#allocation2 + $0xae8] sm:$0xff]  ;;  %v395_v31 = vld [vmem:[#allocation2 + $0x5d0] sm:$0xff] }
  0xdd   :  { %997 = vmatpush.msrb.mxu0 %v506_v37  ;;  %1017 = vmatpush.msrb.mxu1 %v570_v38  ;;  %v622_v51 = vld [vmem:[#allocation2 + $0xce8] sm:$0xff]  ;;  %v263_v32 = vld [vmem:[#allocation2 + $0x1b0] sm:$0xff] }
  0xde   :  { %1037 = vmatpush.msrb.mxu2 %v634_v39  ;;  %1056 = vmatpush.msrb.mxu3 %v702_v40  ;;  %v690_v52 = vld [vmem:[#allocation2 + $0xf08] sm:$0xff]  ;;  %v327_v33 = vld [vmem:[#allocation2 + $0x3b0] sm:$0xff] }
  0xdf   :  { %998 = vmatpush.msrb.mxu0 %v502_v41  ;;  %1018 = vmatpush.msrb.mxu1 %v566_v42  ;;  %v490_v53 = vld [vmem:[#allocation2 + $0x8c8] sm:$0xff]  ;;  %v391_v34 = vld [vmem:[#allocation2 + $0x5b0] sm:$0xff] }
  0xe0   :  { %1038 = vmatpush.msrb.mxu2 %v630_v43  ;;  %1057 = vmatpush.msrb.mxu3 %v698_v44  ;;  %v554_v54 = vld [vmem:[#allocation2 + $0xac8] sm:$0xff]  ;;  %v259_v35 = vld [vmem:[#allocation2 + $0x190] sm:$0xff] }
  0xe1   :  { %999 = vmatpush.msrb.mxu0 %v498_v45  ;;  %1019 = vmatpush.msrb.mxu1 %v562_v46  ;;  %v618_v55 = vld [vmem:[#allocation2 + $0xcc8] sm:$0xff]  ;;  %v455_v36 = vld [vmem:[#allocation2 + $0x7b0] sm:$0xff] }
  0xe2   :  { %1039 = vmatpush.msrb.mxu2 %v626_v47  ;;  %1058 = vmatpush.msrb.mxu3 %v694_v48  ;;  %v686_v56 = vld [vmem:[#allocation2 + $0xee8] sm:$0xff]  ;;  %v255_v37 = vld [vmem:[#allocation2 + $0x170] sm:$0xff] }
  0xe3   :  { %1000 = vmatpush.msrb.mxu0 %v494_v49  ;;  %1020 = vmatpush.msrb.mxu1 %v558_v50  ;;  %v486_v57 = vld [vmem:[#allocation2 + $0x8a8] sm:$0xff]  ;;  %v319_v38 = vld [vmem:[#allocation2 + $0x370] sm:$0xff] }
  0xe4   :  { %1040 = vmatpush.msrb.mxu2 %v622_v51  ;;  %1059 = vmatpush.msrb.mxu3 %v690_v52  ;;  %v550_v58 = vld [vmem:[#allocation2 + $0xaa8] sm:$0xff]  ;;  %v383_v39 = vld [vmem:[#allocation2 + $0x570] sm:$0xff] }
  0xe5   :  { %1001 = vmatpush.msrb.mxu0 %v490_v53  ;;  %1021 = vmatpush.msrb.mxu1 %v554_v54  ;;  %v614_v59 = vld [vmem:[#allocation2 + $0xca8] sm:$0xff]  ;;  %v451_v40 = vld [vmem:[#allocation2 + $0x790] sm:$0xff] }
  0xe6   :  { %v682_v60 = vld [vmem:[#allocation2 + $0xec8] sm:$0xff]  ;;  %1041 = vmatpush.msrb.mxu2 %v618_v55  ;;  %1060 = vmatpush.msrb.mxu3 %v686_v56  ;;  %v251_v41 = vld [vmem:[#allocation2 + $0x150] sm:$0xff] }
  0xe7   :  { %v482_v62 = vld [vmem:[#allocation2 + $0x888] sm:$0xff]  ;;  %1002 = vmatpush.msrb.mxu0 %v486_v57  ;;  %1022 = vmatpush.msrb.mxu1 %v550_v58  ;;  %v315_v42 = vld [vmem:[#allocation2 + $0x350] sm:$0xff] }
  0xe8   :  { %v546_v63 = vld [vmem:[#allocation2 + $0xa88] sm:$0xff]  ;;  %1042 = vmatpush.msrb.mxu2 %v614_v59  ;;  %1061 = vmatpush.msrb.mxu3 %v682_v60  ;;  %v379_v43 = vld [vmem:[#allocation2 + $0x550] sm:$0xff] }
  0xe9   :  { %v610_v0 = vld [vmem:[#allocation2 + $0xc88] sm:$0xff]  ;;  %1003 = vmatpush.msrb.mxu0 %v482_v62  ;;  %1023 = vmatpush.msrb.mxu1 %v546_v63  ;;  %v447_v44 = vld [vmem:[#allocation2 + $0x770] sm:$0xff] }
  0xea   :  { %v678_v1 = vld [vmem:[#allocation2 + $0xea8] sm:$0xff]  ;;  %1043 = vmatpush.msrb.mxu2 %v610_v0  ;;  %928 = vmatmul.f32.vlgmr.msra.gmra.mxu0 %v3902_v2  ;;  %v459_v2 = vld [vmem:[#allocation2 + $0x7d0] sm:$0xff] }
  0xeb   :  { %v478_v5 = vld [vmem:[#allocation2 + $0x868] sm:$0xff]  ;;  %1062 = vmatpush.msrb.mxu3 %v678_v1  ;;  %968 = vmatmul.f32.vlgmr.msra.gmra.mxu2 %v3900_v61  ;;  %v463_v61 = vld [vmem:[#allocation2 + $0x7f0] sm:$0xff] }
  0xec   :  { %v542_v6 = vld [vmem:[#allocation2 + $0xa68] sm:$0xff]  ;;  %1004 = vmatpush.msrb.mxu0 %v478_v5  ;;  %948 = vmatmul.f32.vlgmr.msra.gmra.mxu1 %v3905_v3  ;;  %v323_v3 = vld [vmem:[#allocation2 + $0x390] sm:$0xff] }
  0xed   :  { %v606_v7 = vld [vmem:[#allocation2 + $0xc68] sm:$0xff]  ;;  %1024 = vmatpush.msrb.mxu1 %v542_v6  ;;  %988 = vmatmul.f32.vlgmr.msra.gmra.mxu3 %v3907_v4  ;;  %v387_v4 = vld [vmem:[#allocation2 + $0x590] sm:$0xff] }
  0xee   :  { %v674_v8 = vld [vmem:[#allocation2 + $0xe88] sm:$0xff]  ;;  %1044 = vmatpush.msrb.mxu2 %v606_v7  ;;  %v311_v45 = vld [vmem:[#allocation2 + $0x330] sm:$0xff] }
  0xef   :  { %v474_v9 = vld [vmem:[#allocation2 + $0x848] sm:$0xff]  ;;  %1063 = vmatpush.msrb.mxu3 %v674_v8  ;;  %v375_v46 = vld [vmem:[#allocation2 + $0x530] sm:$0xff] }
  0xf0   :  { %v538_v10 = vld [vmem:[#allocation2 + $0xa48] sm:$0xff]  ;;  %1005 = vmatpush.msrb.mxu0 %v474_v9  ;;  %v443_v47 = vld [vmem:[#allocation2 + $0x750] sm:$0xff] }
  0xf1   :  { %v602_v11 = vld [vmem:[#allocation2 + $0xc48] sm:$0xff]  ;;  %1025 = vmatpush.msrb.mxu1 %v538_v10  ;;  %v371_v48 = vld [vmem:[#allocation2 + $0x510] sm:$0xff] }
  0xf2   :  { %v670_v12 = vld [vmem:[#allocation2 + $0xe68] sm:$0xff]  ;;  %1045 = vmatpush.msrb.mxu2 %v602_v11  ;;  %v439_v49 = vld [vmem:[#allocation2 + $0x730] sm:$0xff] }
  0xf3   :  { %v470_v13 = vld [vmem:[#allocation2 + $0x828] sm:$0xff]  ;;  %1064 = vmatpush.msrb.mxu3 %v670_v12  ;;  %v239_v50 = vld [vmem:[#allocation2 + $0xf0] sm:$0xff] }
  0xf4   :  { %v534_v14 = vld [vmem:[#allocation2 + $0xa28] sm:$0xff]  ;;  %1006 = vmatpush.msrb.mxu0 %v470_v13  ;;  %v303_v51 = vld [vmem:[#allocation2 + $0x2f0] sm:$0xff] }
  0xf5   :  { %v598_v15 = vld [vmem:[#allocation2 + $0xc28] sm:$0xff]  ;;  %1026 = vmatpush.msrb.mxu1 %v534_v14  ;;  %v435_v52 = vld [vmem:[#allocation2 + $0x710] sm:$0xff] }
  0xf6   :  { %v666_v16 = vld [vmem:[#allocation2 + $0xe48] sm:$0xff]  ;;  %1046 = vmatpush.msrb.mxu2 %v598_v15  ;;  %v235_v53 = vld [vmem:[#allocation2 + $0xd0] sm:$0xff] }
  0xf7   :  { %v466_v18 = vld [vmem:[#allocation2 + $0x808] sm:$0xff]  ;;  %1065 = vmatpush.msrb.mxu3 %v666_v16  ;;  %v299_v54 = vld [vmem:[#allocation2 + $0x2d0] sm:$0xff] }
  0xf8   :  { %v530_v19 = vld [vmem:[#allocation2 + $0xa08] sm:$0xff]  ;;  %1007 = vmatpush.msrb.mxu0 %v466_v18  ;;  %v363_v55 = vld [vmem:[#allocation2 + $0x4d0] sm:$0xff] }
  0xf9   :  { %v594_v20 = vld [vmem:[#allocation2 + $0xc08] sm:$0xff]  ;;  %1027 = vmatpush.msrb.mxu1 %v530_v19  ;;  %1008 = vmatmul.f32.vlgmr.msrb.gmra.mxu0 %v3914_v22  ;;  %v243_v22 = vld [vmem:[#allocation2 + $0x110] sm:$0xff] }
  0xfa   :  { %v662_v21 = vld [vmem:[#allocation2 + $0xe28] sm:$0xff]  ;;  %1047 = vmatpush.msrb.mxu2 %v594_v20  ;;  %1072 = vmatpush.msra.mxu0 %v271_v24  ;;  %v431_v56 = vld [vmem:[#allocation2 + $0x6f0] sm:$0xff] }
  0xfb   :  { %1066 = vmatpush.msrb.mxu3 %v662_v21  ;;  %v658_v27 = vld [vmem:[#allocation2 + $0xe08] sm:$0xff]  ;;  %1092 = vmatpush.msra.mxu1 %v335_v25  ;;  %v231_v57 = vld [vmem:[#allocation2 + $0xb0] sm:$0xff] }
  0xfc   :  { %1112 = vmatpush.msra.mxu2 %v399_v26  ;;  %1073 = vmatpush.msra.mxu0 %v267_v29  ;;  %v295_v58 = vld [vmem:[#allocation2 + $0x2b0] sm:$0xff] }
  0xfd   :  { %1067 = vmatpush.msrb.mxu3 %v658_v27  ;;  %1093 = vmatpush.msra.mxu1 %v331_v30  ;;  %v359_v59 = vld [vmem:[#allocation2 + $0x4b0] sm:$0xff] }
  0xfe   :  { %1113 = vmatpush.msra.mxu2 %v395_v31  ;;  %1074 = vmatpush.msra.mxu0 %v263_v32  ;;  %v427_v60 = vld [vmem:[#allocation2 + $0x6d0] sm:$0xff] }
  0xff   :  { %1132 = vmatpush.msra.mxu3 %v463_v61  ;;  %1094 = vmatpush.msra.mxu1 %v327_v33  ;;  %v227_v62 = vld [vmem:[#allocation2 + $0x90] sm:$0xff] }
 0x100   :  { %1114 = vmatpush.msra.mxu2 %v391_v34  ;;  %1075 = vmatpush.msra.mxu0 %v259_v35  ;;  %v291_v63 = vld [vmem:[#allocation2 + $0x290] sm:$0xff] }
 0x101   :  { %1133 = vmatpush.msra.mxu3 %v459_v2  ;;  %1048 = vmatmul.f32.vlgmr.msrb.gmra.mxu2 %v3912_v17  ;;  %v247_v17 = vld [vmem:[#allocation2 + $0x130] sm:$0xff] }
 0x102   :  { %1095 = vmatpush.msra.mxu1 %v323_v3  ;;  %1115 = vmatpush.msra.mxu2 %v387_v4  ;;  %v355_v0 = vld [vmem:[#allocation2 + $0x490] sm:$0xff] }
 0x103   :  { %1134 = vmatpush.msra.mxu3 %v455_v36  ;;  %1076 = vmatpush.msra.mxu0 %v255_v37  ;;  %v423_v1 = vld [vmem:[#allocation2 + $0x6b0] sm:$0xff] }
 0x104   :  { %1068 = vmatmul.f32.vlgmr.msrb.gmra.mxu3 %v3917_v23  ;;  %1096 = vmatpush.msra.mxu1 %v319_v38  ;;  %v307_v23 = vld [vmem:[#allocation2 + $0x310] sm:$0xff] }
 0x105   :  { %1116 = vmatpush.msra.mxu2 %v383_v39  ;;  %1135 = vmatpush.msra.mxu3 %v451_v40  ;;  %v223_v5 = vld [vmem:[#allocation2 + $0x70] sm:$0xff] }
 0x106   :  { %1028 = vmatmul.f32.vlgmr.msrb.gmra.mxu1 %v3920_v28  ;;  %1077 = vmatpush.msra.mxu0 %v251_v41  ;;  %v367_v28 = vld [vmem:[#allocation2 + $0x4f0] sm:$0xff] }
 0x107   :  { %1097 = vmatpush.msra.mxu1 %v315_v42  ;;  %1117 = vmatpush.msra.mxu2 %v379_v43  ;;  %v287_v6 = vld [vmem:[#allocation2 + $0x270] sm:$0xff] }
 0x108   :  { %1136 = vmatpush.msra.mxu3 %v447_v44  ;;  %1078 = vmatpush.msra.mxu0 %v247_v17  ;;  %v351_v7 = vld [vmem:[#allocation2 + $0x470] sm:$0xff] }
 0x109   :  { %1098 = vmatpush.msra.mxu1 %v311_v45  ;;  %1118 = vmatpush.msra.mxu2 %v375_v46  ;;  %v419_v8 = vld [vmem:[#allocation2 + $0x690] sm:$0xff] }
 0x10a   :  { %1137 = vmatpush.msra.mxu3 %v443_v47  ;;  %1079 = vmatpush.msra.mxu0 %v243_v22  ;;  %v219_v9 = vld [vmem:[#allocation2 + $0x50] sm:$0xff] }
 0x10b   :  { %1099 = vmatpush.msra.mxu1 %v307_v23  ;;  %1119 = vmatpush.msra.mxu2 %v371_v48  ;;  %v283_v10 = vld [vmem:[#allocation2 + $0x250] sm:$0xff] }
 0x10c   :  { %1138 = vmatpush.msra.mxu3 %v439_v49  ;;  %1080 = vmatpush.msra.mxu0 %v239_v50  ;;  %v347_v11 = vld [vmem:[#allocation2 + $0x450] sm:$0xff] }
 0x10d   :  { %1100 = vmatpush.msra.mxu1 %v303_v51  ;;  %1120 = vmatpush.msra.mxu2 %v367_v28  ;;  %v415_v12 = vld [vmem:[#allocation2 + $0x670] sm:$0xff] }
 0x10e   :  { %1139 = vmatpush.msra.mxu3 %v435_v52  ;;  %1081 = vmatpush.msra.mxu0 %v235_v53  ;;  %v215_v13 = vld [vmem:[#allocation2 + $0x30] sm:$0xff] }
 0x10f   :  { %1101 = vmatpush.msra.mxu1 %v299_v54  ;;  %1121 = vmatpush.msra.mxu2 %v363_v55  ;;  %v279_v14 = vld [vmem:[#allocation2 + $0x230] sm:$0xff] }
 0x110   :  { %1140 = vmatpush.msra.mxu3 %v431_v56  ;;  %1082 = vmatpush.msra.mxu0 %v231_v57  ;;  %v343_v15 = vld [vmem:[#allocation2 + $0x430] sm:$0xff] }
 0x111   :  { %1102 = vmatpush.msra.mxu1 %v295_v58  ;;  %1122 = vmatpush.msra.mxu2 %v359_v59  ;;  %v411_v16 = vld [vmem:[#allocation2 + $0x650] sm:$0xff] }
 0x112   :  { %1141 = vmatpush.msra.mxu3 %v427_v60  ;;  %1083 = vmatpush.msra.mxu0 %v227_v62  ;;  %v211_v18 = vld [vmem:[#allocation2 + $0x10] sm:$0xff] }
 0x113   :  { %1103 = vmatpush.msra.mxu1 %v291_v63  ;;  %1123 = vmatpush.msra.mxu2 %v355_v0  ;;  %v275_v19 = vld [vmem:[#allocation2 + $0x210] sm:$0xff] }
 0x114   :  { %1142 = vmatpush.msra.mxu3 %v423_v1  ;;  %1084 = vmatpush.msra.mxu0 %v223_v5  ;;  %v339_v20 = vld [vmem:[#allocation2 + $0x410] sm:$0xff] }
 0x115   :  { %1104 = vmatpush.msra.mxu1 %v287_v6  ;;  %1124 = vmatpush.msra.mxu2 %v351_v7  ;;  %v407_v21 = vld [vmem:[#allocation2 + $0x630] sm:$0xff] }
 0x116   :  { %1143 = vmatpush.msra.mxu3 %v419_v8  ;;  %1085 = vmatpush.msra.mxu0 %v219_v9  ;;  %v527_v24 = vld [vmem:[#allocation2 + $0x9f0] sm:$0xff]  ;;  %v3932_v9 = vld.sshfl [vmem:[#allocation1 + $0x10] sm:$0xff pattern:$0x73625140] }
 0x117   :  { %1105 = vmatpush.msra.mxu1 %v283_v10  ;;  %1125 = vmatpush.msra.mxu2 %v347_v11  ;;  %v591_v25 = vld [vmem:[#allocation2 + $0xbf0] sm:$0xff] }
 0x118   :  { %1144 = vmatpush.msra.mxu3 %v415_v12  ;;  %1086 = vmatpush.msra.mxu0 %v215_v13  ;;  %v655_v26 = vld [vmem:[#allocation2 + $0xdf0] sm:$0xff]  ;;  %v3935_v13 = vld.sshfl [vmem:[#allocation1] sm:$0xff pattern:$0x73625140] }
 0x119   :  { %1106 = vmatpush.msra.mxu1 %v279_v14  ;;  %1126 = vmatpush.msra.mxu2 %v343_v15  ;;  %v403_v27 = vld [vmem:[#allocation2 + $0x610] sm:$0xff] }
 0x11a   :  { %1145 = vmatpush.msra.mxu3 %v411_v16  ;;  %1087 = vmatpush.msra.mxu0 %v211_v18  ;;  %v523_v29 = vld [vmem:[#allocation2 + $0x9d0] sm:$0xff] }
 0x11b   :  { %1107 = vmatpush.msra.mxu1 %v275_v19  ;;  %1127 = vmatpush.msra.mxu2 %v339_v20  ;;  %v587_v30 = vld [vmem:[#allocation2 + $0xbd0] sm:$0xff] }
 0x11c   :  { %1146 = vmatpush.msra.mxu3 %v407_v21  ;;  %1152 = vmatpush.msrb.mxu0 %v527_v24  ;;  %v651_v31 = vld [vmem:[#allocation2 + $0xdd0] sm:$0xff]  ;;  %v3941_v21 = vld.sshfl [vmem:[#allocation1 + $0x8] sm:$0xff pattern:$0x73625140] }
 0x11d   :  { %1172 = vmatpush.msrb.mxu1 %v591_v25  ;;  %v719_v61 = vld [vmem:[#allocation2 + $0xff0] sm:$0xff]  ;;  %1192 = vmatpush.msrb.mxu2 %v655_v26 }
 0x11e   :  { %1147 = vmatpush.msra.mxu3 %v403_v27  ;;  %v519_v32 = vld [vmem:[#allocation2 + $0x9b0] sm:$0xff]  ;;  %1153 = vmatpush.msrb.mxu0 %v523_v29  ;;  %v272_v29 = vld [vmem:[#allocation2 + $0x1f8] sm:$0xff] }
 0x11f   :  { %v583_v33 = vld [vmem:[#allocation2 + $0xbb0] sm:$0xff]  ;;  %1173 = vmatpush.msrb.mxu1 %v587_v30  ;;  %1193 = vmatpush.msrb.mxu2 %v651_v31  ;;  %v336_v30 = vld [vmem:[#allocation2 + $0x3f8] sm:$0xff] }
 0x120   :  { %v647_v34 = vld [vmem:[#allocation2 + $0xdb0] sm:$0xff]  ;;  %1212 = vmatpush.msrb.mxu3 %v719_v61  ;;  %1154 = vmatpush.msrb.mxu0 %v519_v32  ;;  %v400_v31 = vld [vmem:[#allocation2 + $0x5f8] sm:$0xff]  ;;  %v3944_v32 = vld.sshfl [vmem:[#allocation1 + $0x30] sm:$0xff pattern:$0x73625140] }
 0x121   :  { %v715_v2 = vld [vmem:[#allocation2 + $0xfd0] sm:$0xff]  ;;  %1174 = vmatpush.msrb.mxu1 %v583_v33  ;;  %1194 = vmatpush.msrb.mxu2 %v647_v34  ;;  %v268_v33 = vld [vmem:[#allocation2 + $0x1d8] sm:$0xff] }
 0x122   :  { %v515_v35 = vld [vmem:[#allocation2 + $0x990] sm:$0xff]  ;;  %1213 = vmatpush.msrb.mxu3 %v715_v2  ;;  %1128 = vmatmul.f32.vlgmr.msra.gmra.mxu2 %v3932_v9  ;;  %v332_v34 = vld [vmem:[#allocation2 + $0x3d8] sm:$0xff] }
 0x123   :  { %v579_v3 = vld [vmem:[#allocation2 + $0xb90] sm:$0xff]  ;;  %1155 = vmatpush.msrb.mxu0 %v515_v35  ;;  %1108 = vmatmul.f32.vlgmr.msra.gmra.mxu1 %v3941_v21  ;;  %v396_v2 = vld [vmem:[#allocation2 + $0x5d8] sm:$0xff] }
 0x124   :  { %v643_v4 = vld [vmem:[#allocation2 + $0xd90] sm:$0xff]  ;;  %1175 = vmatpush.msrb.mxu1 %v579_v3  ;;  %1088 = vmatmul.f32.vlgmr.msra.gmra.mxu0 %v3935_v13  ;;  %v3947_v35 = vld.sshfl [vmem:[#allocation1 + $0x20] sm:$0xff pattern:$0x73625140] }
 0x125   :  { %v711_v36 = vld [vmem:[#allocation2 + $0xfb0] sm:$0xff]  ;;  %1195 = vmatpush.msrb.mxu2 %v643_v4  ;;  %v464_v3 = vld [vmem:[#allocation2 + $0x7f8] sm:$0xff] }
 0x126   :  { %v511_v37 = vld [vmem:[#allocation2 + $0x970] sm:$0xff]  ;;  %1214 = vmatpush.msrb.mxu3 %v711_v36  ;;  %v264_v36 = vld [vmem:[#allocation2 + $0x1b8] sm:$0xff] }
 0x127   :  { %v575_v38 = vld [vmem:[#allocation2 + $0xb70] sm:$0xff]  ;;  %1156 = vmatpush.msrb.mxu0 %v511_v37  ;;  %v328_v37 = vld [vmem:[#allocation2 + $0x3b8] sm:$0xff] }
 0x128   :  { %v639_v39 = vld [vmem:[#allocation2 + $0xd70] sm:$0xff]  ;;  %1176 = vmatpush.msrb.mxu1 %v575_v38  ;;  %v392_v38 = vld [vmem:[#allocation2 + $0x5b8] sm:$0xff] }
 0x129   :  { %v707_v40 = vld [vmem:[#allocation2 + $0xf90] sm:$0xff]  ;;  %1196 = vmatpush.msrb.mxu2 %v639_v39  ;;  %v460_v39 = vld [vmem:[#allocation2 + $0x7d8] sm:$0xff] }
 0x12a   :  { %v507_v41 = vld [vmem:[#allocation2 + $0x950] sm:$0xff]  ;;  %1215 = vmatpush.msrb.mxu3 %v707_v40  ;;  %v3953_v40 = vld.sshfl [vmem:[#allocation1 + $0x28] sm:$0xff pattern:$0x73625140] }
 0x12b   :  { %v571_v42 = vld [vmem:[#allocation2 + $0xb50] sm:$0xff]  ;;  %1157 = vmatpush.msrb.mxu0 %v507_v41  ;;  %v260_v41 = vld [vmem:[#allocation2 + $0x198] sm:$0xff] }
 0x12c   :  { %v635_v43 = vld [vmem:[#allocation2 + $0xd50] sm:$0xff]  ;;  %1177 = vmatpush.msrb.mxu1 %v571_v42  ;;  %v324_v42 = vld [vmem:[#allocation2 + $0x398] sm:$0xff] }
 0x12d   :  { %v703_v44 = vld [vmem:[#allocation2 + $0xf70] sm:$0xff]  ;;  %1197 = vmatpush.msrb.mxu2 %v635_v43  ;;  %v388_v43 = vld [vmem:[#allocation2 + $0x598] sm:$0xff] }
 0x12e   :  { %v503_v17 = vld [vmem:[#allocation2 + $0x930] sm:$0xff]  ;;  %1216 = vmatpush.msrb.mxu3 %v703_v44  ;;  %v456_v44 = vld [vmem:[#allocation2 + $0x7b8] sm:$0xff] }
 0x12f   :  { %v567_v45 = vld [vmem:[#allocation2 + $0xb30] sm:$0xff]  ;;  %1158 = vmatpush.msrb.mxu0 %v503_v17  ;;  %v256_v17 = vld [vmem:[#allocation2 + $0x178] sm:$0xff] }
 0x130   :  { %v631_v46 = vld [vmem:[#allocation2 + $0xd30] sm:$0xff]  ;;  %1178 = vmatpush.msrb.mxu1 %v567_v45  ;;  %v320_v45 = vld [vmem:[#allocation2 + $0x378] sm:$0xff] }
 0x131   :  { %v699_v47 = vld [vmem:[#allocation2 + $0xf50] sm:$0xff]  ;;  %1198 = vmatpush.msrb.mxu2 %v631_v46  ;;  %v384_v46 = vld [vmem:[#allocation2 + $0x578] sm:$0xff] }
 0x132   :  { %v499_v22 = vld [vmem:[#allocation2 + $0x910] sm:$0xff]  ;;  %1217 = vmatpush.msrb.mxu3 %v699_v47  ;;  %v452_v47 = vld [vmem:[#allocation2 + $0x798] sm:$0xff] }
 0x133   :  { %v563_v23 = vld [vmem:[#allocation2 + $0xb10] sm:$0xff]  ;;  %1159 = vmatpush.msrb.mxu0 %v499_v22  ;;  %v252_v22 = vld [vmem:[#allocation2 + $0x158] sm:$0xff] }
 0x134   :  { %v627_v48 = vld [vmem:[#allocation2 + $0xd10] sm:$0xff]  ;;  %1179 = vmatpush.msrb.mxu1 %v563_v23  ;;  %v316_v23 = vld [vmem:[#allocation2 + $0x358] sm:$0xff] }
 0x135   :  { %v695_v49 = vld [vmem:[#allocation2 + $0xf30] sm:$0xff]  ;;  %1199 = vmatpush.msrb.mxu2 %v627_v48  ;;  %v380_v48 = vld [vmem:[#allocation2 + $0x558] sm:$0xff] }
 0x136   :  { %v495_v50 = vld [vmem:[#allocation2 + $0x8f0] sm:$0xff]  ;;  %1218 = vmatpush.msrb.mxu3 %v695_v49  ;;  %v448_v49 = vld [vmem:[#allocation2 + $0x778] sm:$0xff] }
 0x137   :  { %v559_v51 = vld [vmem:[#allocation2 + $0xaf0] sm:$0xff]  ;;  %1160 = vmatpush.msrb.mxu0 %v495_v50  ;;  %v248_v50 = vld [vmem:[#allocation2 + $0x138] sm:$0xff] }
 0x138   :  { %v623_v28 = vld [vmem:[#allocation2 + $0xcf0] sm:$0xff]  ;;  %1180 = vmatpush.msrb.mxu1 %v559_v51  ;;  %v312_v51 = vld [vmem:[#allocation2 + $0x338] sm:$0xff] }
 0x139   :  { %v691_v52 = vld [vmem:[#allocation2 + $0xf10] sm:$0xff]  ;;  %1200 = vmatpush.msrb.mxu2 %v623_v28  ;;  %v376_v28 = vld [vmem:[#allocation2 + $0x538] sm:$0xff] }
 0x13a   :  { %v491_v53 = vld [vmem:[#allocation2 + $0x8d0] sm:$0xff]  ;;  %1219 = vmatpush.msrb.mxu3 %v691_v52  ;;  %v444_v52 = vld [vmem:[#allocation2 + $0x758] sm:$0xff] }
 0x13b   :  { %v555_v54 = vld [vmem:[#allocation2 + $0xad0] sm:$0xff]  ;;  %1161 = vmatpush.msrb.mxu0 %v491_v53  ;;  %v244_v53 = vld [vmem:[#allocation2 + $0x118] sm:$0xff] }
 0x13c   :  { %v619_v55 = vld [vmem:[#allocation2 + $0xcd0] sm:$0xff]  ;;  %1181 = vmatpush.msrb.mxu1 %v555_v54  ;;  %v308_v54 = vld [vmem:[#allocation2 + $0x318] sm:$0xff] }
 0x13d   :  { %v687_v56 = vld [vmem:[#allocation2 + $0xef0] sm:$0xff]  ;;  %1201 = vmatpush.msrb.mxu2 %v619_v55  ;;  %v372_v55 = vld [vmem:[#allocation2 + $0x518] sm:$0xff] }
 0x13e   :  { %v487_v57 = vld [vmem:[#allocation2 + $0x8b0] sm:$0xff]  ;;  %1220 = vmatpush.msrb.mxu3 %v687_v56  ;;  %v440_v56 = vld [vmem:[#allocation2 + $0x738] sm:$0xff] }
 0x13f   :  { %v551_v58 = vld [vmem:[#allocation2 + $0xab0] sm:$0xff]  ;;  %1162 = vmatpush.msrb.mxu0 %v487_v57  ;;  %v240_v57 = vld [vmem:[#allocation2 + $0xf8] sm:$0xff] }
 0x140   :  { %v615_v59 = vld [vmem:[#allocation2 + $0xcb0] sm:$0xff]  ;;  %1182 = vmatpush.msrb.mxu1 %v551_v58  ;;  %v304_v58 = vld [vmem:[#allocation2 + $0x2f8] sm:$0xff] }
 0x141   :  { %v683_v60 = vld [vmem:[#allocation2 + $0xed0] sm:$0xff]  ;;  %1202 = vmatpush.msrb.mxu2 %v615_v59  ;;  %v368_v59 = vld [vmem:[#allocation2 + $0x4f8] sm:$0xff] }
 0x142   :  { %v483_v62 = vld [vmem:[#allocation2 + $0x890] sm:$0xff]  ;;  %1221 = vmatpush.msrb.mxu3 %v683_v60  ;;  %v436_v60 = vld [vmem:[#allocation2 + $0x718] sm:$0xff] }
 0x143   :  { %v547_v63 = vld [vmem:[#allocation2 + $0xa90] sm:$0xff]  ;;  %1163 = vmatpush.msrb.mxu0 %v483_v62  ;;  %v236_v62 = vld [vmem:[#allocation2 + $0xd8] sm:$0xff] }
 0x144   :  { %v611_v0 = vld [vmem:[#allocation2 + $0xc90] sm:$0xff]  ;;  %1183 = vmatpush.msrb.mxu1 %v547_v63  ;;  %v300_v63 = vld [vmem:[#allocation2 + $0x2d8] sm:$0xff] }
 0x145   :  { %v679_v1 = vld [vmem:[#allocation2 + $0xeb0] sm:$0xff]  ;;  %1203 = vmatpush.msrb.mxu2 %v611_v0  ;;  %v364_v0 = vld [vmem:[#allocation2 + $0x4d8] sm:$0xff] }
 0x146   :  { %v479_v5 = vld [vmem:[#allocation2 + $0x870] sm:$0xff]  ;;  %1222 = vmatpush.msrb.mxu3 %v679_v1  ;;  %v432_v1 = vld [vmem:[#allocation2 + $0x6f8] sm:$0xff] }
 0x147   :  { %v543_v6 = vld [vmem:[#allocation2 + $0xa70] sm:$0xff]  ;;  %1164 = vmatpush.msrb.mxu0 %v479_v5  ;;  %v232_v5 = vld [vmem:[#allocation2 + $0xb8] sm:$0xff] }
 0x148   :  { %v607_v7 = vld [vmem:[#allocation2 + $0xc70] sm:$0xff]  ;;  %1184 = vmatpush.msrb.mxu1 %v543_v6  ;;  %v296_v6 = vld [vmem:[#allocation2 + $0x2b8] sm:$0xff] }
 0x149   :  { %v675_v8 = vld [vmem:[#allocation2 + $0xe90] sm:$0xff]  ;;  %1204 = vmatpush.msrb.mxu2 %v607_v7  ;;  %v360_v7 = vld [vmem:[#allocation2 + $0x4b8] sm:$0xff] }
 0x14a   :  { %v475_v10 = vld [vmem:[#allocation2 + $0x850] sm:$0xff]  ;;  %1223 = vmatpush.msrb.mxu3 %v675_v8  ;;  %v428_v8 = vld [vmem:[#allocation2 + $0x6d8] sm:$0xff] }
 0x14b   :  { %v539_v11 = vld [vmem:[#allocation2 + $0xa50] sm:$0xff]  ;;  %1165 = vmatpush.msrb.mxu0 %v475_v10  ;;  %v228_v10 = vld [vmem:[#allocation2 + $0x98] sm:$0xff] }
 0x14c   :  { %v603_v12 = vld [vmem:[#allocation2 + $0xc50] sm:$0xff]  ;;  %1185 = vmatpush.msrb.mxu1 %v539_v11  ;;  %v292_v11 = vld [vmem:[#allocation2 + $0x298] sm:$0xff] }
 0x14d   :  { %v671_v14 = vld [vmem:[#allocation2 + $0xe70] sm:$0xff]  ;;  %1205 = vmatpush.msrb.mxu2 %v603_v12  ;;  %v356_v12 = vld [vmem:[#allocation2 + $0x498] sm:$0xff] }
 0x14e   :  { %v3938_v15 = vld.sshfl [vmem:[#allocation1 + $0x18] sm:$0xff pattern:$0x73625140]  ;;  %1224 = vmatpush.msrb.mxu3 %v671_v14  ;;  %v424_v14 = vld [vmem:[#allocation2 + $0x6b8] sm:$0xff] }
 0x14f   :  { %1148 = vmatmul.f32.vlgmr.msra.gmra.mxu3 %v3938_v15  ;;  %v471_v16 = vld [vmem:[#allocation2 + $0x830] sm:$0xff] }
 0x150   :  { %v535_v18 = vld [vmem:[#allocation2 + $0xa30] sm:$0xff]  ;;  %1166 = vmatpush.msrb.mxu0 %v471_v16  ;;  %v224_v16 = vld [vmem:[#allocation2 + $0x78] sm:$0xff] }
 0x151   :  { %v599_v19 = vld [vmem:[#allocation2 + $0xc30] sm:$0xff]  ;;  %1186 = vmatpush.msrb.mxu1 %v535_v18  ;;  %v288_v18 = vld [vmem:[#allocation2 + $0x278] sm:$0xff] }
 0x152   :  { %v667_v20 = vld [vmem:[#allocation2 + $0xe50] sm:$0xff]  ;;  %1206 = vmatpush.msrb.mxu2 %v599_v19  ;;  %v352_v19 = vld [vmem:[#allocation2 + $0x478] sm:$0xff] }
 0x153   :  { %v467_v24 = vld [vmem:[#allocation2 + $0x810] sm:$0xff]  ;;  %1225 = vmatpush.msrb.mxu3 %v667_v20  ;;  %v420_v20 = vld [vmem:[#allocation2 + $0x698] sm:$0xff] }
 0x154   :  { %v531_v25 = vld [vmem:[#allocation2 + $0xa10] sm:$0xff]  ;;  %1167 = vmatpush.msrb.mxu0 %v467_v24  ;;  %v220_v24 = vld [vmem:[#allocation2 + $0x58] sm:$0xff] }
 0x155   :  { %v595_v26 = vld [vmem:[#allocation2 + $0xc10] sm:$0xff]  ;;  %1187 = vmatpush.msrb.mxu1 %v531_v25  ;;  %1168 = vmatmul.f32.vlgmr.msrb.gmra.mxu0 %v3947_v35  ;;  %v284_v25 = vld [vmem:[#allocation2 + $0x258] sm:$0xff] }
 0x156   :  { %v663_v27 = vld [vmem:[#allocation2 + $0xe30] sm:$0xff]  ;;  %1207 = vmatpush.msrb.mxu2 %v595_v26  ;;  %1232 = vmatpush.msra.mxu0 %v272_v29  ;;  %v348_v26 = vld [vmem:[#allocation2 + $0x458] sm:$0xff] }
 0x157   :  { %1226 = vmatpush.msrb.mxu3 %v663_v27  ;;  %v659_v61 = vld [vmem:[#allocation2 + $0xe10] sm:$0xff]  ;;  %1208 = vmatmul.f32.vlgmr.msrb.gmra.mxu2 %v3944_v32  ;;  %v416_v27 = vld [vmem:[#allocation2 + $0x678] sm:$0xff] }
 0x158   :  { %1252 = vmatpush.msra.mxu1 %v336_v30  ;;  %1272 = vmatpush.msra.mxu2 %v400_v31  ;;  %v3950_v4 = vld.sshfl [vmem:[#allocation1 + $0x38] sm:$0xff pattern:$0x73625140]  ;;  %v216_v29 = vld [vmem:[#allocation2 + $0x38] sm:$0xff] }
 0x159   :  { %1227 = vmatpush.msrb.mxu3 %v659_v61  ;;  %1233 = vmatpush.msra.mxu0 %v268_v33  ;;  %v280_v30 = vld [vmem:[#allocation2 + $0x238] sm:$0xff] }
 0x15a   :  { %1228 = vmatmul.f32.vlgmr.msrb.gmra.mxu3 %v3950_v4  ;;  %1253 = vmatpush.msra.mxu1 %v332_v34  ;;  %v344_v31 = vld [vmem:[#allocation2 + $0x438] sm:$0xff] }
 0x15b   :  { %1273 = vmatpush.msra.mxu2 %v396_v2  ;;  %1292 = vmatpush.msra.mxu3 %v464_v3  ;;  %v412_v61 = vld [vmem:[#allocation2 + $0x658] sm:$0xff] }
 0x15c   :  { %1188 = vmatmul.f32.vlgmr.msrb.gmra.mxu1 %v3953_v40  ;;  %1234 = vmatpush.msra.mxu0 %v264_v36  ;;  %v212_v33 = vld [vmem:[#allocation2 + $0x18] sm:$0xff] }
 0x15d   :  { %1254 = vmatpush.msra.mxu1 %v328_v37  ;;  %1274 = vmatpush.msra.mxu2 %v392_v38  ;;  %v276_v34 = vld [vmem:[#allocation2 + $0x218] sm:$0xff] }
 0x15e   :  { %1293 = vmatpush.msra.mxu3 %v460_v39  ;;  %1235 = vmatpush.msra.mxu0 %v260_v41  ;;  %v340_v2 = vld [vmem:[#allocation2 + $0x418] sm:$0xff] }
 0x15f   :  { %1255 = vmatpush.msra.mxu1 %v324_v42  ;;  %1275 = vmatpush.msra.mxu2 %v388_v43  ;;  %v408_v3 = vld [vmem:[#allocation2 + $0x638] sm:$0xff] }
 0x160   :  { %1294 = vmatpush.msra.mxu3 %v456_v44  ;;  %1236 = vmatpush.msra.mxu0 %v256_v17  ;;  %v528_v36 = vld [vmem:[#allocation2 + $0x9f8] sm:$0xff] }
 0x161   :  { %1256 = vmatpush.msra.mxu1 %v320_v45  ;;  %1276 = vmatpush.msra.mxu2 %v384_v46  ;;  %v592_v37 = vld [vmem:[#allocation2 + $0xbf8] sm:$0xff] }
 0x162   :  { %1295 = vmatpush.msra.mxu3 %v452_v47  ;;  %1237 = vmatpush.msra.mxu0 %v252_v22  ;;  %v656_v38 = vld [vmem:[#allocation2 + $0xdf8] sm:$0xff] }
 0x163   :  { %1257 = vmatpush.msra.mxu1 %v316_v23  ;;  %1277 = vmatpush.msra.mxu2 %v380_v48  ;;  %v404_v39 = vld [vmem:[#allocation2 + $0x618] sm:$0xff] }
 0x164   :  { %1296 = vmatpush.msra.mxu3 %v448_v49  ;;  %1238 = vmatpush.msra.mxu0 %v248_v50  ;;  %v524_v41 = vld [vmem:[#allocation2 + $0x9d8] sm:$0xff] }
 0x165   :  { %1258 = vmatpush.msra.mxu1 %v312_v51  ;;  %1278 = vmatpush.msra.mxu2 %v376_v28  ;;  %v588_v42 = vld [vmem:[#allocation2 + $0xbd8] sm:$0xff] }
 0x166   :  { %1297 = vmatpush.msra.mxu3 %v444_v52  ;;  %1239 = vmatpush.msra.mxu0 %v244_v53  ;;  %v652_v43 = vld [vmem:[#allocation2 + $0xdd8] sm:$0xff] }
 0x167   :  { %1259 = vmatpush.msra.mxu1 %v308_v54  ;;  %1279 = vmatpush.msra.mxu2 %v372_v55  ;;  %v720_v44 = vld [vmem:[#allocation2 + $0xff8] sm:$0xff]  ;;  %v3956_v55 = vpop.f32.mrf.mxu0 }
 0x168   :  { %1298 = vmatpush.msra.mxu3 %v440_v56  ;;  %1240 = vmatpush.msra.mxu0 %v240_v57  ;;  %v520_v17 = vld [vmem:[#allocation2 + $0x9b8] sm:$0xff] }
 0x169   :  { %1260 = vmatpush.msra.mxu1 %v304_v58  ;;  %1280 = vmatpush.msra.mxu2 %v368_v59  ;;  %v584_v45 = vld [vmem:[#allocation2 + $0xbb8] sm:$0xff] }
 0x16a   :  { %1299 = vmatpush.msra.mxu3 %v436_v60  ;;  %1241 = vmatpush.msra.mxu0 %v236_v62  ;;  %v648_v46 = vld [vmem:[#allocation2 + $0xdb8] sm:$0xff] }
 0x16b   :  { %1261 = vmatpush.msra.mxu1 %v300_v63  ;;  %1281 = vmatpush.msra.mxu2 %v364_v0  ;;  %v716_v47 = vld [vmem:[#allocation2 + $0xfd8] sm:$0xff] }
 0x16c   :  { %1300 = vmatpush.msra.mxu3 %v432_v1  ;;  %1242 = vmatpush.msra.mxu0 %v232_v5  ;;  %v516_v22 = vld [vmem:[#allocation2 + $0x998] sm:$0xff]  ;;  %v3958_v1 = vpop.f32.mrf.mxu1 }
 0x16d   :  { %1262 = vmatpush.msra.mxu1 %v296_v6  ;;  %1282 = vmatpush.msra.mxu2 %v360_v7  ;;  %v580_v23 = vld [vmem:[#allocation2 + $0xb98] sm:$0xff] }
 0x16e   :  { %1301 = vmatpush.msra.mxu3 %v428_v8  ;;  %1243 = vmatpush.msra.mxu0 %v228_v10  ;;  %v644_v48 = vld [vmem:[#allocation2 + $0xd98] sm:$0xff] }
 0x16f   :  { %1263 = vmatpush.msra.mxu1 %v292_v11  ;;  %1283 = vmatpush.msra.mxu2 %v356_v12  ;;  %v712_v49 = vld [vmem:[#allocation2 + $0xfb8] sm:$0xff] }
 0x170   :  { %1302 = vmatpush.msra.mxu3 %v424_v14  ;;  %1244 = vmatpush.msra.mxu0 %v224_v16  ;;  %v512_v50 = vld [vmem:[#allocation2 + $0x978] sm:$0xff]  ;;  %v3960_v16 = vpop.f32.mrf.mxu2 }
 0x171   :  { %1264 = vmatpush.msra.mxu1 %v288_v18  ;;  %1284 = vmatpush.msra.mxu2 %v352_v19  ;;  %v576_v51 = vld [vmem:[#allocation2 + $0xb78] sm:$0xff] }
 0x172   :  { %1303 = vmatpush.msra.mxu3 %v420_v20  ;;  %1245 = vmatpush.msra.mxu0 %v220_v24  ;;  %v640_v28 = vld [vmem:[#allocation2 + $0xd78] sm:$0xff] }
 0x173   :  { %1265 = vmatpush.msra.mxu1 %v284_v25  ;;  %1285 = vmatpush.msra.mxu2 %v348_v26  ;;  %v708_v52 = vld [vmem:[#allocation2 + $0xf98] sm:$0xff]  ;;  %v3962_v25 = vpop.f32.mrf.mxu0 }
 0x174   :  { %1304 = vmatpush.msra.mxu3 %v416_v27  ;;  %1246 = vmatpush.msra.mxu0 %v216_v29  ;;  %v508_v53 = vld [vmem:[#allocation2 + $0x958] sm:$0xff] }
 0x175   :  { %1266 = vmatpush.msra.mxu1 %v280_v30  ;;  %1286 = vmatpush.msra.mxu2 %v344_v31  ;;  %v572_v54 = vld [vmem:[#allocation2 + $0xb58] sm:$0xff]  ;;  %v3964_v31 = vpop.f32.mrf.mxu3 }
 0x176   :  { %1305 = vmatpush.msra.mxu3 %v412_v61  ;;  %1247 = vmatpush.msra.mxu0 %v212_v33  ;;  %v636_v56 = vld [vmem:[#allocation2 + $0xd58] sm:$0xff] }
 0x177   :  { %1267 = vmatpush.msra.mxu1 %v276_v34  ;;  %1287 = vmatpush.msra.mxu2 %v340_v2  ;;  %v704_v57 = vld [vmem:[#allocation2 + $0xf78] sm:$0xff]  ;;  %v3966_v2 = vld [vmem:[#allocation5] sm:$0xf] }
 0x178   :  { %1306 = vmatpush.msra.mxu3 %v408_v3  ;;  %1312 = vmatpush.msrb.mxu0 %v528_v36  ;;  %v504_v58 = vld [vmem:[#allocation2 + $0x938] sm:$0xff]  ;;  %v3968_v3 = vpop.f32.mrf.mxu1 }
 0x179   :  { %1332 = vmatpush.msrb.mxu1 %v592_v37  ;;  %1352 = vmatpush.msrb.mxu2 %v656_v38  ;;  %v568_v59 = vld [vmem:[#allocation2 + $0xb38] sm:$0xff] }
 0x17a   :  { %1307 = vmatpush.msra.mxu3 %v404_v39  ;;  %1313 = vmatpush.msrb.mxu0 %v524_v41  ;;  %v632_v60 = vld [vmem:[#allocation2 + $0xd38] sm:$0xff]  ;;  %v723_v41 = vperm.slane %v3966_v2, 0 }
 0x17b   :  { %1333 = vmatpush.msrb.mxu1 %v588_v42  ;;  %1353 = vmatpush.msrb.mxu2 %v652_v43  ;;  %v700_v62 = vld [vmem:[#allocation2 + $0xf58] sm:$0xff] }
 0x17c   :  { %1372 = vmatpush.msrb.mxu3 %v720_v44  ;;  %1314 = vmatpush.msrb.mxu0 %v520_v17  ;;  %v500_v63 = vld [vmem:[#allocation2 + $0x918] sm:$0xff]  ;;  %v724_v44 = vperm.slane %v3966_v2, 1  ;;  %v3973_v17 = vpop.f32.mrf.mxu2 }
 0x17d   :  { %1334 = vmatpush.msrb.mxu1 %v584_v45  ;;  %1354 = vmatpush.msrb.mxu2 %v648_v46  ;;  %v564_v0 = vld [vmem:[#allocation2 + $0xb18] sm:$0xff]  ;;  %v929_v46 = vpop.f32.mrf.mxu0 }
 0x17e   :  { %1373 = vmatpush.msrb.mxu3 %v716_v47  ;;  %1315 = vmatpush.msrb.mxu0 %v516_v22  ;;  %v628_v5 = vld [vmem:[#allocation2 + $0xd18] sm:$0xff] }
 0x17f   :  { %1335 = vmatpush.msrb.mxu1 %v580_v23  ;;  %1355 = vmatpush.msrb.mxu2 %v644_v48  ;;  %v696_v6 = vld [vmem:[#allocation2 + $0xf38] sm:$0xff]  ;;  %v770_v48 = vadd.f32 %v3956_v55, %v723_v41  ;;  %v1448_v41 = vld [vmem:[#allocation7 + $0x160] sm:$0xff] }
 0x180   :  { %1374 = vmatpush.msrb.mxu3 %v712_v49  ;;  %1316 = vmatpush.msrb.mxu0 %v512_v50  ;;  %v496_v7 = vld [vmem:[#allocation2 + $0x8f8] sm:$0xff] }
 0x181   :  { %1336 = vmatpush.msrb.mxu1 %v576_v51  ;;  %1356 = vmatpush.msrb.mxu2 %v640_v28  ;;  %v560_v8 = vld [vmem:[#allocation2 + $0xaf8] sm:$0xff]  ;;  %v930_v51 = vadd.f32 %v929_v46, %v724_v44 }
 0x182   :  { %1375 = vmatpush.msrb.mxu3 %v708_v52  ;;  %1317 = vmatpush.msrb.mxu0 %v508_v53  ;;  %v624_v10 = vld [vmem:[#allocation2 + $0xcf8] sm:$0xff]  ;;  %v949_v52 = vpop.f32.mrf.mxu1 }
 0x183   :  { %1337 = vmatpush.msrb.mxu1 %v572_v54  ;;  %1357 = vmatpush.msrb.mxu2 %v636_v56  ;;  %v692_v11 = vld [vmem:[#allocation2 + $0xf18] sm:$0xff]  ;;  %v790_v56 = vadd.f32 %v3958_v1, %v770_v48 }
 0x184   :  { %1376 = vmatpush.msrb.mxu3 %v704_v57  ;;  %1318 = vmatpush.msrb.mxu0 %v504_v58  ;;  %v492_v12 = vld [vmem:[#allocation2 + $0x8d8] sm:$0xff]  ;;  %v1432_v57 = vld [vmem:[#allocation7 + $0xe0] sm:$0xff] }
 0x185   :  { %1338 = vmatpush.msrb.mxu1 %v568_v59  ;;  %1358 = vmatpush.msrb.mxu2 %v632_v60  ;;  %v556_v14 = vld [vmem:[#allocation2 + $0xad8] sm:$0xff]  ;;  %v1464_v58 = vld [vmem:[#allocation7 + $0x1e0] sm:$0xff]  ;;  %v969_v59 = vpop.f32.mrf.mxu2 }
 0x186   :  { %1377 = vmatpush.msrb.mxu3 %v700_v62  ;;  %1319 = vmatpush.msrb.mxu0 %v500_v63  ;;  %v620_v18 = vld [vmem:[#allocation2 + $0xcd8] sm:$0xff] }
 0x187   :  { %1339 = vmatpush.msrb.mxu1 %v564_v0  ;;  %1359 = vmatpush.msrb.mxu2 %v628_v5  ;;  %v688_v19 = vld [vmem:[#allocation2 + $0xef8] sm:$0xff]  ;;  %v810_v0 = vadd.f32 %v3960_v16, %v790_v56  ;;  %v1496_v5 = vld [vmem:[#allocation7 + $0x2e0] sm:$0xff] }
 0x188   :  { %1378 = vmatpush.msrb.mxu3 %v696_v6  ;;  %1320 = vmatpush.msrb.mxu0 %v496_v7  ;;  %v488_v20 = vld [vmem:[#allocation2 + $0x8b8] sm:$0xff]  ;;  %v1460_v6 = vld [vmem:[#allocation7 + $0x1c0] sm:$0xff] }
 0x189   :  { %1340 = vmatpush.msrb.mxu1 %v560_v8  ;;  %1360 = vmatpush.msrb.mxu2 %v624_v10  ;;  %v552_v24 = vld [vmem:[#allocation2 + $0xab8] sm:$0xff]  ;;  %v1424_v16 = vld [vmem:[#allocation7 + $0xa0] sm:$0xff] }
 0x18a   :  { %1379 = vmatpush.msrb.mxu3 %v692_v11  ;;  %1321 = vmatpush.msrb.mxu0 %v492_v12  ;;  %v616_v26 = vld [vmem:[#allocation2 + $0xcb8] sm:$0xff]  ;;  %v1492_v12 = vld [vmem:[#allocation7 + $0x2c0] sm:$0xff] }
 0x18b   :  { %1341 = vmatpush.msrb.mxu1 %v556_v14  ;;  %v684_v27 = vld [vmem:[#allocation2 + $0xed8] sm:$0xff]  ;;  %1361 = vmatpush.msrb.mxu2 %v620_v18  ;;  %v1009_v14 = vpop.f32.mrf.mxu0  ;;  %v1456_v18 = vld [vmem:[#allocation7 + $0x1a0] sm:$0xff] }
 0x18c   :  { %1380 = vmatpush.msrb.mxu3 %v688_v19  ;;  %v484_v29 = vld [vmem:[#allocation2 + $0x898] sm:$0xff]  ;;  %1322 = vmatpush.msrb.mxu0 %v488_v20 }
 0x18d   :  { %v548_v30 = vld [vmem:[#allocation2 + $0xa98] sm:$0xff]  ;;  %1342 = vmatpush.msrb.mxu1 %v552_v24  ;;  %1362 = vmatpush.msrb.mxu2 %v616_v26 }
 0x18e   :  { %v612_v61 = vld [vmem:[#allocation2 + $0xc98] sm:$0xff]  ;;  %1381 = vmatpush.msrb.mxu3 %v684_v27  ;;  %1323 = vmatpush.msrb.mxu0 %v484_v29  ;;  %v1488_v27 = vld [vmem:[#allocation7 + $0x2a0] sm:$0xff]  ;;  %v1029_v29 = vpop.f32.mrf.mxu1 }
 0x18f   :  { %v680_v33 = vld [vmem:[#allocation2 + $0xeb8] sm:$0xff]  ;;  %1343 = vmatpush.msrb.mxu1 %v548_v30  ;;  %1363 = vmatpush.msrb.mxu2 %v612_v61  ;;  %v1420_v30 = vld [vmem:[#allocation7 + $0x80] sm:$0xff] }
 0x190   :  { %v480_v34 = vld [vmem:[#allocation2 + $0x878] sm:$0xff]  ;;  %1382 = vmatpush.msrb.mxu3 %v680_v33  ;;  %1288 = vmatmul.f32.vlgmr.msra.gmra.mxu2 %v3932_v9 }
 0x191   :  { %v544_v36 = vld [vmem:[#allocation2 + $0xa78] sm:$0xff]  ;;  %1324 = vmatpush.msrb.mxu0 %v480_v34  ;;  %1308 = vmatmul.f32.vlgmr.msra.gmra.mxu3 %v3938_v15 }
 0x192   :  { %v608_v37 = vld [vmem:[#allocation2 + $0xc78] sm:$0xff]  ;;  %1344 = vmatpush.msrb.mxu1 %v544_v36  ;;  %1248 = vmatmul.f32.vlgmr.msra.gmra.mxu0 %v3935_v13  ;;  %v3979_v13 = vpop.f32.mrf.mxu3 }
 0x193   :  { %v676_v38 = vld [vmem:[#allocation2 + $0xe98] sm:$0xff]  ;;  %1364 = vmatpush.msrb.mxu2 %v608_v37  ;;  %1268 = vmatmul.f32.vlgmr.msra.gmra.mxu1 %v3941_v21  ;;  %v950_v21 = vadd.f32 %v949_v52, %v930_v51 }
 0x194   :  { %v476_v39 = vld [vmem:[#allocation2 + $0x858] sm:$0xff]  ;;  %1383 = vmatpush.msrb.mxu3 %v676_v38  ;;  %v1049_v38 = vpop.f32.mrf.mxu2 }
 0x195   :  { %v540_v42 = vld [vmem:[#allocation2 + $0xa58] sm:$0xff]  ;;  %1325 = vmatpush.msrb.mxu0 %v476_v39  ;;  %v970_v1 = vadd.f32 %v969_v59, %v950_v21  ;;  %v1416_v39 = vld [vmem:[#allocation7 + $0x60] sm:$0xff] }
 0x196   :  { %v604_v43 = vld [vmem:[#allocation2 + $0xc58] sm:$0xff]  ;;  %1345 = vmatpush.msrb.mxu1 %v540_v42  ;;  %v1472_v21 = vld [vmem:[#allocation7 + $0x220] sm:$0xff] }
 0x197   :  { %v672_v45 = vld [vmem:[#allocation2 + $0xe78] sm:$0xff]  ;;  %1365 = vmatpush.msrb.mxu2 %v604_v43 }
 0x198   :  { %v472_v9 = vld [vmem:[#allocation2 + $0x838] sm:$0xff]  ;;  %1384 = vmatpush.msrb.mxu3 %v672_v45 }
 0x199   :  { %v536_v47 = vld [vmem:[#allocation2 + $0xa38] sm:$0xff]  ;;  %1326 = vmatpush.msrb.mxu0 %v472_v9 }
 0x19a   :  { %v600_v22 = vld [vmem:[#allocation2 + $0xc38] sm:$0xff]  ;;  %1346 = vmatpush.msrb.mxu1 %v536_v47  ;;  %v989_v7 = vpop.f32.mrf.mxu3  ;;  %v1412_v47 = vld [vmem:[#allocation7 + $0x40] sm:$0xff] }
 0x19b   :  { %v668_v23 = vld [vmem:[#allocation2 + $0xe58] sm:$0xff]  ;;  %1366 = vmatpush.msrb.mxu2 %v600_v22  ;;  %v990_v11 = vadd.f32 %v989_v7, %v970_v1  ;;  %v1444_v22 = vld [vmem:[#allocation7 + $0x140] sm:$0xff]  ;;  %v1465_v1 = vld [vmem:[#allocation7 + $0x1e8] sm:$0xff] }
 0x19c   :  { %v468_v49 = vld [vmem:[#allocation2 + $0x818] sm:$0xff]  ;;  %1385 = vmatpush.msrb.mxu3 %v668_v23 }
 0x19d   :  { %v532_v50 = vld [vmem:[#allocation2 + $0xa18] sm:$0xff]  ;;  %1327 = vmatpush.msrb.mxu0 %v468_v49  ;;  %v1010_v26 = vadd.f32 %v1009_v14, %v990_v11  ;;  %v1425_v14 = vld [vmem:[#allocation7 + $0xa8] sm:$0xff] }
 0x19e   :  { %v596_v15 = vld [vmem:[#allocation2 + $0xc18] sm:$0xff]  ;;  %1347 = vmatpush.msrb.mxu1 %v532_v50  ;;  %1328 = vmatmul.f32.vlgmr.msrb.gmra.mxu0 %v3947_v35 }
 0x19f   :  { %v664_v28 = vld [vmem:[#allocation2 + $0xe38] sm:$0xff]  ;;  %1367 = vmatpush.msrb.mxu2 %v596_v15  ;;  %1348 = vmatmul.f32.vlgmr.msrb.gmra.mxu1 %v3953_v40  ;;  %v1030_v37 = vadd.f32 %v1029_v29, %v1010_v26  ;;  %v1408_v15 = vld [vmem:[#allocation7 + $0x20] sm:$0xff]  ;;  %v1421_v26 = vld [vmem:[#allocation7 + $0x88] sm:$0xff] }
 0x1a0   :  { %v1434_v53 = vld [vmem:[#allocation7 + $0xf0] sm:$0xff]  ;;  %1386 = vmatpush.msrb.mxu3 %v664_v28  ;;  %1368 = vmatmul.f32.vlgmr.msrb.gmra.mxu2 %v3944_v32  ;;  %v1428_v32 = vld [vmem:[#allocation7 + $0xc0] sm:$0xff]  ;;  %v1467_v59 = vld [vmem:[#allocation7 + $0x1f8] sm:$0xff] }
 0x1a1   :  { %v1466_v54 = vld [vmem:[#allocation7 + $0x1f0] sm:$0xff]  ;;  %1538 = vmatpush.msra.mxu0 %v1434_v53  ;;  %v1050_v46 = vadd.f32 %v1049_v38, %v1030_v37  ;;  %v1440_v28 = vld [vmem:[#allocation7 + $0x120] sm:$0xff]  ;;  %v1499_v7 = vld [vmem:[#allocation7 + $0x2f8] sm:$0xff] }
 0x1a2   :  { %v660_v55 = vld [vmem:[#allocation2 + $0xe18] sm:$0xff]  ;;  %1558 = vmatpush.msra.mxu1 %v1466_v54  ;;  %v1069_v9 = vpop.f32.mrf.mxu3  ;;  %v1489_v29 = vld [vmem:[#allocation7 + $0x2a8] sm:$0xff]  ;;  %v1528_v37 = vld [vmem:[#allocation7 + $0x3e0] sm:$0xff] }
 0x1a3   :  { %1387 = vmatpush.msrb.mxu3 %v660_v55  ;;  %v1498_v60 = vld [vmem:[#allocation7 + $0x2f0] sm:$0xff]  ;;  %1539 = vmatpush.msra.mxu0 %v1432_v57  ;;  %v1070_v51 = vadd.f32 %v1069_v9, %v1050_v46  ;;  %v1436_v57 = vld [vmem:[#allocation7 + $0x100] sm:$0xff]  ;;  %v1459_v11 = vld [vmem:[#allocation7 + $0x1b8] sm:$0xff]  ;;  %v1109_v9 = vpop.f32.mrf.mxu1 }
 0x1a4   :  { %1388 = vmatmul.f32.vlgmr.msrb.gmra.mxu3 %v3950_v4  ;;  %v1430_v62 = vld [vmem:[#allocation7 + $0xd0] sm:$0xff]  ;;  %1559 = vmatpush.msra.mxu1 %v1464_v58  ;;  %v830_v4 = vadd.f32 %v3964_v31, %v810_v0  ;;  %v1452_v31 = vld [vmem:[#allocation7 + $0x180] sm:$0xff]  ;;  %v1435_v58 = vld [vmem:[#allocation7 + $0xf8] sm:$0xff] }
 0x1a5   :  { %v1462_v63 = vld [vmem:[#allocation7 + $0x1d0] sm:$0xff]  ;;  %1578 = vmatpush.msra.mxu2 %v1498_v60  ;;  %1540 = vmatpush.msra.mxu0 %v1430_v62  ;;  %v1397_v56 = vmul.f32 0.2, %v1070_v51  ;;  %vm1393_vm1 = vcmp.gt.f32.partialorder %v1070_v51, 0.0  ;;  %v1433_v0 = vld [vmem:[#allocation7 + $0xe8] sm:$0xff] }
 0x1a6   :  { %1560 = vmatpush.msra.mxu1 %v1462_v63  ;;  %v1494_v8 = vld [vmem:[#allocation7 + $0x2d0] sm:$0xff]  ;;  %v850_v24 = vadd.f32 %v3962_v25, %v830_v4  ;;  %v1484_v25 = vld [vmem:[#allocation7 + $0x280] sm:$0xff]  ;;  %v1427_v4 = vld [vmem:[#allocation7 + $0xb8] sm:$0xff] }
 0x1a7   :  { %v1426_v35 = vld [vmem:[#allocation7 + $0xb0] sm:$0xff]  ;;  %1579 = vmatpush.msra.mxu2 %v1496_v5  ;;  %1541 = vmatpush.msra.mxu0 %v1428_v32  ;;  %v3994_v62 = vsel %vm1393_vm1, %v1070_v51, %v1397_v56  ;;  %v1468_v5 = vld [vmem:[#allocation7 + $0x200] sm:$0xff]  ;;  %v1431_v32 = vld [vmem:[#allocation7 + $0xd8] sm:$0xff] }
 0x1a8   :  { %v1458_v10 = vld [vmem:[#allocation7 + $0x1b0] sm:$0xff]  ;;  %1561 = vmatpush.msra.mxu1 %v1460_v6  ;;  %v870_v36 = vadd.f32 %v3968_v3, %v850_v24  ;;  %v1480_v3 = vld [vmem:[#allocation7 + $0x260] sm:$0xff]  ;;  %v1463_v6 = vld [vmem:[#allocation7 + $0x1d8] sm:$0xff] }
 0x1a9   :  { %1580 = vmatpush.msra.mxu2 %v1494_v8  ;;  %1542 = vmatpush.msra.mxu0 %v1426_v35  ;;  %v1490_v40 = vld [vmem:[#allocation7 + $0x2b0] sm:$0xff]  ;;  %v1429_v8 = vld [vmem:[#allocation7 + $0xc8] sm:$0xff]  ;;  %v1491_v24 = vld [vmem:[#allocation7 + $0x2b8] sm:$0xff] }
 0x1aa   :  { %1562 = vmatpush.msra.mxu1 %v1458_v10  ;;  %v1422_v19 = vld [vmem:[#allocation7 + $0x90] sm:$0xff]  ;;  %v890_v45 = vadd.f32 %v3973_v17, %v870_v36  ;;  %v1476_v17 = vld [vmem:[#allocation7 + $0x240] sm:$0xff]  ;;  %v1461_v35 = vld [vmem:[#allocation7 + $0x1c8] sm:$0xff] }
 0x1ab   :  { %v1454_v20 = vld [vmem:[#allocation7 + $0x190] sm:$0xff]  ;;  %1581 = vmatpush.msra.mxu2 %v1492_v12  ;;  %1543 = vmatpush.msra.mxu0 %v1424_v16  ;;  %v1497_v10 = vld [vmem:[#allocation7 + $0x2e8] sm:$0xff]  ;;  %v1495_v12 = vld [vmem:[#allocation7 + $0x2d8] sm:$0xff] }
 0x1ac   :  { %1563 = vmatpush.msra.mxu1 %v1456_v18  ;;  %v1486_v61 = vld [vmem:[#allocation7 + $0x290] sm:$0xff]  ;;  %v910_v50 = vadd.f32 %v3979_v13, %v890_v45  ;;  %v1404_v13 = vld [vmem:[#allocation7] sm:$0xff]  ;;  %v1457_v16 = vld [vmem:[#allocation7 + $0x1a8] sm:$0xff] }
 0x1ad   :  { %1582 = vmatpush.msra.mxu2 %v1490_v40  ;;  %1544 = vmatpush.msra.mxu0 %v1422_v19  ;;  %v1418_v33 = vld [vmem:[#allocation7 + $0x70] sm:$0xff]  ;;  %v1493_v18 = vld [vmem:[#allocation7 + $0x2c8] sm:$0xff]  ;;  %v1423_v19 = vld [vmem:[#allocation7 + $0x98] sm:$0xff] }
 0x1ae   :  { %1564 = vmatpush.msra.mxu1 %v1454_v20  ;;  %v1450_v34 = vld [vmem:[#allocation7 + $0x170] sm:$0xff]  ;;  %v1396_v55 = vmul.f32 0.2, %v910_v50  ;;  %vm1392_vm0 = vcmp.gt.f32.partialorder %v910_v50, 0.0  ;;  %v1455_v20 = vld [vmem:[#allocation7 + $0x198] sm:$0xff]  ;;  %v1449_v36 = vld [vmem:[#allocation7 + $0x168] sm:$0xff] }
 0x1af   :  { %1583 = vmatpush.msra.mxu2 %v1488_v27  ;;  %1545 = vmatpush.msra.mxu0 %v1420_v30  ;;  %v1482_v42 = vld [vmem:[#allocation7 + $0x270] sm:$0xff]  ;;  %v1453_v27 = vld [vmem:[#allocation7 + $0x188] sm:$0xff]  ;;  %v1419_v30 = vld [vmem:[#allocation7 + $0x78] sm:$0xff] }
 0x1b0   :  { %1565 = vmatpush.msra.mxu1 %v1452_v31  ;;  %v1414_v43 = vld [vmem:[#allocation7 + $0x50] sm:$0xff]  ;;  %v3992_v60 = vsel %vm1392_vm0, %v910_v50, %v1396_v55  ;;  %v1451_v31 = vld [vmem:[#allocation7 + $0x178] sm:$0xff]  ;;  %v1485_v38 = vld [vmem:[#allocation7 + $0x288] sm:$0xff] }
 0x1b1   :  { %1584 = vmatpush.msra.mxu2 %v1486_v61  ;;  %1546 = vmatpush.msra.mxu0 %v1418_v33  ;;  %v1446_v44 = vld [vmem:[#allocation7 + $0x150] sm:$0xff]  ;;  %v725_v61 = vperm.slane %v3966_v2, 2  ;;  %v1487_v33 = vld [vmem:[#allocation7 + $0x298] sm:$0xff]  ;;  %v1524_v45 = vld [vmem:[#allocation7 + $0x3c0] sm:$0xff] }
 0x1b2   :  { %1566 = vmatpush.msra.mxu1 %v1450_v34  ;;  %v1478_v23 = vld [vmem:[#allocation7 + $0x250] sm:$0xff]  ;;  %v1417_v34 = vld [vmem:[#allocation7 + $0x68] sm:$0xff]  ;;  %v1443_v50 = vld [vmem:[#allocation7 + $0x138] sm:$0xff] }
 0x1b3   :  { %1585 = vmatpush.msra.mxu2 %v1484_v25  ;;  %1547 = vmatpush.msra.mxu0 %v1416_v39  ;;  %v1410_v48 = vld [vmem:[#allocation7 + $0x30] sm:$0xff]  ;;  %v1089_v25 = vpop.f32.mrf.mxu0  ;;  %v1413_v46 = vld [vmem:[#allocation7 + $0x48] sm:$0xff] }
 0x1b4   :  { %1567 = vmatpush.msra.mxu1 %v1448_v41  ;;  %v1442_v49 = vld [vmem:[#allocation7 + $0x130] sm:$0xff]  ;;  %v1415_v41 = vld [vmem:[#allocation7 + $0x58] sm:$0xff]  ;;  %v1477_v55 = vld [vmem:[#allocation7 + $0x248] sm:$0xff] }
 0x1b5   :  { %1586 = vmatpush.msra.mxu2 %v1482_v42  ;;  %1548 = vmatpush.msra.mxu0 %v1414_v43  ;;  %v1474_v52 = vld [vmem:[#allocation7 + $0x230] sm:$0xff]  ;;  %v1447_v42 = vld [vmem:[#allocation7 + $0x158] sm:$0xff]  ;;  %v1090_v43 = vadd.f32 %v1089_v25, %v725_v61  ;;  %v1521_v61 = vld [vmem:[#allocation7 + $0x3a8] sm:$0xff] }
 0x1b6   :  { %1568 = vmatpush.msra.mxu1 %v1446_v44  ;;  %v1406_v53 = vld [vmem:[#allocation7 + $0x10] sm:$0xff]  ;;  %v1483_v44 = vld [vmem:[#allocation7 + $0x278] sm:$0xff] }
 0x1b7   :  { %1587 = vmatpush.msra.mxu2 %v1480_v3  ;;  %1549 = vmatpush.msra.mxu0 %v1412_v47  ;;  %v1438_v54 = vld [vmem:[#allocation7 + $0x110] sm:$0xff]  ;;  %v1445_v3 = vld [vmem:[#allocation7 + $0x148] sm:$0xff]  ;;  %v1110_v47 = vadd.f32 %v1109_v9, %v1090_v43  ;;  %v1511_v25 = vld [vmem:[#allocation7 + $0x358] sm:$0xff] }
 0x1b8   :  { %1569 = vmatpush.msra.mxu1 %v1444_v22  ;;  %v1470_v63 = vld [vmem:[#allocation7 + $0x210] sm:$0xff]  ;;  %v1129_v22 = vpop.f32.mrf.mxu2  ;;  %v1501_v43 = vld [vmem:[#allocation7 + $0x308] sm:$0xff] }
 0x1b9   :  { %1588 = vmatpush.msra.mxu2 %v1478_v23  ;;  %1550 = vmatpush.msra.mxu0 %v1410_v48  ;;  %v1530_v40 = vld [vmem:[#allocation7 + $0x3f0] sm:$0xff]  ;;  %v1481_v23 = vld [vmem:[#allocation7 + $0x268] sm:$0xff]  ;;  %v1130_v51 = vadd.f32 %v1129_v22, %v1110_v47 }
 0x1ba   :  { %1570 = vmatpush.msra.mxu1 %v1442_v49  ;;  %1598 = vmatpush.msra.mxu3 %v1530_v40  ;;  %v1526_v39 = vld [vmem:[#allocation7 + $0x3d0] sm:$0xff]  ;;  %v1411_v49 = vld [vmem:[#allocation7 + $0x38] sm:$0xff] }
 0x1bb   :  { %1589 = vmatpush.msra.mxu2 %v1476_v17  ;;  %1551 = vmatpush.msra.mxu0 %v1408_v15  ;;  %v1522_v48 = vld [vmem:[#allocation7 + $0x3b0] sm:$0xff]  ;;  %v1479_v17 = vld [vmem:[#allocation7 + $0x258] sm:$0xff]  ;;  %v1520_v15 = vld [vmem:[#allocation7 + $0x3a0] sm:$0xff] }
 0x1bc   :  { %1571 = vmatpush.msra.mxu1 %v1440_v28  ;;  %1599 = vmatpush.msra.mxu3 %v1528_v37  ;;  %v1409_v28 = vld [vmem:[#allocation7 + $0x28] sm:$0xff]  ;;  %v1518_v56 = vld [vmem:[#allocation7 + $0x390] sm:$0xff] }
 0x1bd   :  { %1590 = vmatpush.msra.mxu2 %v1474_v52  ;;  %1552 = vmatpush.msra.mxu0 %v1406_v53  ;;  %v1441_v52 = vld [vmem:[#allocation7 + $0x128] sm:$0xff] }
 0x1be   :  { %1572 = vmatpush.msra.mxu1 %v1438_v54  ;;  %1600 = vmatpush.msra.mxu3 %v1526_v39  ;;  %v1513_v37 = vld [vmem:[#allocation7 + $0x368] sm:$0xff]  ;;  %v1507_v39 = vld [vmem:[#allocation7 + $0x338] sm:$0xff] }
 0x1bf   :  { %1591 = vmatpush.msra.mxu2 %v1472_v21  ;;  %1553 = vmatpush.msra.mxu0 %v1404_v13  ;;  %v1407_v21 = vld [vmem:[#allocation7 + $0x18] sm:$0xff] }
 0x1c0   :  { %1573 = vmatpush.msra.mxu1 %v1436_v57  ;;  %1554 = vmatmul.f32.vlgmr.msra.gmra.mxu0 %v3992_v60  ;;  %v1439_v13 = vld [vmem:[#allocation7 + $0x118] sm:$0xff] }
 0x1c1   :  { %1574 = vmatmul.f32.vlgmr.msra.gmra.mxu1 %v3994_v62  ;;  %1618 = vmatpush.msrb.mxu0 %v1435_v58  ;;  %v1475_v58 = vld [vmem:[#allocation7 + $0x238] sm:$0xff] }
 0x1c2   :  { %1638 = vmatpush.msrb.mxu1 %v1467_v59  ;;  %1592 = vmatpush.msra.mxu2 %v1470_v63  ;;  %v1516_v59 = vld [vmem:[#allocation7 + $0x380] sm:$0xff]  ;;  %v1405_v63 = vld [vmem:[#allocation7 + $0x8] sm:$0xff] }
 0x1c3   :  { %1619 = vmatpush.msrb.mxu0 %v1433_v0  ;;  %1601 = vmatpush.msra.mxu3 %v1524_v45  ;;  %v1437_v0 = vld [vmem:[#allocation7 + $0x108] sm:$0xff] }
 0x1c4   :  { %1639 = vmatpush.msrb.mxu1 %v1465_v1  ;;  %1593 = vmatpush.msra.mxu2 %v1468_v5 }
 0x1c5   :  { %1620 = vmatpush.msrb.mxu0 %v1431_v32  ;;  %1602 = vmatpush.msra.mxu3 %v1522_v48  ;;  %v1473_v32 = vld [vmem:[#allocation7 + $0x228] sm:$0xff] }
 0x1c6   :  { %1640 = vmatpush.msrb.mxu1 %v1463_v6  ;;  %1658 = vmatpush.msrb.mxu2 %v1499_v7  ;;  %v1514_v6 = vld [vmem:[#allocation7 + $0x370] sm:$0xff] }
 0x1c7   :  { %1621 = vmatpush.msrb.mxu0 %v1429_v8  ;;  %1603 = vmatpush.msra.mxu3 %v1520_v15 }
 0x1c8   :  { %1641 = vmatpush.msrb.mxu1 %v1461_v35  ;;  %1659 = vmatpush.msrb.mxu2 %v1497_v10  ;;  %v1471_v35 = vld [vmem:[#allocation7 + $0x218] sm:$0xff]  ;;  %v1512_v10 = vld [vmem:[#allocation7 + $0x360] sm:$0xff] }
 0x1c9   :  { %1622 = vmatpush.msrb.mxu0 %v1427_v4  ;;  %1604 = vmatpush.msra.mxu3 %v1518_v56  ;;  %v1718_v56 = vld [vmem:[%s4177_s5 + $0x70] sm:$0xff] }
 0x1ca   :  { %1642 = vmatpush.msrb.mxu1 %v1459_v11  ;;  %1660 = vmatpush.msrb.mxu2 %v1495_v12  ;;  %v1469_v12 = vld [vmem:[#allocation7 + $0x208] sm:$0xff] }
 0x1cb   :  { %1623 = vmatpush.msrb.mxu0 %v1425_v14  ;;  %1605 = vmatpush.msra.mxu3 %v1516_v59  ;;  %v1510_v14 = vld [vmem:[#allocation7 + $0x350] sm:$0xff] }
 0x1cc   :  { %1643 = vmatpush.msrb.mxu1 %v1457_v16  ;;  %1661 = vmatpush.msrb.mxu2 %v1493_v18  ;;  %v1508_v18 = vld [vmem:[#allocation7 + $0x340] sm:$0xff]  ;;  %v1716_v59 = vld [vmem:[%s4177_s5 + $0x60] sm:$0xff] }
 0x1cd   :  { %1624 = vmatpush.msrb.mxu0 %v1423_v19  ;;  %1606 = vmatpush.msra.mxu3 %v1514_v6  ;;  %v1506_v19 = vld [vmem:[#allocation7 + $0x330] sm:$0xff]  ;;  %v1713_v6 = vld [vmem:[%s4177_s5 + $0x48] sm:$0xff] }
 0x1ce   :  { %1644 = vmatpush.msrb.mxu1 %v1455_v20  ;;  %1662 = vmatpush.msrb.mxu2 %v1491_v24  ;;  %v1502_v20 = vld [vmem:[#allocation7 + $0x310] sm:$0xff]  ;;  %v1500_v24 = vld [vmem:[#allocation7 + $0x300] sm:$0xff] }
 0x1cf   :  { %1625 = vmatpush.msrb.mxu0 %v1421_v26  ;;  %1607 = vmatpush.msra.mxu3 %v1512_v10  ;;  %v1531_v26 = vld [vmem:[#allocation7 + $0x3f8] sm:$0xff]  ;;  %v1711_v10 = vld [vmem:[%s4177_s5 + $0x38] sm:$0xff] }
 0x1d0   :  { %1645 = vmatpush.msrb.mxu1 %v1453_v27  ;;  %1663 = vmatpush.msrb.mxu2 %v1489_v29  ;;  %v1529_v27 = vld [vmem:[#allocation7 + $0x3e8] sm:$0xff]  ;;  %v1527_v29 = vld [vmem:[#allocation7 + $0x3d8] sm:$0xff] }
 0x1d1   :  { %1626 = vmatpush.msrb.mxu0 %v1419_v30  ;;  %1608 = vmatpush.msra.mxu3 %v1510_v14  ;;  %v1525_v30 = vld [vmem:[#allocation7 + $0x3c8] sm:$0xff]  ;;  %v1708_v14 = vld [vmem:[%s4177_s5 + $0x20] sm:$0xff] }
 0x1d2   :  { %1646 = vmatpush.msrb.mxu1 %v1451_v31  ;;  %1664 = vmatpush.msrb.mxu2 %v1487_v33  ;;  %v1149_v53 = vpop.f32.mrf.mxu3  ;;  %v1169_v57 = vpop.f32.mrf.mxu0  ;;  %v1523_v31 = vld [vmem:[#allocation7 + $0x3b8] sm:$0xff] }
 0x1d3   :  { %1627 = vmatpush.msrb.mxu0 %v1417_v34  ;;  %v1150_v54 = vadd.f32 %v1149_v53, %v1130_v51  ;;  %1609 = vmatpush.msra.mxu3 %v1508_v18  ;;  %v1519_v33 = vld [vmem:[#allocation7 + $0x398] sm:$0xff]  ;;  %v1517_v34 = vld [vmem:[#allocation7 + $0x388] sm:$0xff] }
 0x1d4   :  { %1647 = vmatpush.msrb.mxu1 %v1449_v36  ;;  %1665 = vmatpush.msrb.mxu2 %v1485_v38  ;;  %v1515_v36 = vld [vmem:[#allocation7 + $0x378] sm:$0xff]  ;;  %v1509_v38 = vld [vmem:[#allocation7 + $0x348] sm:$0xff] }
 0x1d5   :  { %1628 = vmatpush.msrb.mxu0 %v1415_v41  ;;  %v1170_v1 = vadd.f32 %v1169_v57, %v1150_v54  ;;  %1610 = vmatpush.msra.mxu3 %v1506_v19  ;;  %v1505_v41 = vld [vmem:[#allocation7 + $0x328] sm:$0xff]  ;;  %v1705_v19 = vld [vmem:[%s4177_s5 + $0x8] sm:$0xff] }
 0x1d6   :  { %1648 = vmatpush.msrb.mxu1 %v1447_v42  ;;  %1666 = vmatpush.msrb.mxu2 %v1483_v44  ;;  %v1503_v42 = vld [vmem:[#allocation7 + $0x318] sm:$0xff]  ;;  %v726_v44 = vperm.slane %v3966_v2, 3  ;;  %v1734_v57 = vld [vmem:[%s4177_s5 + $0xf0] sm:$0xff] }
 0x1d7   :  { %1629 = vmatpush.msrb.mxu0 %v1413_v46  ;;  %v1706_v18 = vld [vmem:[%s4177_s5 + $0x10] sm:$0xff] }
 0x1d8   :  { %1649 = vmatpush.msrb.mxu1 %v1445_v3  ;;  %1667 = vmatpush.msrb.mxu2 %v1481_v23 }
 0x1d9   :  { %1630 = vmatpush.msrb.mxu0 %v1411_v49  ;;  %v1189_v5 = vpop.f32.mrf.mxu1 }
 0x1da   :  { %1650 = vmatpush.msrb.mxu1 %v1443_v50  ;;  %1668 = vmatpush.msrb.mxu2 %v1479_v17  ;;  %v1190_v7 = vadd.f32 %v1189_v5, %v1170_v1  ;;  %v1209_v8 = vpop.f32.mrf.mxu2  ;;  %v1731_v1 = vld [vmem:[%s4177_s5 + $0xd8] sm:$0xff]  ;;  %v1714_v5 = vld [vmem:[%s4177_s5 + $0x50] sm:$0xff] }
 0x1db   :  { %1631 = vmatpush.msrb.mxu0 %v1409_v28 }
 0x1dc   :  { %1651 = vmatpush.msrb.mxu1 %v1441_v52  ;;  %1669 = vmatpush.msrb.mxu2 %v1477_v55  ;;  %v1210_v4 = vadd.f32 %v1209_v8, %v1190_v7  ;;  %v1719_v55 = vld [vmem:[%s4177_s5 + $0x78] sm:$0xff]  ;;  %v1729_v7 = vld [vmem:[%s4177_s5 + $0xc8] sm:$0xff]  ;;  %v1712_v8 = vld [vmem:[%s4177_s5 + $0x40] sm:$0xff] }
 0x1dd   :  { %1632 = vmatpush.msrb.mxu0 %v1407_v21  ;;  %v1229_v11 = vpop.f32.mrf.mxu3  ;;  %v1735_v21 = vld [vmem:[%s4177_s5 + $0xf8] sm:$0xff] }
 0x1de   :  { %1652 = vmatpush.msrb.mxu1 %v1439_v13  ;;  %1670 = vmatpush.msrb.mxu2 %v1475_v58  ;;  %v1230_v16 = vadd.f32 %v1229_v11, %v1210_v4  ;;  %v1717_v13 = vld [vmem:[%s4177_s5 + $0x68] sm:$0xff]  ;;  %v1727_v4 = vld [vmem:[%s4177_s5 + $0xb8] sm:$0xff]  ;;  %v1710_v11 = vld [vmem:[%s4177_s5 + $0x30] sm:$0xff] }
 0x1df   :  { %1633 = vmatpush.msrb.mxu0 %v1405_v63  ;;  %v1733_v58 = vld [vmem:[%s4177_s5 + $0xe8] sm:$0xff]  ;;  %v1732_v63 = vld [vmem:[%s4177_s5 + $0xe0] sm:$0xff] }
 0x1e0   :  { %1653 = vmatpush.msrb.mxu1 %v1437_v0  ;;  %1634 = vmatmul.f32.vlgmr.msrb.gmra.mxu0 %v3992_v60  ;;  %vm1394_vm2 = vcmp.gt.f32.partialorder %v1230_v16, 0.0  ;;  %v1398_v40 = vmul.f32 0.2, %v1230_v16  ;;  %v1715_v0 = vld [vmem:[%s4177_s5 + $0x58] sm:$0xff] }
 0x1e1   :  { %1654 = vmatmul.f32.vlgmr.msrb.gmra.mxu1 %v3994_v62  ;;  %1671 = vmatpush.msrb.mxu2 %v1473_v32  ;;  %v1504_v62 = vld [vmem:[#allocation7 + $0x320] sm:$0xff] }
 0x1e2   :  { %v1402_v60 = vsel %vm1394_vm2, %v1230_v16, %v1398_v40  ;;  %1611 = vmatpush.msra.mxu3 %v1504_v62  ;;  %1740 = vmatpush.msra.mxu0 %v1719_v55  ;;  %v1730_v32 = vld [vmem:[%s4177_s5 + $0xd0] sm:$0xff]  ;;  %v1707_v16 = vld [vmem:[%s4177_s5 + $0x18] sm:$0xff]  ;;  %v1704_v62 = vld [vmem:[%s4177_s5] sm:$0xff] }
 0x1e3   :  { %1672 = vmatpush.msrb.mxu2 %v1471_v35  ;;  %1760 = vmatpush.msra.mxu1 %v1735_v21  ;;  %v1728_v35 = vld [vmem:[%s4177_s5 + $0xc0] sm:$0xff]  ;;  %v1726_v40 = vld [vmem:[%s4177_s5 + $0xb0] sm:$0xff] }
 0x1e4   :  { %1594 = vmatmul.f32.vlgmr.msra.gmra.mxu2 %v1402_v60  ;;  %1612 = vmatpush.msra.mxu3 %v1502_v20  ;;  %v1724_v20 = vld [vmem:[%s4177_s5 + $0xa0] sm:$0xff]  ;;  %v1966_v55 = vld [vmem:[#allocation14 + $0x3e0] sm:$0xff] }
 0x1e5   :  { %1673 = vmatpush.msrb.mxu2 %v1469_v12  ;;  %1741 = vmatpush.msra.mxu0 %v1718_v56  ;;  %v1709_v12 = vld [vmem:[%s4177_s5 + $0x28] sm:$0xff]  ;;  %v1903_v56 = vld [vmem:[#allocation14 + $0x1e8] sm:$0xff] }
 0x1e6   :  { %1613 = vmatpush.msra.mxu3 %v1500_v24  ;;  %1761 = vmatpush.msra.mxu1 %v1734_v57  ;;  %v1723_v24 = vld [vmem:[%s4177_s5 + $0x98] sm:$0xff] }
 0x1e7   :  { %1742 = vmatpush.msra.mxu0 %v1717_v13  ;;  %v1967_v21 = vld [vmem:[#allocation14 + $0x3e8] sm:$0xff]  ;;  %v1898_v13 = vld [vmem:[#allocation14 + $0x1c0] sm:$0xff] }
 0x1e8   :  { %1678 = vmatpush.msrb.mxu3 %v1531_v26  ;;  %1762 = vmatpush.msra.mxu1 %v1733_v58  ;;  %v1722_v26 = vld [vmem:[%s4177_s5 + $0x90] sm:$0xff]  ;;  %v1899_v58 = vld [vmem:[#allocation14 + $0x1c8] sm:$0xff] }
 0x1e9   :  { %1743 = vmatpush.msra.mxu0 %v1716_v59  ;;  %v1962_v57 = vld [vmem:[#allocation14 + $0x3c0] sm:$0xff]  ;;  %v1963_v59 = vld [vmem:[#allocation14 + $0x3c8] sm:$0xff] }
 0x1ea   :  { %1679 = vmatpush.msrb.mxu3 %v1529_v27  ;;  %1763 = vmatpush.msra.mxu1 %v1732_v63  ;;  %v1721_v27 = vld [vmem:[%s4177_s5 + $0x88] sm:$0xff]  ;;  %v1894_v63 = vld [vmem:[#allocation14 + $0x1a0] sm:$0xff] }
 0x1eb   :  { %1744 = vmatpush.msra.mxu0 %v1715_v0  ;;  %v1958_v0 = vld [vmem:[#allocation14 + $0x3a0] sm:$0xff] }
 0x1ec   :  { %1674 = vmatmul.f32.vlgmr.msrb.gmra.mxu2 %v1402_v60  ;;  %1680 = vmatpush.msrb.mxu3 %v1527_v29  ;;  %v1725_v60 = vld [vmem:[%s4177_s5 + $0xa8] sm:$0xff]  ;;  %v1720_v29 = vld [vmem:[%s4177_s5 + $0x80] sm:$0xff] }
 0x1ed   :  { %1764 = vmatpush.msra.mxu1 %v1731_v1  ;;  %1745 = vmatpush.msra.mxu0 %v1714_v5  ;;  %v1895_v1 = vld [vmem:[#allocation14 + $0x1a8] sm:$0xff] }
 0x1ee   :  { %1681 = vmatpush.msrb.mxu3 %v1525_v30  ;;  %v1532_v30 = vld [vmem:[#allocation8] sm:$0x3]  ;;  %v1959_v5 = vld [vmem:[#allocation14 + $0x3a8] sm:$0xff] }
 0x1ef   :  { %1765 = vmatpush.msra.mxu1 %v1730_v32  ;;  %1746 = vmatpush.msra.mxu0 %v1713_v6  ;;  %v1890_v32 = vld [vmem:[#allocation14 + $0x180] sm:$0xff] }
 0x1f0   :  { %1682 = vmatpush.msrb.mxu3 %v1523_v31  ;;  %v1534_v31 = vperm.slane %v1532_v30, 0  ;;  %v1954_v6 = vld [vmem:[#allocation14 + $0x380] sm:$0xff] }
 0x1f1   :  { %1766 = vmatpush.msra.mxu1 %v1729_v7  ;;  %1747 = vmatpush.msra.mxu0 %v1712_v8  ;;  %v1891_v7 = vld [vmem:[#allocation14 + $0x188] sm:$0xff] }
 0x1f2   :  { %1683 = vmatpush.msrb.mxu3 %v1521_v61  ;;  %v1955_v8 = vld [vmem:[#allocation14 + $0x388] sm:$0xff] }
 0x1f3   :  { %1767 = vmatpush.msra.mxu1 %v1728_v35  ;;  %1748 = vmatpush.msra.mxu0 %v1711_v10  ;;  %v1886_v35 = vld [vmem:[#allocation14 + $0x160] sm:$0xff] }
 0x1f4   :  { %1684 = vmatpush.msrb.mxu3 %v1519_v33  ;;  %v1950_v10 = vld [vmem:[#allocation14 + $0x360] sm:$0xff] }
 0x1f5   :  { %1768 = vmatpush.msra.mxu1 %v1727_v4  ;;  %1749 = vmatpush.msra.mxu0 %v1710_v11  ;;  %v1887_v4 = vld [vmem:[#allocation14 + $0x168] sm:$0xff] }
 0x1f6   :  { %1685 = vmatpush.msrb.mxu3 %v1517_v34  ;;  %v1951_v11 = vld [vmem:[#allocation14 + $0x368] sm:$0xff] }
 0x1f7   :  { %1750 = vmatpush.msra.mxu0 %v1709_v12  ;;  %1769 = vmatpush.msra.mxu1 %v1726_v40  ;;  %v1882_v12 = vld [vmem:[#allocation14 + $0x140] sm:$0xff] }
 0x1f8   :  { %1686 = vmatpush.msrb.mxu3 %v1515_v36  ;;  %v1878_v40 = vld [vmem:[#allocation14 + $0x120] sm:$0xff] }
 0x1f9   :  { %1751 = vmatpush.msra.mxu0 %v1708_v14  ;;  %1770 = vmatpush.msra.mxu1 %v1725_v60  ;;  %v1946_v14 = vld [vmem:[#allocation14 + $0x340] sm:$0xff]  ;;  %v1879_v60 = vld [vmem:[#allocation14 + $0x128] sm:$0xff] }
 0x1fa   :  { %1687 = vmatpush.msrb.mxu3 %v1513_v37 }
 0x1fb   :  { %1752 = vmatpush.msra.mxu0 %v1707_v16  ;;  %1771 = vmatpush.msra.mxu1 %v1724_v20  ;;  %v1883_v16 = vld [vmem:[#allocation14 + $0x148] sm:$0xff]  ;;  %v1874_v20 = vld [vmem:[#allocation14 + $0x100] sm:$0xff] }
 0x1fc   :  { %1688 = vmatpush.msrb.mxu3 %v1511_v25  ;;  %v1535_v25 = vperm.slane %v1532_v30, 1  ;;  %v1934_v30 = vld [vmem:[#allocation14 + $0x2e0] sm:$0xff] }
 0x1fd   :  { %1753 = vmatpush.msra.mxu0 %v1706_v18  ;;  %1772 = vmatpush.msra.mxu1 %v1723_v24  ;;  %v1947_v18 = vld [vmem:[#allocation14 + $0x348] sm:$0xff]  ;;  %v1938_v24 = vld [vmem:[#allocation14 + $0x300] sm:$0xff] }
 0x1fe   :  { %1689 = vmatpush.msrb.mxu3 %v1509_v38 }
 0x1ff   :  { %1754 = vmatpush.msra.mxu0 %v1705_v19  ;;  %1773 = vmatpush.msra.mxu1 %v1722_v26  ;;  %v1942_v19 = vld [vmem:[#allocation14 + $0x320] sm:$0xff]  ;;  %v1875_v26 = vld [vmem:[#allocation14 + $0x108] sm:$0xff] }
 0x200   :  { %1690 = vmatpush.msrb.mxu3 %v1507_v39 }
 0x201   :  { %1755 = vmatpush.msra.mxu0 %v1704_v62  ;;  %1774 = vmatpush.msra.mxu1 %v1721_v27  ;;  %v1943_v62 = vld [vmem:[#allocation14 + $0x328] sm:$0xff] }
 0x202   :  { %1691 = vmatpush.msrb.mxu3 %v1505_v41  ;;  %v1939_v27 = vld [vmem:[#allocation14 + $0x308] sm:$0xff] }
 0x203   :  { %1775 = vmatpush.msra.mxu1 %v1720_v29  ;;  %2020 = vmatpush.msrb.mxu0 %v1903_v56  ;;  %v1870_v29 = vld [vmem:[#allocation14 + $0xe0] sm:$0xff] }
 0x204   :  { %1692 = vmatpush.msrb.mxu3 %v1503_v42  ;;  %v1906_v56 = vld [vmem:[#allocation14 + $0x200] sm:$0xff] }
 0x205   :  { %2040 = vmatpush.msrb.mxu1 %v1967_v21  ;;  %2021 = vmatpush.msrb.mxu0 %v1899_v58  ;;  %v1843_v21 = vld [vmem:[#allocation14 + $0x8] sm:$0xff]  ;;  %v1968_v58 = vld [vmem:[#allocation14 + $0x3f0] sm:$0xff] }
 0x206   :  { %1693 = vmatpush.msrb.mxu3 %v1501_v43 }
 0x207   :  { %2041 = vmatpush.msrb.mxu1 %v1963_v59  ;;  %2022 = vmatpush.msrb.mxu0 %v1895_v1  ;;  %v1905_v59 = vld [vmem:[#allocation14 + $0x1f8] sm:$0xff]  ;;  %v1964_v1 = vld [vmem:[#allocation14 + $0x3d0] sm:$0xff] }
 0x209   :  { %2042 = vmatpush.msrb.mxu1 %v1959_v5  ;;  %2023 = vmatpush.msrb.mxu0 %v1891_v7  ;;  %v1901_v5 = vld [vmem:[#allocation14 + $0x1d8] sm:$0xff]  ;;  %v1960_v7 = vld [vmem:[#allocation14 + $0x3b0] sm:$0xff] }
 0x20b   :  { %2043 = vmatpush.msrb.mxu1 %v1955_v8  ;;  %2024 = vmatpush.msrb.mxu0 %v1887_v4  ;;  %v1897_v8 = vld [vmem:[#allocation14 + $0x1b8] sm:$0xff]  ;;  %v1956_v4 = vld [vmem:[#allocation14 + $0x390] sm:$0xff] }
 0x20d   :  { %2044 = vmatpush.msrb.mxu1 %v1951_v11  ;;  %2025 = vmatpush.msrb.mxu0 %v1883_v16  ;;  %v1893_v11 = vld [vmem:[#allocation14 + $0x198] sm:$0xff]  ;;  %v1952_v16 = vld [vmem:[#allocation14 + $0x370] sm:$0xff] }
 0x20f   :  { %v1249_v45 = vpop.f32.mrf.mxu0  ;;  %2045 = vmatpush.msrb.mxu1 %v1947_v18  ;;  %2026 = vmatpush.msrb.mxu0 %v1879_v60  ;;  %v1889_v18 = vld [vmem:[#allocation14 + $0x178] sm:$0xff]  ;;  %v1948_v60 = vld [vmem:[#allocation14 + $0x350] sm:$0xff] }
 0x210   :  { %v1250_v46 = vadd.f32 %v1249_v45, %v726_v44  ;;  %v1269_v3 = vpop.f32.mrf.mxu1 }
 0x211   :  { %2046 = vmatpush.msrb.mxu1 %v1943_v62  ;;  %2027 = vmatpush.msrb.mxu0 %v1875_v26  ;;  %v1885_v62 = vld [vmem:[#allocation14 + $0x158] sm:$0xff]  ;;  %v1944_v26 = vld [vmem:[#allocation14 + $0x330] sm:$0xff] }
 0x212   :  { %v1270_v9 = vadd.f32 %v1269_v3, %v1250_v46 }
 0x213   :  { %v1289_v47 = vpop.f32.mrf.mxu2  ;;  %2047 = vmatpush.msrb.mxu1 %v1939_v27  ;;  %v1881_v27 = vld [vmem:[#allocation14 + $0x138] sm:$0xff] }
 0x214   :  { %v1290_v22 = vadd.f32 %v1289_v47, %v1270_v9  ;;  %v1309_v23 = vpop.f32.mrf.mxu3 }
 0x216   :  { %v1310_v48 = vadd.f32 %v1309_v23, %v1290_v22 }
 0x21b   :  { %v1329_v49 = vpop.f32.mrf.mxu0 }
 0x21c   :  { %v1330_v50 = vadd.f32 %v1329_v49, %v1310_v48  ;;  %v1349_v51 = vpop.f32.mrf.mxu1 }
 0x21e   :  { %v1350_v17 = vadd.f32 %v1349_v51, %v1330_v50  ;;  %v1788_v50 = vld [vmem:[#allocation11 + $0x30] sm:$0xff]  ;;  %v1789_v51 = vld [vmem:[#allocation11 + $0x38] sm:$0xff] }
 0x21f   :  { %1812 = vmatpush.msra.mxu2 %v1788_v50  ;;  %v1851_v50 = vld [vmem:[#allocation14 + $0x48] sm:$0xff] }
 0x223   :  { %v1369_v15 = vpop.f32.mrf.mxu2 }
 0x224   :  { %v1370_v28 = vadd.f32 %v1369_v15, %v1350_v17  ;;  %v1786_v17 = vld [vmem:[#allocation11 + $0x20] sm:$0xff]  ;;  %v1787_v15 = vld [vmem:[#allocation11 + $0x28] sm:$0xff] }
 0x225   :  { %1813 = vmatpush.msra.mxu2 %v1786_v17  ;;  %v1846_v17 = vld [vmem:[#allocation14 + $0x20] sm:$0xff] }
 0x227   :  { %v1389_v52 = vpop.f32.mrf.mxu3 }
 0x228   :  { %v1390_v53 = vadd.f32 %v1389_v52, %v1370_v28  ;;  %v1784_v28 = vld [vmem:[#allocation11 + $0x10] sm:$0xff]  ;;  %v1785_v52 = vld [vmem:[#allocation11 + $0x18] sm:$0xff] }
 0x229   :  { %1814 = vmatpush.msra.mxu2 %v1784_v28 }
 0x22a   :  { %vm1395_vm3 = vcmp.gt.f32.partialorder %v1390_v53, 0.0  ;;  %v1399_v2 = vmul.f32 0.2, %v1390_v53 }
 0x22c   :  { %v1403_v54 = vsel %vm1395_vm3, %v1390_v53, %v1399_v2  ;;  %v1782_v53 = vld [vmem:[#allocation11] sm:$0xff]  ;;  %v1783_v2 = vld [vmem:[#allocation11 + $0x8] sm:$0xff] }
 0x22d   :  { %1614 = vmatmul.f32.vlgmr.msra.gmra.mxu3 %v1403_v54  ;;  %1815 = vmatpush.msra.mxu2 %v1782_v53  ;;  %v1911_v53 = vld [vmem:[#allocation14 + $0x228] sm:$0xff] }
 0x22e   :  { %1832 = vmatpush.msra.mxu3 %v1789_v51  ;;  %v1915_v51 = vld [vmem:[#allocation14 + $0x248] sm:$0xff] }
 0x230   :  { %1833 = vmatpush.msra.mxu3 %v1787_v15  ;;  %v1910_v15 = vld [vmem:[#allocation14 + $0x220] sm:$0xff] }
 0x232   :  { %1834 = vmatpush.msra.mxu3 %v1785_v52  ;;  %v1847_v52 = vld [vmem:[#allocation14 + $0x28] sm:$0xff] }
 0x234   :  { %1835 = vmatpush.msra.mxu3 %v1783_v2 }
 0x235   :  { %1694 = vmatmul.f32.vlgmr.msrb.gmra.mxu3 %v1403_v54  ;;  %v1902_v54 = vld [vmem:[#allocation14 + $0x1e0] sm:$0xff] }
 0x236   :  { %1980 = vmatpush.msrb.mxu2 %v1902_v54  ;;  %2000 = vmatpush.msrb.mxu3 %v1966_v55  ;;  %v1842_v55 = vld [vmem:[#allocation14] sm:$0xff] }
 0x238   :  { %1981 = vmatpush.msrb.mxu2 %v1898_v13  ;;  %2001 = vmatpush.msrb.mxu3 %v1962_v57  ;;  %v1907_v13 = vld [vmem:[#allocation14 + $0x208] sm:$0xff]  ;;  %v1904_v57 = vld [vmem:[#allocation14 + $0x1f0] sm:$0xff] }
 0x23a   :  { %1982 = vmatpush.msrb.mxu2 %v1894_v63  ;;  %2002 = vmatpush.msrb.mxu3 %v1958_v0  ;;  %v1969_v63 = vld [vmem:[#allocation14 + $0x3f8] sm:$0xff]  ;;  %v1900_v0 = vld [vmem:[#allocation14 + $0x1d0] sm:$0xff] }
 0x23c   :  { %1983 = vmatpush.msrb.mxu2 %v1890_v32  ;;  %2003 = vmatpush.msrb.mxu3 %v1954_v6  ;;  %v1965_v32 = vld [vmem:[#allocation14 + $0x3d8] sm:$0xff]  ;;  %v1896_v6 = vld [vmem:[#allocation14 + $0x1b0] sm:$0xff] }
 0x23d   :  { %v1555_v61 = vpop.f32.mrf.mxu0 }
 0x23e   :  { %v1556_v33 = vadd.f32 %v1555_v61, %v1534_v31  ;;  %v1575_v36 = vpop.f32.mrf.mxu1  ;;  %1984 = vmatpush.msrb.mxu2 %v1886_v35  ;;  %2004 = vmatpush.msrb.mxu3 %v1950_v10  ;;  %v1871_v31 = vld [vmem:[#allocation14 + $0xe8] sm:$0xff]  ;;  %v1961_v35 = vld [vmem:[#allocation14 + $0x3b8] sm:$0xff]  ;;  %v1892_v10 = vld [vmem:[#allocation14 + $0x190] sm:$0xff] }
 0x23f   :  { %v1935_v61 = vld [vmem:[#allocation14 + $0x2e8] sm:$0xff]  ;;  %2028 = vmatpush.msrb.mxu0 %v1871_v31  ;;  %v1940_v31 = vld [vmem:[#allocation14 + $0x310] sm:$0xff] }
 0x240   :  { %v1576_v37 = vadd.f32 %v1575_v36, %v1556_v33  ;;  %1985 = vmatpush.msrb.mxu2 %v1882_v12  ;;  %2005 = vmatpush.msrb.mxu3 %v1946_v14  ;;  %v1866_v33 = vld [vmem:[#allocation14 + $0xc0] sm:$0xff]  ;;  %v1867_v36 = vld [vmem:[#allocation14 + $0xc8] sm:$0xff]  ;;  %v1957_v12 = vld [vmem:[#allocation14 + $0x398] sm:$0xff] }
 0x241   :  { %2048 = vmatpush.msrb.mxu1 %v1935_v61  ;;  %2029 = vmatpush.msrb.mxu0 %v1867_v36  ;;  %v1888_v14 = vld [vmem:[#allocation14 + $0x170] sm:$0xff]  ;;  %v1877_v61 = vld [vmem:[#allocation14 + $0x118] sm:$0xff] }
 0x242   :  { %1986 = vmatpush.msrb.mxu2 %v1878_v40  ;;  %2006 = vmatpush.msrb.mxu3 %v1942_v19  ;;  %v1953_v40 = vld [vmem:[#allocation14 + $0x378] sm:$0xff]  ;;  %v1884_v19 = vld [vmem:[#allocation14 + $0x150] sm:$0xff] }
 0x243   :  { %v1936_v36 = vld [vmem:[#allocation14 + $0x2f0] sm:$0xff] }
 0x244   :  { %1987 = vmatpush.msrb.mxu2 %v1874_v20  ;;  %2007 = vmatpush.msrb.mxu3 %v1938_v24  ;;  %v1949_v20 = vld [vmem:[#allocation14 + $0x358] sm:$0xff]  ;;  %v1880_v24 = vld [vmem:[#allocation14 + $0x130] sm:$0xff] }
 0x246   :  { %1988 = vmatpush.msrb.mxu2 %v1870_v29  ;;  %2008 = vmatpush.msrb.mxu3 %v1934_v30  ;;  %v1945_v29 = vld [vmem:[#allocation14 + $0x338] sm:$0xff]  ;;  %v1876_v30 = vld [vmem:[#allocation14 + $0x110] sm:$0xff] }
 0x248   :  { %1989 = vmatpush.msrb.mxu2 %v1866_v33  ;;  %v1941_v33 = vld [vmem:[#allocation14 + $0x318] sm:$0xff] }
 0x25d   :  { %v1635_v38 = vpop.f32.mrf.mxu0 }
 0x25e   :  { %v1636_v42 = vadd.f32 %v1635_v38, %v1535_v25  ;;  %v1655_v45 = vpop.f32.mrf.mxu1  ;;  %v1862_v25 = vld [vmem:[#allocation14 + $0xa0] sm:$0xff] }
 0x25f   :  { %v1926_v38 = vld [vmem:[#allocation14 + $0x2a0] sm:$0xff]  ;;  %1990 = vmatpush.msrb.mxu2 %v1862_v25  ;;  %v1937_v25 = vld [vmem:[#allocation14 + $0x2f8] sm:$0xff] }
 0x260   :  { %v1656_v3 = vadd.f32 %v1655_v45, %v1636_v42  ;;  %v1858_v42 = vld [vmem:[#allocation14 + $0x80] sm:$0xff]  ;;  %v1923_v45 = vld [vmem:[#allocation14 + $0x288] sm:$0xff] }
 0x261   :  { %1991 = vmatpush.msrb.mxu2 %v1858_v42  ;;  %v1933_v42 = vld [vmem:[#allocation14 + $0x2d8] sm:$0xff] }
 0x267   :  { %v1595_v34 = vpop.f32.mrf.mxu2 }
 0x268   :  { %v1596_v39 = vadd.f32 %v1595_v34, %v1576_v37  ;;  %v1930_v34 = vld [vmem:[#allocation14 + $0x2c0] sm:$0xff]  ;;  %v1931_v37 = vld [vmem:[#allocation14 + $0x2c8] sm:$0xff] }
 0x269   :  { %2009 = vmatpush.msrb.mxu3 %v1930_v34  ;;  %2049 = vmatpush.msrb.mxu1 %v1931_v37  ;;  %v1872_v34 = vld [vmem:[#allocation14 + $0xf0] sm:$0xff]  ;;  %v1873_v37 = vld [vmem:[#allocation14 + $0xf8] sm:$0xff] }
 0x26b   :  { %2010 = vmatpush.msrb.mxu3 %v1926_v38  ;;  %v1868_v38 = vld [vmem:[#allocation14 + $0xd0] sm:$0xff] }
 0x26f   :  { %v1675_v46 = vpop.f32.mrf.mxu2 }
 0x270   :  { %v1676_v47 = vadd.f32 %v1675_v46, %v1656_v3  ;;  %v1854_v46 = vld [vmem:[#allocation14 + $0x60] sm:$0xff] }
 0x271   :  { %v1918_v3 = vld [vmem:[#allocation14 + $0x260] sm:$0xff]  ;;  %1992 = vmatpush.msrb.mxu2 %v1854_v46  ;;  %v1929_v46 = vld [vmem:[#allocation14 + $0x2b8] sm:$0xff] }
 0x2b0   :  { %v1615_v41 = vpop.f32.mrf.mxu3 }
 0x2b1   :  { %v1616_v43 = vadd.f32 %v1615_v41, %v1596_v39  ;;  %v1863_v39 = vld [vmem:[#allocation14 + $0xa8] sm:$0xff] }
 0x2b2   :  { %v1927_v41 = vld [vmem:[#allocation14 + $0x2a8] sm:$0xff]  ;;  %2030 = vmatpush.msrb.mxu0 %v1863_v39  ;;  %v1932_v39 = vld [vmem:[#allocation14 + $0x2d0] sm:$0xff] }
 0x2b3   :  { %vm1698_vm4 = vcmp.gt.f32.partialorder %v1616_v43, 0.0  ;;  %v1700_v44 = vmul.f32 0.2, %v1616_v43  ;;  %2050 = vmatpush.msrb.mxu1 %v1927_v41  ;;  %v1869_v41 = vld [vmem:[#allocation14 + $0xd8] sm:$0xff] }
 0x2b5   :  { %v1702_v9 = vsel %vm1698_vm4, %v1616_v43, %v1700_v44  ;;  %v1922_v43 = vld [vmem:[#allocation14 + $0x280] sm:$0xff]  ;;  %v1859_v44 = vld [vmem:[#allocation14 + $0x88] sm:$0xff]  ;;  %2051 = vmatpush.msrb.mxu1 %v1923_v45  ;;  %v1865_v45 = vld [vmem:[#allocation14 + $0xb8] sm:$0xff] }
 0x2b6   :  { %1756 = vmatmul.f32.vlgmr.msra.gmra.mxu0 %v1702_v9  ;;  %v3408_v9 = vld [vmem:[#allocation10] ss:$0 sm:$0xff]  ;;  %2011 = vmatpush.msrb.mxu3 %v1922_v43  ;;  %v1864_v43 = vld [vmem:[#allocation14 + $0xb0] sm:$0xff] }
 0x2b7   :  { %2031 = vmatpush.msrb.mxu0 %v1859_v44  ;;  %v1928_v44 = vld [vmem:[#allocation14 + $0x2b0] sm:$0xff] }
 0x2b8   :  { %v1695_v22 = vpop.f32.mrf.mxu3  ;;  %2012 = vmatpush.msrb.mxu3 %v1918_v3  ;;  %v1860_v3 = vld [vmem:[#allocation14 + $0x90] sm:$0xff] }
 0x2b9   :  { %v1696_v23 = vadd.f32 %v1695_v22, %v1676_v47  ;;  %v1855_v47 = vld [vmem:[#allocation14 + $0x68] sm:$0xff] }
 0x2ba   :  { %v1919_v22 = vld [vmem:[#allocation14 + $0x268] sm:$0xff]  ;;  %2032 = vmatpush.msrb.mxu0 %v1855_v47  ;;  %v1861_v47 = vld [vmem:[#allocation14 + $0x98] sm:$0xff] }
 0x2bb   :  { %vm1699_vm5 = vcmp.gt.f32.partialorder %v1696_v23, 0.0  ;;  %v1701_v48 = vmul.f32 0.2, %v1696_v23  ;;  %2052 = vmatpush.msrb.mxu1 %v1919_v22  ;;  %v1925_v22 = vld [vmem:[#allocation14 + $0x298] sm:$0xff] }
 0x2bc   :  { %2033 = vmatpush.msrb.mxu0 %v1851_v50  ;;  %v1921_v50 = vld [vmem:[#allocation14 + $0x278] sm:$0xff] }
 0x2bd   :  { %v1703_v49 = vsel %vm1699_vm5, %v1696_v23, %v1701_v48  ;;  %v1850_v48 = vld [vmem:[#allocation14 + $0x40] sm:$0xff]  ;;  %2053 = vmatpush.msrb.mxu1 %v1915_v51  ;;  %v1852_v51 = vld [vmem:[#allocation14 + $0x50] sm:$0xff] }
 0x2be   :  { %1776 = vmatmul.f32.vlgmr.msra.gmra.mxu1 %v1703_v49  ;;  %v1914_v49 = vld [vmem:[#allocation14 + $0x240] sm:$0xff]  ;;  %1993 = vmatpush.msrb.mxu2 %v1850_v48  ;;  %v1920_v48 = vld [vmem:[#allocation14 + $0x270] sm:$0xff] }
 0x2bf   :  { %2013 = vmatpush.msrb.mxu3 %v1914_v49  ;;  %2034 = vmatpush.msrb.mxu0 %v1847_v52  ;;  %v1857_v49 = vld [vmem:[#allocation14 + $0x78] sm:$0xff]  ;;  %v1848_v52 = vld [vmem:[#allocation14 + $0x30] sm:$0xff] }
 0x2c0   :  { %1994 = vmatpush.msrb.mxu2 %v1846_v17  ;;  %2054 = vmatpush.msrb.mxu1 %v1911_v53  ;;  %v1916_v17 = vld [vmem:[#allocation14 + $0x250] sm:$0xff] }
 0x2c1   :  { %2014 = vmatpush.msrb.mxu3 %v1910_v15  ;;  %2035 = vmatpush.msrb.mxu0 %v1843_v21  ;;  %v1853_v15 = vld [vmem:[#allocation14 + $0x58] sm:$0xff]  ;;  %v1912_v53 = vld [vmem:[#allocation14 + $0x230] sm:$0xff] }
 0x2c2   :  { %1995 = vmatpush.msrb.mxu2 %v1842_v55  ;;  %2055 = vmatpush.msrb.mxu1 %v1907_v13  ;;  %v1844_v55 = vld [vmem:[#allocation14 + $0x10] sm:$0xff]  ;;  %v1845_v21 = vld [vmem:[#allocation14 + $0x18] sm:$0xff] }
 0x2c3   :  { %2015 = vmatpush.msrb.mxu3 %v1906_v56  ;;  %2100 = vmatpush.msra.mxu0 %v1905_v59  ;;  %v1908_v56 = vld [vmem:[#allocation14 + $0x210] sm:$0xff]  ;;  %v1909_v13 = vld [vmem:[#allocation14 + $0x218] sm:$0xff] }
 0x2c4   :  { %2120 = vmatpush.msra.mxu1 %v1969_v63 }
 0x2c5   :  { %2101 = vmatpush.msra.mxu0 %v1901_v5 }
 0x2c6   :  { %2121 = vmatpush.msra.mxu1 %v1965_v32 }
 0x2c7   :  { %2102 = vmatpush.msra.mxu0 %v1897_v8  ;;  %v2264_v8 = vld [vmem:[#allocation17 + $0x3c0] sm:$0xff] }
 0x2c8   :  { %2122 = vmatpush.msra.mxu1 %v1961_v35  ;;  %v2648_v35 = vld [vmem:[#allocation17 + $0xfc0] sm:$0xff] }
 0x2c9   :  { %2103 = vmatpush.msra.mxu0 %v1893_v11  ;;  %v2256_v11 = vld [vmem:[#allocation17 + $0x380] sm:$0xff] }
 0x2ca   :  { %2123 = vmatpush.msra.mxu1 %v1957_v12  ;;  %v2640_v12 = vld [vmem:[#allocation17 + $0xf80] sm:$0xff] }
 0x2cb   :  { %2104 = vmatpush.msra.mxu0 %v1889_v18  ;;  %v2248_v18 = vld [vmem:[#allocation17 + $0x340] sm:$0xff] }
 0x2cc   :  { %2124 = vmatpush.msra.mxu1 %v1953_v40  ;;  %v2632_v40 = vld [vmem:[#allocation17 + $0xf40] sm:$0xff] }
 0x2cd   :  { %2105 = vmatpush.msra.mxu0 %v1885_v62  ;;  %v2240_v62 = vld [vmem:[#allocation17 + $0x300] sm:$0xff] }
 0x2ce   :  { %2125 = vmatpush.msra.mxu1 %v1949_v20  ;;  %v2624_v20 = vld [vmem:[#allocation17 + $0xf00] sm:$0xff] }
 0x2cf   :  { %2106 = vmatpush.msra.mxu0 %v1881_v27  ;;  %v2232_v27 = vld [vmem:[#allocation17 + $0x2c0] sm:$0xff] }
 0x2d0   :  { %2126 = vmatpush.msra.mxu1 %v1945_v29  ;;  %v2616_v29 = vld [vmem:[#allocation17 + $0xec0] sm:$0xff] }
 0x2d1   :  { %2107 = vmatpush.msra.mxu0 %v1877_v61  ;;  %v2224_v61 = vld [vmem:[#allocation17 + $0x280] sm:$0xff] }
 0x2d2   :  { %2127 = vmatpush.msra.mxu1 %v1941_v33  ;;  %v2608_v33 = vld [vmem:[#allocation17 + $0xe80] sm:$0xff] }
 0x2d3   :  { %2108 = vmatpush.msra.mxu0 %v1873_v37  ;;  %v2216_v37 = vld [vmem:[#allocation17 + $0x240] sm:$0xff] }
 0x2d4   :  { %2128 = vmatpush.msra.mxu1 %v1937_v25  ;;  %v2600_v25 = vld [vmem:[#allocation17 + $0xe40] sm:$0xff] }
 0x2d5   :  { %2109 = vmatpush.msra.mxu0 %v1869_v41  ;;  %v2208_v41 = vld [vmem:[#allocation17 + $0x200] sm:$0xff] }
 0x2d6   :  { %2129 = vmatpush.msra.mxu1 %v1933_v42  ;;  %v2592_v42 = vld [vmem:[#allocation17 + $0xe00] sm:$0xff] }
 0x2d7   :  { %2110 = vmatpush.msra.mxu0 %v1865_v45  ;;  %v2200_v45 = vld [vmem:[#allocation17 + $0x1c0] sm:$0xff] }
 0x2d8   :  { %2130 = vmatpush.msra.mxu1 %v1929_v46  ;;  %v2584_v46 = vld [vmem:[#allocation17 + $0xdc0] sm:$0xff] }
 0x2d9   :  { %2111 = vmatpush.msra.mxu0 %v1861_v47  ;;  %v2192_v47 = vld [vmem:[#allocation17 + $0x180] sm:$0xff] }
 0x2da   :  { %2131 = vmatpush.msra.mxu1 %v1925_v22  ;;  %v2576_v22 = vld [vmem:[#allocation17 + $0xd80] sm:$0xff] }
 0x2db   :  { %2112 = vmatpush.msra.mxu0 %v1857_v49  ;;  %v2184_v49 = vld [vmem:[#allocation17 + $0x140] sm:$0xff] }
 0x2dc   :  { %2132 = vmatpush.msra.mxu1 %v1921_v50  ;;  %v2568_v50 = vld [vmem:[#allocation17 + $0xd40] sm:$0xff] }
 0x2dd   :  { %2113 = vmatpush.msra.mxu0 %v1853_v15  ;;  %v2176_v15 = vld [vmem:[#allocation17 + $0x100] sm:$0xff] }
 0x333   :  { %v1757_v23 = vpop.f32.mrf.mxu0 }
 0x334   :  { %v1758_v28 = vadd.f32 %v3408_v9, %v1757_v23  ;;  %v1924_v9 = vld [vmem:[#allocation14 + $0x290] sm:$0xff] }
 0x335   :  { %v1856_v23 = vld [vmem:[#allocation14 + $0x70] sm:$0xff] }
 0x33b   :  { %v1777_v2 = vpop.f32.mrf.mxu1 }
 0x33c   :  { %v1778_v54 = vadd.f32 %v1777_v2, %v1758_v28  ;;  %v1917_v28 = vld [vmem:[#allocation14 + $0x258] sm:$0xff] }
 0x33d   :  { %v1849_v2 = vld [vmem:[#allocation14 + $0x38] sm:$0xff]  ;;  %2133 = vmatpush.msra.mxu1 %v1917_v28  ;;  %v2560_v28 = vld [vmem:[#allocation17 + $0xd00] sm:$0xff] }
 0x33e   :  { %3387 = vmatmul.msk.f32.vlgmr.msra.gmra.mxu2 %vm1796_vm6, %v1778_v54  ;;  %3388 = vmatmul.msk.f32.vlgmr.msra.gmra.mxu3 %vm1796_vm6, %v1778_v54  ;;  %1781 = vst.msk [vmem:[#allocation20] sm:$0x3] %vm1780_vm7, %v1778_v54  ;;  %v1913_v54 = vld [vmem:[#allocation14 + $0x238] sm:$0xff] }
 0x33f   :  { %2060 = vmatpush.msra.mxu2 %v1904_v57  ;;  %2080 = vmatpush.msra.mxu3 %v1968_v58  ;;  %v1790_v57 = vld [vmem:[#allocation13] sm:$0x3]  ;;  %3359 = dma.vmem_to_hbm [thread:$0]  %s3355_s3, 32, %s3357_s22, [#allocation4]  }
 0x340   :  { %2114 = vmatpush.msra.mxu0 %v1849_v2  ;;  %2134 = vmatpush.msra.mxu1 %v1913_v54  ;;  %v1792_v58 = vperm.slane %v1790_v57, 0  ;;  %v1793_v59 = vperm.slane %v1790_v57, 1  ;;  %v2168_v2 = vld [vmem:[#allocation17 + $0xc0] sm:$0xff] }
 0x341   :  { %2061 = vmatpush.msra.mxu2 %v1900_v0  ;;  %2081 = vmatpush.msra.mxu3 %v1964_v1  ;;  %v2552_v54 = vld [vmem:[#allocation17 + $0xcc0] sm:$0xff] }
 0x342   :  { %2115 = vmatpush.msra.mxu0 %v1845_v21  ;;  %2135 = vmatpush.msra.mxu1 %v1909_v13  ;;  %v2160_v21 = vld [vmem:[#allocation17 + $0x80] sm:$0xff] }
 0x343   :  { %2062 = vmatpush.msra.mxu2 %v1896_v6  ;;  %2082 = vmatpush.msra.mxu3 %v1960_v7  ;;  %v2392_v7 = vld [vmem:[#allocation17 + $0x7c0] sm:$0xff] }
 0x344   :  { %v2544_v13 = vld [vmem:[#allocation17 + $0xc80] sm:$0xff] }
 0x345   :  { %2063 = vmatpush.msra.mxu2 %v1892_v10  ;;  %2083 = vmatpush.msra.mxu3 %v1956_v4  ;;  %v2520_v10 = vld [vmem:[#allocation17 + $0xbc0] sm:$0xff] }
 0x346   :  { %v2384_v4 = vld [vmem:[#allocation17 + $0x780] sm:$0xff] }
 0x347   :  { %2064 = vmatpush.msra.mxu2 %v1888_v14  ;;  %2084 = vmatpush.msra.mxu3 %v1952_v16  ;;  %v2512_v14 = vld [vmem:[#allocation17 + $0xb80] sm:$0xff] }
 0x348   :  { %v2376_v16 = vld [vmem:[#allocation17 + $0x740] sm:$0xff] }
 0x349   :  { %2065 = vmatpush.msra.mxu2 %v1884_v19  ;;  %2085 = vmatpush.msra.mxu3 %v1948_v60  ;;  %v2504_v19 = vld [vmem:[#allocation17 + $0xb40] sm:$0xff] }
 0x34a   :  { %v2368_v60 = vld [vmem:[#allocation17 + $0x700] sm:$0xff] }
 0x34b   :  { %2066 = vmatpush.msra.mxu2 %v1880_v24  ;;  %2086 = vmatpush.msra.mxu3 %v1944_v26  ;;  %v2496_v24 = vld [vmem:[#allocation17 + $0xb00] sm:$0xff] }
 0x34c   :  { %v2360_v26 = vld [vmem:[#allocation17 + $0x6c0] sm:$0xff] }
 0x34d   :  { %2067 = vmatpush.msra.mxu2 %v1876_v30  ;;  %2087 = vmatpush.msra.mxu3 %v1940_v31  ;;  %v2488_v30 = vld [vmem:[#allocation17 + $0xac0] sm:$0xff] }
 0x34e   :  { %v2352_v31 = vld [vmem:[#allocation17 + $0x680] sm:$0xff] }
 0x34f   :  { %2068 = vmatpush.msra.mxu2 %v1872_v34  ;;  %2088 = vmatpush.msra.mxu3 %v1936_v36  ;;  %v2480_v34 = vld [vmem:[#allocation17 + $0xa80] sm:$0xff] }
 0x350   :  { %v2344_v36 = vld [vmem:[#allocation17 + $0x640] sm:$0xff] }
 0x351   :  { %2069 = vmatpush.msra.mxu2 %v1868_v38  ;;  %2089 = vmatpush.msra.mxu3 %v1932_v39  ;;  %v2472_v38 = vld [vmem:[#allocation17 + $0xa40] sm:$0xff] }
 0x352   :  { %v2336_v39 = vld [vmem:[#allocation17 + $0x600] sm:$0xff] }
 0x353   :  { %2070 = vmatpush.msra.mxu2 %v1864_v43  ;;  %2090 = vmatpush.msra.mxu3 %v1928_v44  ;;  %v2464_v43 = vld [vmem:[#allocation17 + $0xa00] sm:$0xff] }
 0x354   :  { %v2328_v44 = vld [vmem:[#allocation17 + $0x5c0] sm:$0xff] }
 0x355   :  { %2071 = vmatpush.msra.mxu2 %v1860_v3  ;;  %2091 = vmatpush.msra.mxu3 %v1924_v9  ;;  %v2456_v3 = vld [vmem:[#allocation17 + $0x9c0] sm:$0xff] }
 0x356   :  { %v2320_v9 = vld [vmem:[#allocation17 + $0x580] sm:$0xff] }
 0x357   :  { %2072 = vmatpush.msra.mxu2 %v1856_v23  ;;  %2092 = vmatpush.msra.mxu3 %v1920_v48  ;;  %v2448_v23 = vld [vmem:[#allocation17 + $0x980] sm:$0xff] }
 0x358   :  { %v2312_v48 = vld [vmem:[#allocation17 + $0x540] sm:$0xff] }
 0x359   :  { %2073 = vmatpush.msra.mxu2 %v1852_v51  ;;  %2093 = vmatpush.msra.mxu3 %v1916_v17  ;;  %v2440_v51 = vld [vmem:[#allocation17 + $0x940] sm:$0xff] }
 0x35a   :  { %v2304_v17 = vld [vmem:[#allocation17 + $0x500] sm:$0xff] }
 0x35b   :  { %2074 = vmatpush.msra.mxu2 %v1848_v52  ;;  %2094 = vmatpush.msra.mxu3 %v1912_v53  ;;  %v2432_v52 = vld [vmem:[#allocation17 + $0x900] sm:$0xff] }
 0x35c   :  { %v2296_v53 = vld [vmem:[#allocation17 + $0x4c0] sm:$0xff] }
 0x35d   :  { %2075 = vmatpush.msra.mxu2 %v1844_v55  ;;  %2095 = vmatpush.msra.mxu3 %v1908_v56  ;;  %v2424_v55 = vld [vmem:[#allocation17 + $0x8c0] sm:$0xff] }
 0x35e   :  { %v2288_v56 = vld [vmem:[#allocation17 + $0x480] sm:$0xff] }
 0x35f   :  { %v2416_v57 = vld [vmem:[#allocation17 + $0x880] sm:$0xff] }
 0x3c1   :  { %v1817_v63 = vpop.f32.mrf.mxu2  ;;  %v1837_v0 = vpop.f32.mrf.mxu3 }
 0x3c2   :  { %v1818_v1 = vadd.f32 %v1817_v63, %v1792_v58  ;;  %v1838_v5 = vadd.f32 %v1837_v0, %v1793_v59  ;;  %v2280_v58 = vld [vmem:[#allocation17 + $0x440] sm:$0xff] }
 0x3c3   :  { %v2152_v59 = vld [vmem:[#allocation17 + $0x40] sm:$0xff] }
 0x3c4   :  { %v1840_v32 = vmax.f32 %v1818_v1, 0.0  ;;  %v1841_v6 = vmax.f32 %v1838_v5, 0.0  ;;  %v2536_v63 = vld [vmem:[#allocation17 + $0xc40] sm:$0xff] }
 0x3c5   :  { %v2408_v0 = vld [vmem:[#allocation17 + $0x840] sm:$0xff] }
 0x3c6   :  { %1996 = vmatmul.f32.vlgmr.msrb.gmra.mxu2 %v1840_v32  ;;  %2016 = vmatmul.f32.vlgmr.msrb.gmra.mxu3 %v1841_v6  ;;  %v2272_v1 = vld [vmem:[#allocation17 + $0x400] sm:$0xff] }
 0x3c7   :  { %2036 = vmatmul.f32.vlgmr.msrb.gmra.mxu0 %v1840_v32  ;;  %2056 = vmatmul.f32.vlgmr.msrb.gmra.mxu1 %v1841_v6  ;;  %v2144_v5 = vld [vmem:[#allocation17] sm:$0xff] }
 0x3c8   :  { %2694 = vmatpush.msrb.mxu3 %v2392_v7  ;;  %2674 = vmatpush.msrb.mxu2 %v2264_v8  ;;  %v2528_v7 = vld [vmem:[#allocation17 + $0xc00] sm:$0xff] }
 0x3c9   :  { %2734 = vmatpush.msrb.mxu1 %v2648_v35  ;;  %2714 = vmatpush.msrb.mxu0 %v2520_v10  ;;  %v2400_v8 = vld [vmem:[#allocation17 + $0x800] sm:$0xff]  ;;  %v2385_v35 = vld [vmem:[#allocation17 + $0x788] sm:$0xff] }
 0x3ca   :  { %2695 = vmatpush.msrb.mxu3 %v2384_v4  ;;  %2675 = vmatpush.msrb.mxu2 %v2256_v11  ;;  %v2257_v10 = vld [vmem:[#allocation17 + $0x388] sm:$0xff] }
 0x3cb   :  { %2735 = vmatpush.msrb.mxu1 %v2640_v12  ;;  %2715 = vmatpush.msrb.mxu0 %v2512_v14  ;;  %v2649_v4 = vld [vmem:[#allocation17 + $0xfc8] sm:$0xff] }
 0x3cc   :  { %2696 = vmatpush.msrb.mxu3 %v2376_v16  ;;  %2676 = vmatpush.msrb.mxu2 %v2248_v18  ;;  %v2521_v11 = vld [vmem:[#allocation17 + $0xbc8] sm:$0xff] }
 0x3cd   :  { %2736 = vmatpush.msrb.mxu1 %v2632_v40  ;;  %2716 = vmatpush.msrb.mxu0 %v2504_v19  ;;  %v2377_v12 = vld [vmem:[#allocation17 + $0x748] sm:$0xff] }
 0x3ce   :  { %2076 = vmatmul.f32.vlgmr.msra.gmra.mxu2 %v1840_v32  ;;  %2096 = vmatmul.f32.vlgmr.msra.gmra.mxu3 %v1841_v6  ;;  %v2249_v14 = vld [vmem:[#allocation17 + $0x348] sm:$0xff] }
 0x3cf   :  { %2116 = vmatmul.f32.vlgmr.msra.gmra.mxu0 %v1840_v32  ;;  %2136 = vmatmul.f32.vlgmr.msra.gmra.mxu1 %v1841_v6  ;;  %v2393_v32 = vld [vmem:[#allocation17 + $0x7c8] sm:$0xff] }
 0x3d0   :  { %2697 = vmatpush.msrb.mxu3 %v2368_v60  ;;  %2677 = vmatpush.msrb.mxu2 %v2240_v62  ;;  %v2265_v6 = vld [vmem:[#allocation17 + $0x3c8] sm:$0xff] }
 0x3d1   :  { %2737 = vmatpush.msrb.mxu1 %v2624_v20  ;;  %2717 = vmatpush.msrb.mxu0 %v2496_v24  ;;  %v2641_v16 = vld [vmem:[#allocation17 + $0xf88] sm:$0xff] }
 0x3d2   :  { %2698 = vmatpush.msrb.mxu3 %v2360_v26  ;;  %2678 = vmatpush.msrb.mxu2 %v2232_v27  ;;  %v2513_v18 = vld [vmem:[#allocation17 + $0xb88] sm:$0xff] }
 0x3d3   :  { %2738 = vmatpush.msrb.mxu1 %v2616_v29  ;;  %2718 = vmatpush.msrb.mxu0 %v2488_v30  ;;  %v2369_v40 = vld [vmem:[#allocation17 + $0x708] sm:$0xff] }
 0x3d4   :  { %2699 = vmatpush.msrb.mxu3 %v2352_v31  ;;  %2679 = vmatpush.msrb.mxu2 %v2224_v61  ;;  %v2241_v19 = vld [vmem:[#allocation17 + $0x308] sm:$0xff] }
 0x3d5   :  { %2739 = vmatpush.msrb.mxu1 %v2608_v33  ;;  %2719 = vmatpush.msrb.mxu0 %v2480_v34  ;;  %v2633_v60 = vld [vmem:[#allocation17 + $0xf48] sm:$0xff] }
 0x3d6   :  { %2700 = vmatpush.msrb.mxu3 %v2344_v36  ;;  %2680 = vmatpush.msrb.mxu2 %v2216_v37  ;;  %v2505_v62 = vld [vmem:[#allocation17 + $0xb48] sm:$0xff] }
 0x3d7   :  { %2740 = vmatpush.msrb.mxu1 %v2600_v25  ;;  %2720 = vmatpush.msrb.mxu0 %v2472_v38  ;;  %v2361_v20 = vld [vmem:[#allocation17 + $0x6c8] sm:$0xff] }
 0x3d8   :  { %2701 = vmatpush.msrb.mxu3 %v2336_v39  ;;  %2681 = vmatpush.msrb.mxu2 %v2208_v41  ;;  %v2233_v24 = vld [vmem:[#allocation17 + $0x2c8] sm:$0xff] }
 0x3d9   :  { %2741 = vmatpush.msrb.mxu1 %v2592_v42  ;;  %2721 = vmatpush.msrb.mxu0 %v2464_v43  ;;  %v2625_v26 = vld [vmem:[#allocation17 + $0xf08] sm:$0xff] }
 0x3da   :  { %2702 = vmatpush.msrb.mxu3 %v2328_v44  ;;  %2682 = vmatpush.msrb.mxu2 %v2200_v45  ;;  %v2497_v27 = vld [vmem:[#allocation17 + $0xb08] sm:$0xff] }
 0x3db   :  { %2742 = vmatpush.msrb.mxu1 %v2584_v46  ;;  %2722 = vmatpush.msrb.mxu0 %v2456_v3  ;;  %v2353_v29 = vld [vmem:[#allocation17 + $0x688] sm:$0xff] }
 0x3dc   :  { %2703 = vmatpush.msrb.mxu3 %v2320_v9  ;;  %2683 = vmatpush.msrb.mxu2 %v2192_v47  ;;  %v2225_v30 = vld [vmem:[#allocation17 + $0x288] sm:$0xff] }
 0x3dd   :  { %2743 = vmatpush.msrb.mxu1 %v2576_v22  ;;  %2723 = vmatpush.msrb.mxu0 %v2448_v23  ;;  %v2617_v31 = vld [vmem:[#allocation17 + $0xec8] sm:$0xff] }
 0x3de   :  { %2704 = vmatpush.msrb.mxu3 %v2312_v48  ;;  %2684 = vmatpush.msrb.mxu2 %v2184_v49  ;;  %v2489_v61 = vld [vmem:[#allocation17 + $0xac8] sm:$0xff] }
 0x3df   :  { %2744 = vmatpush.msrb.mxu1 %v2568_v50  ;;  %2724 = vmatpush.msrb.mxu0 %v2440_v51  ;;  %v2345_v33 = vld [vmem:[#allocation17 + $0x648] sm:$0xff] }
 0x3e0   :  { %2705 = vmatpush.msrb.mxu3 %v2304_v17  ;;  %2685 = vmatpush.msrb.mxu2 %v2176_v15  ;;  %v2217_v34 = vld [vmem:[#allocation17 + $0x248] sm:$0xff] }
 0x3e1   :  { %2745 = vmatpush.msrb.mxu1 %v2560_v28  ;;  %2725 = vmatpush.msrb.mxu0 %v2432_v52  ;;  %v2609_v36 = vld [vmem:[#allocation17 + $0xe88] sm:$0xff] }
 0x3e2   :  { %2706 = vmatpush.msrb.mxu3 %v2296_v53  ;;  %2686 = vmatpush.msrb.mxu2 %v2168_v2  ;;  %v2337_v37 = vld [vmem:[#allocation17 + $0x608] sm:$0xff] }
 0x3e3   :  { %2746 = vmatpush.msrb.mxu1 %v2552_v54  ;;  %2726 = vmatpush.msrb.mxu0 %v2424_v55  ;;  %v2209_v25 = vld [vmem:[#allocation17 + $0x208] sm:$0xff] }
 0x3e4   :  { %2707 = vmatpush.msrb.mxu3 %v2288_v56  ;;  %2687 = vmatpush.msrb.mxu2 %v2160_v21  ;;  %v2601_v38 = vld [vmem:[#allocation17 + $0xe48] sm:$0xff] }
 0x3e5   :  { %2747 = vmatpush.msrb.mxu1 %v2544_v13  ;;  %2727 = vmatpush.msrb.mxu0 %v2416_v57  ;;  %v2329_v39 = vld [vmem:[#allocation17 + $0x5c8] sm:$0xff] }
 0x3e6   :  { %2708 = vmatpush.msrb.mxu3 %v2280_v58  ;;  %2688 = vmatpush.msrb.mxu2 %v2152_v59  ;;  %v2201_v41 = vld [vmem:[#allocation17 + $0x1c8] sm:$0xff] }
 0x3e7   :  { %2748 = vmatpush.msrb.mxu1 %v2536_v63  ;;  %2728 = vmatpush.msrb.mxu0 %v2408_v0  ;;  %v2593_v42 = vld [vmem:[#allocation17 + $0xe08] sm:$0xff] }
 0x3e8   :  { %2709 = vmatpush.msrb.mxu3 %v2272_v1  ;;  %2689 = vmatpush.msrb.mxu2 %v2144_v5  ;;  %v2321_v43 = vld [vmem:[#allocation17 + $0x588] sm:$0xff] }
 0x3e9   :  { %2749 = vmatpush.msrb.mxu1 %v2528_v7  ;;  %2729 = vmatpush.msrb.mxu0 %v2400_v8  ;;  %v2313_v44 = vld [vmem:[#allocation17 + $0x548] sm:$0xff]  ;;  %v1970_v7 = vld [vmem:[#allocation16] sm:$0xf] }
 0x3ea   :  { %2774 = vmatpush.msra.mxu3 %v2393_v32  ;;  %2754 = vmatpush.msra.mxu2 %v2265_v6  ;;  %v2305_v45 = vld [vmem:[#allocation17 + $0x508] sm:$0xff]  ;;  %v1973_v8 = vperm.slane %v1970_v7, 1 }
 0x3eb   :  { %2814 = vmatpush.msra.mxu1 %v2649_v4  ;;  %2794 = vmatpush.msra.mxu0 %v2521_v11  ;;  %v2193_v46 = vld [vmem:[#allocation17 + $0x188] sm:$0xff]  ;;  %v1972_v11 = vperm.slane %v1970_v7, 0 }
 0x3ec   :  { %2775 = vmatpush.msra.mxu3 %v2385_v35  ;;  %2755 = vmatpush.msra.mxu2 %v2257_v10  ;;  %v2297_v3 = vld [vmem:[#allocation17 + $0x4c8] sm:$0xff] }
 0x3ed   :  { %2815 = vmatpush.msra.mxu1 %v2641_v16  ;;  %2795 = vmatpush.msra.mxu0 %v2513_v18  ;;  %v2481_v9 = vld [vmem:[#allocation17 + $0xa88] sm:$0xff] }
 0x3ee   :  { %2776 = vmatpush.msra.mxu3 %v2377_v12  ;;  %2756 = vmatpush.msra.mxu2 %v2249_v14  ;;  %v2585_v47 = vld [vmem:[#allocation17 + $0xdc8] sm:$0xff] }
 0x3ef   :  { %2816 = vmatpush.msra.mxu1 %v2633_v60  ;;  %2796 = vmatpush.msra.mxu0 %v2505_v62  ;;  %v2185_v22 = vld [vmem:[#allocation17 + $0x148] sm:$0xff]  ;;  %v2386_v62 = vld [vmem:[#allocation17 + $0x790] sm:$0xff] }
 0x3f0   :  { %2777 = vmatpush.msra.mxu3 %v2369_v40  ;;  %2757 = vmatpush.msra.mxu2 %v2241_v19  ;;  %v2289_v23 = vld [vmem:[#allocation17 + $0x488] sm:$0xff]  ;;  %v2394_v40 = vld [vmem:[#allocation17 + $0x7d0] sm:$0xff]  ;;  %v1975_v19 = vperm.slane %v1970_v7, 3 }
 0x3f1   :  { %2817 = vmatpush.msra.mxu1 %v2625_v26  ;;  %2797 = vmatpush.msra.mxu0 %v2497_v27  ;;  %v2473_v48 = vld [vmem:[#allocation17 + $0xa48] sm:$0xff]  ;;  %v2378_v27 = vld [vmem:[#allocation17 + $0x750] sm:$0xff] }
 0x3f2   :  { %2778 = vmatpush.msra.mxu3 %v2361_v20  ;;  %2758 = vmatpush.msra.mxu2 %v2233_v24  ;;  %v2577_v49 = vld [vmem:[#allocation17 + $0xd88] sm:$0xff] }
 0x3f3   :  { %2818 = vmatpush.msra.mxu1 %v2617_v31  ;;  %2798 = vmatpush.msra.mxu0 %v2489_v61  ;;  %v2177_v50 = vld [vmem:[#allocation17 + $0x108] sm:$0xff]  ;;  %v2266_v31 = vld [vmem:[#allocation17 + $0x3d0] sm:$0xff]  ;;  %v1974_v61 = vperm.slane %v1970_v7, 2 }
 0x3f4   :  { %2779 = vmatpush.msra.mxu3 %v2353_v29  ;;  %2759 = vmatpush.msra.mxu2 %v2225_v30  ;;  %v2281_v51 = vld [vmem:[#allocation17 + $0x448] sm:$0xff]  ;;  %v2290_v7 = vld [vmem:[#allocation17 + $0x490] sm:$0xff] }
 0x3f5   :  { %2819 = vmatpush.msra.mxu1 %v2609_v36  ;;  %2799 = vmatpush.msra.mxu0 %v2481_v9  ;;  %v2465_v17 = vld [vmem:[#allocation17 + $0xa08] sm:$0xff]  ;;  %v2346_v9 = vld [vmem:[#allocation17 + $0x650] sm:$0xff] }
 0x3f6   :  { %2780 = vmatpush.msra.mxu3 %v2345_v33  ;;  %2760 = vmatpush.msra.mxu2 %v2217_v34  ;;  %v2569_v15 = vld [vmem:[#allocation17 + $0xd48] sm:$0xff]  ;;  %v2370_v34 = vld [vmem:[#allocation17 + $0x710] sm:$0xff] }
 0x3f7   :  { %2820 = vmatpush.msra.mxu1 %v2601_v38  ;;  %2800 = vmatpush.msra.mxu0 %v2473_v48  ;;  %v2169_v28 = vld [vmem:[#allocation17 + $0xc8] sm:$0xff]  ;;  %v2362_v38 = vld [vmem:[#allocation17 + $0x6d0] sm:$0xff] }
 0x3f8   :  { %2781 = vmatpush.msra.mxu3 %v2337_v37  ;;  %2761 = vmatpush.msra.mxu2 %v2209_v25  ;;  %v2273_v52 = vld [vmem:[#allocation17 + $0x408] sm:$0xff]  ;;  %v2258_v25 = vld [vmem:[#allocation17 + $0x390] sm:$0xff] }
 0x3f9   :  { %2821 = vmatpush.msra.mxu1 %v2593_v42  ;;  %2801 = vmatpush.msra.mxu0 %v2465_v17  ;;  %v2457_v53 = vld [vmem:[#allocation17 + $0x9c8] sm:$0xff]  ;;  %v2234_v48 = vld [vmem:[#allocation17 + $0x2d0] sm:$0xff] }
 0x3fa   :  { %2782 = vmatpush.msra.mxu3 %v2329_v39  ;;  %2762 = vmatpush.msra.mxu2 %v2201_v41  ;;  %v2561_v2 = vld [vmem:[#allocation17 + $0xd08] sm:$0xff]  ;;  %v2650_v41 = vld [vmem:[#allocation17 + $0xfd0] sm:$0xff] }
 0x3fb   :  { %2822 = vmatpush.msra.mxu1 %v2585_v47  ;;  %2802 = vmatpush.msra.mxu0 %v2457_v53  ;;  %v2161_v54 = vld [vmem:[#allocation17 + $0x88] sm:$0xff]  ;;  %v2226_v17 = vld [vmem:[#allocation17 + $0x290] sm:$0xff] }
 0x3fc   :  { %2783 = vmatpush.msra.mxu3 %v2321_v43  ;;  %2763 = vmatpush.msra.mxu2 %v2193_v46  ;;  %v2449_v55 = vld [vmem:[#allocation17 + $0x988] sm:$0xff]  ;;  %v2250_v43 = vld [vmem:[#allocation17 + $0x350] sm:$0xff] }
 0x3fd   :  { %2823 = vmatpush.msra.mxu1 %v2577_v49  ;;  %v2553_v56 = vld [vmem:[#allocation17 + $0xcc8] sm:$0xff]  ;;  %2803 = vmatpush.msra.mxu0 %v2449_v55  ;;  %v2642_v46 = vld [vmem:[#allocation17 + $0xf90] sm:$0xff] }
 0x3fe   :  { %2784 = vmatpush.msra.mxu3 %v2313_v44  ;;  %2764 = vmatpush.msra.mxu2 %v2185_v22  ;;  %v2153_v21 = vld [vmem:[#allocation17 + $0x48] sm:$0xff]  ;;  %v2354_v44 = vld [vmem:[#allocation17 + $0x690] sm:$0xff] }
 0x3ff   :  { %2824 = vmatpush.msra.mxu1 %v2569_v15  ;;  %v2441_v13 = vld [vmem:[#allocation17 + $0x948] sm:$0xff]  ;;  %v2634_v22 = vld [vmem:[#allocation17 + $0xf50] sm:$0xff] }
 0x400   :  { %2785 = vmatpush.msra.mxu3 %v2305_v45  ;;  %2765 = vmatpush.msra.mxu2 %v2177_v50  ;;  %v2545_v57 = vld [vmem:[#allocation17 + $0xc88] sm:$0xff]  ;;  %v2522_v49 = vld [vmem:[#allocation17 + $0xbd0] sm:$0xff] }
 0x401   :  { %2825 = vmatpush.msra.mxu1 %v2561_v2  ;;  %2804 = vmatpush.msra.mxu0 %v2441_v13  ;;  %v2145_v58 = vld [vmem:[#allocation17 + $0x8] sm:$0xff]  ;;  %v2626_v50 = vld [vmem:[#allocation17 + $0xf10] sm:$0xff] }
 0x402   :  { %2786 = vmatpush.msra.mxu3 %v2297_v3  ;;  %2766 = vmatpush.msra.mxu2 %v2169_v28  ;;  %v2433_v59 = vld [vmem:[#allocation17 + $0x908] sm:$0xff]  ;;  %v2242_v3 = vld [vmem:[#allocation17 + $0x310] sm:$0xff] }
 0x403   :  { %2826 = vmatpush.msra.mxu1 %v2553_v56  ;;  %v2537_v63 = vld [vmem:[#allocation17 + $0xc48] sm:$0xff]  ;;  %2805 = vmatpush.msra.mxu0 %v2433_v59  ;;  %v2514_v15 = vld [vmem:[#allocation17 + $0xb90] sm:$0xff] }
 0x404   :  { %2787 = vmatpush.msra.mxu3 %v2289_v23  ;;  %2767 = vmatpush.msra.mxu2 %v2161_v54  ;;  %v2425_v0 = vld [vmem:[#allocation17 + $0x8c8] sm:$0xff]  ;;  %v2338_v23 = vld [vmem:[#allocation17 + $0x610] sm:$0xff] }
 0x405   :  { %2827 = vmatpush.msra.mxu1 %v2545_v57  ;;  %v2529_v1 = vld [vmem:[#allocation17 + $0xc08] sm:$0xff]  ;;  %2806 = vmatpush.msra.mxu0 %v2425_v0  ;;  %v2618_v28 = vld [vmem:[#allocation17 + $0xed0] sm:$0xff] }
 0x406   :  { %2788 = vmatpush.msra.mxu3 %v2281_v51  ;;  %2768 = vmatpush.msra.mxu2 %v2153_v21  ;;  %v2417_v5 = vld [vmem:[#allocation17 + $0x888] sm:$0xff]  ;;  %v2330_v51 = vld [vmem:[#allocation17 + $0x5d0] sm:$0xff] }
 0x407   :  { %2828 = vmatpush.msra.mxu1 %v2537_v63  ;;  %2807 = vmatpush.msra.mxu0 %v2417_v5  ;;  %v2409_v32 = vld [vmem:[#allocation17 + $0x848] sm:$0xff]  ;;  %v2322_v53 = vld [vmem:[#allocation17 + $0x590] sm:$0xff] }
 0x408   :  { %2789 = vmatpush.msra.mxu3 %v2273_v52  ;;  %2769 = vmatpush.msra.mxu2 %v2145_v58  ;;  %v2401_v6 = vld [vmem:[#allocation17 + $0x808] sm:$0xff]  ;;  %v2218_v52 = vld [vmem:[#allocation17 + $0x250] sm:$0xff] }
 0x409   :  { %2829 = vmatpush.msra.mxu1 %v2529_v1  ;;  %2808 = vmatpush.msra.mxu0 %v2409_v32  ;;  %v2506_v2 = vld [vmem:[#allocation17 + $0xb50] sm:$0xff] }
 0x40a   :  { %v2610_v54 = vld [vmem:[#allocation17 + $0xe90] sm:$0xff] }
 0x40b   :  { %2809 = vmatpush.msra.mxu0 %v2401_v6  ;;  %v2210_v55 = vld [vmem:[#allocation17 + $0x210] sm:$0xff] }
 0x40c   :  { %v2314_v56 = vld [vmem:[#allocation17 + $0x550] sm:$0xff] }
 0x40d   :  { %v2498_v21 = vld [vmem:[#allocation17 + $0xb10] sm:$0xff] }
 0x40e   :  { %v2602_v13 = vld [vmem:[#allocation17 + $0xe50] sm:$0xff] }
 0x40f   :  { %v2202_v57 = vld [vmem:[#allocation17 + $0x1d0] sm:$0xff] }
 0x410   :  { %v2306_v58 = vld [vmem:[#allocation17 + $0x510] sm:$0xff] }
 0x411   :  { %v2490_v59 = vld [vmem:[#allocation17 + $0xad0] sm:$0xff] }
 0x412   :  { %v2594_v63 = vld [vmem:[#allocation17 + $0xe10] sm:$0xff] }
 0x413   :  { %v2194_v0 = vld [vmem:[#allocation17 + $0x190] sm:$0xff] }
 0x414   :  { %v2298_v1 = vld [vmem:[#allocation17 + $0x4d0] sm:$0xff] }
 0x415   :  { %v2482_v5 = vld [vmem:[#allocation17 + $0xa90] sm:$0xff] }
 0x416   :  { %v2586_v32 = vld [vmem:[#allocation17 + $0xdd0] sm:$0xff] }
 0x417   :  { %v2186_v6 = vld [vmem:[#allocation17 + $0x150] sm:$0xff] }
 0x444   :  { %v2037_v35 = vpop.f32.mrf.mxu0  ;;  %v2057_v10 = vpop.f32.mrf.mxu1 }
 0x445   :  { %v2038_v4 = vadd.f32 %v2037_v35, %v1973_v8  ;;  %v2474_v8 = vld [vmem:[#allocation17 + $0xa50] sm:$0xff] }
 0x446   :  { %v2578_v35 = vld [vmem:[#allocation17 + $0xd90] sm:$0xff] }
 0x447   :  { %v2058_v12 = vadd.f32 %v2057_v10, %v2038_v4  ;;  %v2178_v10 = vld [vmem:[#allocation17 + $0x110] sm:$0xff] }
 0x448   :  { %v2282_v4 = vld [vmem:[#allocation17 + $0x450] sm:$0xff] }
 0x449   :  { %v4098_v14 = vmax.f32 %v2058_v12, 0.0  ;;  %v1997_v16 = vpop.f32.mrf.mxu2  ;;  %v2017_v18 = vpop.f32.mrf.mxu3  ;;  %v2570_v12 = vld [vmem:[#allocation17 + $0xd50] sm:$0xff] }
 0x44a   :  { %v1998_v60 = vadd.f32 %v1997_v16, %v1972_v11  ;;  %v2466_v11 = vld [vmem:[#allocation17 + $0xa10] sm:$0xff] }
 0x44b   :  { %2710 = vmatmul.f32.vlgmr.msrb.gmra.mxu3 %v4098_v14  ;;  %v2170_v16 = vld [vmem:[#allocation17 + $0xd0] sm:$0xff] }
 0x44c   :  { %v2018_v20 = vadd.f32 %v2017_v18, %v1998_v60  ;;  %2854 = vmatpush.msrb.mxu3 %v2394_v40  ;;  %v2117_v24 = vpop.f32.mrf.mxu0  ;;  %v2137_v30 = vpop.f32.mrf.mxu1  ;;  %v2274_v18 = vld [vmem:[#allocation17 + $0x410] sm:$0xff]  ;;  %v2395_v60 = vld [vmem:[#allocation17 + $0x7d8] sm:$0xff] }
 0x44d   :  { %v2118_v26 = vadd.f32 %v2117_v24, %v1975_v19  ;;  %v2458_v40 = vld [vmem:[#allocation17 + $0x9d0] sm:$0xff] }
 0x44e   :  { %v4101_v29 = vmax.f32 %v2018_v20, 0.0  ;;  %2855 = vmatpush.msrb.mxu3 %v2386_v62  ;;  %v2562_v19 = vld [vmem:[#allocation17 + $0xd10] sm:$0xff] }
 0x44f   :  { %v2138_v33 = vadd.f32 %v2137_v30, %v2118_v26  ;;  %v2162_v62 = vld [vmem:[#allocation17 + $0x90] sm:$0xff]  ;;  %v2387_v26 = vld [vmem:[#allocation17 + $0x798] sm:$0xff] }
 0x450   :  { %2856 = vmatpush.msrb.mxu3 %v2378_v27  ;;  %2690 = vmatmul.f32.vlgmr.msrb.gmra.mxu2 %v4101_v29  ;;  %v2450_v20 = vld [vmem:[#allocation17 + $0x990] sm:$0xff] }
 0x451   :  { %v4104_v36 = vmax.f32 %v2138_v33, 0.0  ;;  %2834 = vmatpush.msrb.mxu2 %v2266_v31  ;;  %v2077_v37 = vpop.f32.mrf.mxu2  ;;  %v2097_v42 = vpop.f32.mrf.mxu3  ;;  %v2554_v24 = vld [vmem:[#allocation17 + $0xcd0] sm:$0xff] }
 0x452   :  { %2857 = vmatpush.msrb.mxu3 %v2370_v34  ;;  %v2078_v39 = vadd.f32 %v2077_v37, %v1974_v61  ;;  %v2154_v27 = vld [vmem:[#allocation17 + $0x50] sm:$0xff]  ;;  %v2379_v61 = vld [vmem:[#allocation17 + $0x758] sm:$0xff] }
 0x453   :  { %2750 = vmatmul.f32.vlgmr.msrb.gmra.mxu1 %v4104_v36  ;;  %2790 = vmatmul.f32.vlgmr.msra.gmra.mxu3 %v4098_v14  ;;  %v2442_v30 = vld [vmem:[#allocation17 + $0x950] sm:$0xff] }
 0x454   :  { %v2098_v45 = vadd.f32 %v2097_v42, %v2078_v39  ;;  %2835 = vmatpush.msrb.mxu2 %v2258_v25  ;;  %2858 = vmatpush.msrb.mxu3 %v2362_v38  ;;  %v2546_v31 = vld [vmem:[#allocation17 + $0xc90] sm:$0xff]  ;;  %v2371_v25 = vld [vmem:[#allocation17 + $0x718] sm:$0xff] }
 0x455   :  { %2894 = vmatpush.msrb.mxu1 %v2650_v41  ;;  %v2146_v33 = vld [vmem:[#allocation17 + $0x10] sm:$0xff]  ;;  %v2267_v38 = vld [vmem:[#allocation17 + $0x3d8] sm:$0xff] }
 0x456   :  { %v4108_v47 = vmax.f32 %v2098_v45, 0.0  ;;  %2836 = vmatpush.msrb.mxu2 %v2250_v43  ;;  %2859 = vmatpush.msrb.mxu3 %v2354_v44  ;;  %v2434_v34 = vld [vmem:[#allocation17 + $0x910] sm:$0xff]  ;;  %v2363_v42 = vld [vmem:[#allocation17 + $0x6d8] sm:$0xff] }
 0x457   :  { %2895 = vmatpush.msrb.mxu1 %v2642_v46  ;;  %v2538_v37 = vld [vmem:[#allocation17 + $0xc50] sm:$0xff]  ;;  %v2259_v43 = vld [vmem:[#allocation17 + $0x398] sm:$0xff] }
 0x458   :  { %2837 = vmatpush.msrb.mxu2 %v2242_v3  ;;  %2860 = vmatpush.msrb.mxu3 %v2346_v9  ;;  %v2426_v39 = vld [vmem:[#allocation17 + $0x8d0] sm:$0xff]  ;;  %v2651_v44 = vld [vmem:[#allocation17 + $0xfd8] sm:$0xff] }
 0x459   :  { %2896 = vmatpush.msrb.mxu1 %v2634_v22  ;;  %2730 = vmatmul.f32.vlgmr.msrb.gmra.mxu0 %v4108_v47  ;;  %v2530_v41 = vld [vmem:[#allocation17 + $0xc10] sm:$0xff]  ;;  %v2251_v46 = vld [vmem:[#allocation17 + $0x358] sm:$0xff] }
 0x45a   :  { %2770 = vmatmul.f32.vlgmr.msra.gmra.mxu2 %v4101_v29  ;;  %2861 = vmatpush.msrb.mxu3 %v2338_v23  ;;  %v2418_v45 = vld [vmem:[#allocation17 + $0x890] sm:$0xff]  ;;  %v2355_v3 = vld [vmem:[#allocation17 + $0x698] sm:$0xff] }
 0x45b   :  { %2838 = vmatpush.msrb.mxu2 %v2234_v48  ;;  %2874 = vmatpush.msrb.mxu0 %v2522_v49  ;;  %v2643_v9 = vld [vmem:[#allocation17 + $0xf98] sm:$0xff]  ;;  %v2410_v22 = vld [vmem:[#allocation17 + $0x850] sm:$0xff] }
 0x45c   :  { %2897 = vmatpush.msrb.mxu1 %v2626_v50  ;;  %2862 = vmatpush.msrb.mxu3 %v2330_v51  ;;  %v2243_v23 = vld [vmem:[#allocation17 + $0x318] sm:$0xff]  ;;  %v2402_v50 = vld [vmem:[#allocation17 + $0x810] sm:$0xff] }
 0x45d   :  { %2830 = vmatmul.f32.vlgmr.msra.gmra.mxu1 %v4104_v36  ;;  %2839 = vmatpush.msrb.mxu2 %v2226_v17  ;;  %v2347_v48 = vld [vmem:[#allocation17 + $0x658] sm:$0xff] }
 0x45e   :  { %2875 = vmatpush.msrb.mxu0 %v2514_v15  ;;  %2898 = vmatpush.msrb.mxu1 %v2618_v28  ;;  %v2635_v49 = vld [vmem:[#allocation17 + $0xf58] sm:$0xff] }
 0x45f   :  { %2840 = vmatpush.msrb.mxu2 %v2218_v52  ;;  %2863 = vmatpush.msrb.mxu3 %v2322_v53  ;;  %v2235_v51 = vld [vmem:[#allocation17 + $0x2d8] sm:$0xff] }
 0x460   :  { %2876 = vmatpush.msrb.mxu0 %v2506_v2  ;;  %2899 = vmatpush.msrb.mxu1 %v2610_v54  ;;  %v2339_v17 = vld [vmem:[#allocation17 + $0x618] sm:$0xff] }
 0x461   :  { %2841 = vmatpush.msrb.mxu2 %v2210_v55  ;;  %2864 = vmatpush.msrb.mxu3 %v2314_v56  ;;  %v2523_v15 = vld [vmem:[#allocation17 + $0xbd8] sm:$0xff] }
 0x462   :  { %2877 = vmatpush.msrb.mxu0 %v2498_v21  ;;  %2900 = vmatpush.msrb.mxu1 %v2602_v13  ;;  %v2627_v28 = vld [vmem:[#allocation17 + $0xf18] sm:$0xff] }
 0x463   :  { %2810 = vmatmul.f32.vlgmr.msra.gmra.mxu0 %v4108_v47  ;;  %2842 = vmatpush.msrb.mxu2 %v2202_v57  ;;  %v2227_v52 = vld [vmem:[#allocation17 + $0x298] sm:$0xff] }
 0x464   :  { %2865 = vmatpush.msrb.mxu3 %v2306_v58  ;;  %2878 = vmatpush.msrb.mxu0 %v2490_v59  ;;  %v2331_v53 = vld [vmem:[#allocation17 + $0x5d8] sm:$0xff] }
 0x465   :  { %2901 = vmatpush.msrb.mxu1 %v2594_v63  ;;  %2843 = vmatpush.msrb.mxu2 %v2194_v0  ;;  %v2515_v2 = vld [vmem:[#allocation17 + $0xb98] sm:$0xff] }
 0x466   :  { %2866 = vmatpush.msrb.mxu3 %v2298_v1  ;;  %2879 = vmatpush.msrb.mxu0 %v2482_v5  ;;  %v2619_v54 = vld [vmem:[#allocation17 + $0xed8] sm:$0xff] }
 0x467   :  { %2902 = vmatpush.msrb.mxu1 %v2586_v32  ;;  %2844 = vmatpush.msrb.mxu2 %v2186_v6  ;;  %v2219_v55 = vld [vmem:[#allocation17 + $0x258] sm:$0xff] }
 0x468   :  { %2867 = vmatpush.msrb.mxu3 %v2290_v7  ;;  %2880 = vmatpush.msrb.mxu0 %v2474_v8  ;;  %v2323_v56 = vld [vmem:[#allocation17 + $0x598] sm:$0xff] }
 0x469   :  { %2903 = vmatpush.msrb.mxu1 %v2578_v35  ;;  %2845 = vmatpush.msrb.mxu2 %v2178_v10  ;;  %v2507_v21 = vld [vmem:[#allocation17 + $0xb58] sm:$0xff] }
 0x46a   :  { %2868 = vmatpush.msrb.mxu3 %v2282_v4  ;;  %2881 = vmatpush.msrb.mxu0 %v2466_v11  ;;  %v2611_v13 = vld [vmem:[#allocation17 + $0xe98] sm:$0xff] }
 0x46b   :  { %2904 = vmatpush.msrb.mxu1 %v2570_v12  ;;  %2846 = vmatpush.msrb.mxu2 %v2170_v16  ;;  %v2211_v57 = vld [vmem:[#allocation17 + $0x218] sm:$0xff] }
 0x46c   :  { %2869 = vmatpush.msrb.mxu3 %v2274_v18  ;;  %2882 = vmatpush.msrb.mxu0 %v2458_v40  ;;  %v2315_v58 = vld [vmem:[#allocation17 + $0x558] sm:$0xff] }
 0x46d   :  { %2905 = vmatpush.msrb.mxu1 %v2562_v19  ;;  %2870 = vmatmul.f32.vlgmr.msrb.gmra.mxu3 %v4098_v14  ;;  %v2499_v59 = vld [vmem:[#allocation17 + $0xb18] sm:$0xff] }
 0x46e   :  { %2934 = vmatpush.msra.mxu3 %v2395_v60  ;;  %2847 = vmatpush.msrb.mxu2 %v2162_v62  ;;  %v2603_v63 = vld [vmem:[#allocation17 + $0xe58] sm:$0xff] }
 0x46f   :  { %2883 = vmatpush.msrb.mxu0 %v2450_v20  ;;  %2906 = vmatpush.msrb.mxu1 %v2554_v24  ;;  %v2203_v0 = vld [vmem:[#allocation17 + $0x1d8] sm:$0xff] }
 0x470   :  { %2935 = vmatpush.msra.mxu3 %v2387_v26  ;;  %2848 = vmatpush.msrb.mxu2 %v2154_v27  ;;  %v2307_v1 = vld [vmem:[#allocation17 + $0x518] sm:$0xff]  ;;  %v2396_v26 = vld [vmem:[#allocation17 + $0x7e0] sm:$0xff] }
 0x471   :  { %2884 = vmatpush.msrb.mxu0 %v2442_v30  ;;  %2907 = vmatpush.msrb.mxu1 %v2546_v31  ;;  %v2491_v5 = vld [vmem:[#allocation17 + $0xad8] sm:$0xff] }
 0x472   :  { %2936 = vmatpush.msra.mxu3 %v2379_v61  ;;  %2849 = vmatpush.msrb.mxu2 %v2146_v33  ;;  %v2595_v32 = vld [vmem:[#allocation17 + $0xe18] sm:$0xff]  ;;  %v2388_v61 = vld [vmem:[#allocation17 + $0x7a0] sm:$0xff] }
 0x473   :  { %2885 = vmatpush.msrb.mxu0 %v2434_v34  ;;  %2908 = vmatpush.msrb.mxu1 %v2538_v37  ;;  %v2195_v6 = vld [vmem:[#allocation17 + $0x198] sm:$0xff] }
 0x474   :  { %2850 = vmatmul.f32.vlgmr.msrb.gmra.mxu2 %v4101_v29  ;;  %2937 = vmatpush.msra.mxu3 %v2371_v25  ;;  %v2299_v7 = vld [vmem:[#allocation17 + $0x4d8] sm:$0xff]  ;;  %v2380_v25 = vld [vmem:[#allocation17 + $0x760] sm:$0xff] }
 0x475   :  { %2914 = vmatpush.msra.mxu2 %v2267_v38  ;;  %2886 = vmatpush.msrb.mxu0 %v2426_v39  ;;  %v2483_v8 = vld [vmem:[#allocation17 + $0xa98] sm:$0xff] }
 0x476   :  { %2909 = vmatpush.msrb.mxu1 %v2530_v41  ;;  %2938 = vmatpush.msra.mxu3 %v2363_v42  ;;  %v2587_v35 = vld [vmem:[#allocation17 + $0xdd8] sm:$0xff]  ;;  %v2372_v42 = vld [vmem:[#allocation17 + $0x720] sm:$0xff] }
 0x477   :  { %2910 = vmatmul.f32.vlgmr.msrb.gmra.mxu1 %v4104_v36  ;;  %2915 = vmatpush.msra.mxu2 %v2259_v43  ;;  %v2187_v10 = vld [vmem:[#allocation17 + $0x158] sm:$0xff]  ;;  %v2268_v43 = vld [vmem:[#allocation17 + $0x3e0] sm:$0xff] }
 0x478   :  { %2974 = vmatpush.msra.mxu1 %v2651_v44  ;;  %2887 = vmatpush.msrb.mxu0 %v2418_v45  ;;  %v2291_v4 = vld [vmem:[#allocation17 + $0x498] sm:$0xff] }
 0x479   :  { %2916 = vmatpush.msra.mxu2 %v2251_v46  ;;  %2939 = vmatpush.msra.mxu3 %v2355_v3  ;;  %v2475_v11 = vld [vmem:[#allocation17 + $0xa58] sm:$0xff]  ;;  %v2364_v46 = vld [vmem:[#allocation17 + $0x6e0] sm:$0xff] }
 0x47a   :  { %2975 = vmatpush.msra.mxu1 %v2643_v9  ;;  %2888 = vmatpush.msrb.mxu0 %v2410_v22  ;;  %v2579_v12 = vld [vmem:[#allocation17 + $0xd98] sm:$0xff]  ;;  %v2260_v3 = vld [vmem:[#allocation17 + $0x3a0] sm:$0xff] }
 0x47b   :  { %2917 = vmatpush.msra.mxu2 %v2243_v23  ;;  %2940 = vmatpush.msra.mxu3 %v2347_v48  ;;  %v2179_v16 = vld [vmem:[#allocation17 + $0x118] sm:$0xff]  ;;  %v2652_v9 = vld [vmem:[#allocation17 + $0xfe0] sm:$0xff] }
 0x47c   :  { %2976 = vmatpush.msra.mxu1 %v2635_v49  ;;  %2889 = vmatpush.msrb.mxu0 %v2402_v50  ;;  %v2283_v18 = vld [vmem:[#allocation17 + $0x458] sm:$0xff]  ;;  %v2252_v23 = vld [vmem:[#allocation17 + $0x360] sm:$0xff] }
 0x47d   :  { %2890 = vmatmul.f32.vlgmr.msrb.gmra.mxu0 %v4108_v47  ;;  %2918 = vmatpush.msra.mxu2 %v2235_v51  ;;  %v2467_v40 = vld [vmem:[#allocation17 + $0xa18] sm:$0xff]  ;;  %v2356_v48 = vld [vmem:[#allocation17 + $0x6a0] sm:$0xff] }
 0x47e   :  { %2941 = vmatpush.msra.mxu3 %v2339_v17  ;;  %2954 = vmatpush.msra.mxu0 %v2523_v15  ;;  %v2571_v19 = vld [vmem:[#allocation17 + $0xd58] sm:$0xff]  ;;  %v2644_v49 = vld [vmem:[#allocation17 + $0xfa0] sm:$0xff] }
 0x47f   :  { %2977 = vmatpush.msra.mxu1 %v2627_v28  ;;  %2919 = vmatpush.msra.mxu2 %v2227_v52  ;;  %v2171_v60 = vld [vmem:[#allocation17 + $0xd8] sm:$0xff]  ;;  %v2244_v51 = vld [vmem:[#allocation17 + $0x320] sm:$0xff] }
 0x480   :  { %2942 = vmatpush.msra.mxu3 %v2331_v53  ;;  %2955 = vmatpush.msra.mxu0 %v2515_v2  ;;  %v2275_v62 = vld [vmem:[#allocation17 + $0x418] sm:$0xff]  ;;  %v2348_v17 = vld [vmem:[#allocation17 + $0x660] sm:$0xff] }
 0x481   :  { %2978 = vmatpush.msra.mxu1 %v2619_v54  ;;  %2920 = vmatpush.msra.mxu2 %v2219_v55  ;;  %v2459_v20 = vld [vmem:[#allocation17 + $0x9d8] sm:$0xff]  ;;  %v2636_v15 = vld [vmem:[#allocation17 + $0xf60] sm:$0xff] }
 0x482   :  { %2943 = vmatpush.msra.mxu3 %v2323_v56  ;;  %2956 = vmatpush.msra.mxu0 %v2507_v21  ;;  %v2563_v24 = vld [vmem:[#allocation17 + $0xd18] sm:$0xff]  ;;  %v2236_v52 = vld [vmem:[#allocation17 + $0x2e0] sm:$0xff] }
 0x483   :  { %2979 = vmatpush.msra.mxu1 %v2611_v13  ;;  %2921 = vmatpush.msra.mxu2 %v2211_v57  ;;  %v2163_v27 = vld [vmem:[#allocation17 + $0x98] sm:$0xff]  ;;  %v2340_v53 = vld [vmem:[#allocation17 + $0x620] sm:$0xff] }
 0x484   :  { %2944 = vmatpush.msra.mxu3 %v2315_v58  ;;  %2957 = vmatpush.msra.mxu0 %v2499_v59  ;;  %v2451_v30 = vld [vmem:[#allocation17 + $0x998] sm:$0xff]  ;;  %v2524_v2 = vld [vmem:[#allocation17 + $0xbe0] sm:$0xff] }
 0x485   :  { %2980 = vmatpush.msra.mxu1 %v2603_v63  ;;  %2922 = vmatpush.msra.mxu2 %v2203_v0  ;;  %v2555_v31 = vld [vmem:[#allocation17 + $0xcd8] sm:$0xff]  ;;  %v2628_v54 = vld [vmem:[#allocation17 + $0xf20] sm:$0xff] }
 0x486   :  { %2945 = vmatpush.msra.mxu3 %v2307_v1  ;;  %2958 = vmatpush.msra.mxu0 %v2491_v5  ;;  %v2155_v33 = vld [vmem:[#allocation17 + $0x58] sm:$0xff]  ;;  %v2228_v55 = vld [vmem:[#allocation17 + $0x2a0] sm:$0xff] }
 0x487   :  { %2981 = vmatpush.msra.mxu1 %v2595_v32  ;;  %2923 = vmatpush.msra.mxu2 %v2195_v6  ;;  %v2443_v34 = vld [vmem:[#allocation17 + $0x958] sm:$0xff]  ;;  %v2332_v56 = vld [vmem:[#allocation17 + $0x5e0] sm:$0xff] }
 0x488   :  { %2946 = vmatpush.msra.mxu3 %v2299_v7  ;;  %2959 = vmatpush.msra.mxu0 %v2483_v8  ;;  %v2547_v37 = vld [vmem:[#allocation17 + $0xc98] sm:$0xff]  ;;  %v2516_v21 = vld [vmem:[#allocation17 + $0xba0] sm:$0xff] }
 0x489   :  { %2982 = vmatpush.msra.mxu1 %v2587_v35  ;;  %2924 = vmatpush.msra.mxu2 %v2187_v10  ;;  %v2147_v38 = vld [vmem:[#allocation17 + $0x18] sm:$0xff]  ;;  %v2620_v13 = vld [vmem:[#allocation17 + $0xee0] sm:$0xff] }
 0x48a   :  { %2947 = vmatpush.msra.mxu3 %v2291_v4  ;;  %2960 = vmatpush.msra.mxu0 %v2475_v11  ;;  %v2435_v39 = vld [vmem:[#allocation17 + $0x918] sm:$0xff]  ;;  %v2220_v57 = vld [vmem:[#allocation17 + $0x260] sm:$0xff] }
 0x48b   :  { %2983 = vmatpush.msra.mxu1 %v2579_v12  ;;  %2925 = vmatpush.msra.mxu2 %v2179_v16  ;;  %v2539_v41 = vld [vmem:[#allocation17 + $0xc58] sm:$0xff]  ;;  %v2324_v58 = vld [vmem:[#allocation17 + $0x5a0] sm:$0xff] }
 0x48c   :  { %2948 = vmatpush.msra.mxu3 %v2283_v18  ;;  %2961 = vmatpush.msra.mxu0 %v2467_v40  ;;  %v2427_v44 = vld [vmem:[#allocation17 + $0x8d8] sm:$0xff]  ;;  %v2508_v59 = vld [vmem:[#allocation17 + $0xb60] sm:$0xff] }
 0x48d   :  { %2984 = vmatpush.msra.mxu1 %v2571_v19  ;;  %2926 = vmatpush.msra.mxu2 %v2171_v60  ;;  %v2531_v45 = vld [vmem:[#allocation17 + $0xc18] sm:$0xff]  ;;  %v2612_v63 = vld [vmem:[#allocation17 + $0xea0] sm:$0xff] }
 0x48e   :  { %2949 = vmatpush.msra.mxu3 %v2275_v62  ;;  %2962 = vmatpush.msra.mxu0 %v2459_v20  ;;  %v2419_v22 = vld [vmem:[#allocation17 + $0x898] sm:$0xff]  ;;  %v2212_v0 = vld [vmem:[#allocation17 + $0x220] sm:$0xff] }
 0x48f   :  { %2985 = vmatpush.msra.mxu1 %v2563_v24  ;;  %2950 = vmatmul.f32.vlgmr.msra.gmra.mxu3 %v4098_v14  ;;  %v2411_v50 = vld [vmem:[#allocation17 + $0x858] sm:$0xff]  ;;  %v2316_v1 = vld [vmem:[#allocation17 + $0x560] sm:$0xff] }
 0x490   :  { %3014 = vmatpush.msrb.mxu3 %v2396_v26  ;;  %2927 = vmatpush.msra.mxu2 %v2163_v27  ;;  %v2403_v28 = vld [vmem:[#allocation17 + $0x818] sm:$0xff]  ;;  %v2500_v5 = vld [vmem:[#allocation17 + $0xb20] sm:$0xff] }
 0x491   :  { %2963 = vmatpush.msra.mxu0 %v2451_v30  ;;  %2986 = vmatpush.msra.mxu1 %v2555_v31  ;;  %v2604_v32 = vld [vmem:[#allocation17 + $0xe60] sm:$0xff] }
 0x492   :  { %3015 = vmatpush.msrb.mxu3 %v2388_v61  ;;  %2928 = vmatpush.msra.mxu2 %v2155_v33  ;;  %v2204_v6 = vld [vmem:[#allocation17 + $0x1e0] sm:$0xff]  ;;  %v2397_v61 = vld [vmem:[#allocation17 + $0x7e8] sm:$0xff] }
 0x493   :  { %2964 = vmatpush.msra.mxu0 %v2443_v34  ;;  %2987 = vmatpush.msra.mxu1 %v2547_v37  ;;  %v2308_v7 = vld [vmem:[#allocation17 + $0x520] sm:$0xff] }
 0x494   :  { %3016 = vmatpush.msrb.mxu3 %v2380_v25  ;;  %2929 = vmatpush.msra.mxu2 %v2147_v38  ;;  %v2492_v8 = vld [vmem:[#allocation17 + $0xae0] sm:$0xff]  ;;  %v2389_v25 = vld [vmem:[#allocation17 + $0x7a8] sm:$0xff] }
 0x495   :  { %2965 = vmatpush.msra.mxu0 %v2435_v39  ;;  %2988 = vmatpush.msra.mxu1 %v2539_v41  ;;  %v2596_v35 = vld [vmem:[#allocation17 + $0xe20] sm:$0xff] }
 0x496   :  { %2930 = vmatmul.f32.vlgmr.msra.gmra.mxu2 %v4101_v29  ;;  %3017 = vmatpush.msrb.mxu3 %v2372_v42  ;;  %v2196_v10 = vld [vmem:[#allocation17 + $0x1a0] sm:$0xff]  ;;  %v2381_v42 = vld [vmem:[#allocation17 + $0x768] sm:$0xff] }
 0x497   :  { %2994 = vmatpush.msrb.mxu2 %v2268_v43  ;;  %2966 = vmatpush.msra.mxu0 %v2427_v44  ;;  %v2300_v4 = vld [vmem:[#allocation17 + $0x4e0] sm:$0xff] }
 0x498   :  { %2989 = vmatpush.msra.mxu1 %v2531_v45  ;;  %3018 = vmatpush.msrb.mxu3 %v2364_v46  ;;  %v2484_v11 = vld [vmem:[#allocation17 + $0xaa0] sm:$0xff]  ;;  %v2373_v46 = vld [vmem:[#allocation17 + $0x728] sm:$0xff] }
 0x499   :  { %2990 = vmatmul.f32.vlgmr.msra.gmra.mxu1 %v4104_v36  ;;  %2995 = vmatpush.msrb.mxu2 %v2260_v3  ;;  %v2588_v12 = vld [vmem:[#allocation17 + $0xde0] sm:$0xff]  ;;  %v2269_v3 = vld [vmem:[#allocation17 + $0x3e8] sm:$0xff] }
 0x49a   :  { %3054 = vmatpush.msrb.mxu1 %v2652_v9  ;;  %2967 = vmatpush.msra.mxu0 %v2419_v22  ;;  %v2188_v16 = vld [vmem:[#allocation17 + $0x160] sm:$0xff] }
 0x49b   :  { %2996 = vmatpush.msrb.mxu2 %v2252_v23  ;;  %3019 = vmatpush.msrb.mxu3 %v2356_v48  ;;  %v2292_v18 = vld [vmem:[#allocation17 + $0x4a0] sm:$0xff]  ;;  %v2365_v23 = vld [vmem:[#allocation17 + $0x6e8] sm:$0xff] }
 0x49c   :  { %3055 = vmatpush.msrb.mxu1 %v2644_v49  ;;  %2968 = vmatpush.msra.mxu0 %v2411_v50  ;;  %v2476_v40 = vld [vmem:[#allocation17 + $0xa60] sm:$0xff]  ;;  %v2261_v48 = vld [vmem:[#allocation17 + $0x3a8] sm:$0xff] }
 0x49d   :  { %2997 = vmatpush.msrb.mxu2 %v2244_v51  ;;  %3020 = vmatpush.msrb.mxu3 %v2348_v17  ;;  %v2580_v19 = vld [vmem:[#allocation17 + $0xda0] sm:$0xff]  ;;  %v2653_v49 = vld [vmem:[#allocation17 + $0xfe8] sm:$0xff] }
 0x49e   :  { %3056 = vmatpush.msrb.mxu1 %v2636_v15  ;;  %2969 = vmatpush.msra.mxu0 %v2403_v28  ;;  %v2180_v60 = vld [vmem:[#allocation17 + $0x120] sm:$0xff]  ;;  %v2253_v51 = vld [vmem:[#allocation17 + $0x368] sm:$0xff] }
 0x49f   :  { %2970 = vmatmul.f32.vlgmr.msra.gmra.mxu0 %v4108_v47  ;;  %2998 = vmatpush.msrb.mxu2 %v2236_v52  ;;  %v2284_v62 = vld [vmem:[#allocation17 + $0x460] sm:$0xff]  ;;  %v2357_v17 = vld [vmem:[#allocation17 + $0x6a8] sm:$0xff] }
 0x4a0   :  { %3021 = vmatpush.msrb.mxu3 %v2340_v53  ;;  %3034 = vmatpush.msrb.mxu0 %v2524_v2  ;;  %v2468_v20 = vld [vmem:[#allocation17 + $0xa20] sm:$0xff]  ;;  %v2645_v15 = vld [vmem:[#allocation17 + $0xfa8] sm:$0xff] }
 0x4a1   :  { %3057 = vmatpush.msrb.mxu1 %v2628_v54  ;;  %2999 = vmatpush.msrb.mxu2 %v2228_v55  ;;  %v2572_v24 = vld [vmem:[#allocation17 + $0xd60] sm:$0xff]  ;;  %v2245_v52 = vld [vmem:[#allocation17 + $0x328] sm:$0xff] }
 0x4a2   :  { %3022 = vmatpush.msrb.mxu3 %v2332_v56  ;;  %3035 = vmatpush.msrb.mxu0 %v2516_v21  ;;  %v2172_v26 = vld [vmem:[#allocation17 + $0xe0] sm:$0xff]  ;;  %v2349_v53 = vld [vmem:[#allocation17 + $0x668] sm:$0xff] }
 0x4a3   :  { %3058 = vmatpush.msrb.mxu1 %v2620_v13  ;;  %3000 = vmatpush.msrb.mxu2 %v2220_v57  ;;  %v2276_v27 = vld [vmem:[#allocation17 + $0x420] sm:$0xff]  ;;  %v2637_v2 = vld [vmem:[#allocation17 + $0xf68] sm:$0xff] }
 0x4a4   :  { %3023 = vmatpush.msrb.mxu3 %v2324_v58  ;;  %3036 = vmatpush.msrb.mxu0 %v2508_v59  ;;  %v2460_v30 = vld [vmem:[#allocation17 + $0x9e0] sm:$0xff]  ;;  %v2237_v55 = vld [vmem:[#allocation17 + $0x2e8] sm:$0xff] }
 0x4a5   :  { %3059 = vmatpush.msrb.mxu1 %v2612_v63  ;;  %3001 = vmatpush.msrb.mxu2 %v2212_v0  ;;  %v2564_v31 = vld [vmem:[#allocation17 + $0xd20] sm:$0xff]  ;;  %v2341_v56 = vld [vmem:[#allocation17 + $0x628] sm:$0xff] }
 0x4a6   :  { %3024 = vmatpush.msrb.mxu3 %v2316_v1  ;;  %3037 = vmatpush.msrb.mxu0 %v2500_v5  ;;  %v2164_v33 = vld [vmem:[#allocation17 + $0xa0] sm:$0xff]  ;;  %v2525_v21 = vld [vmem:[#allocation17 + $0xbe8] sm:$0xff] }
 0x4a7   :  { %3060 = vmatpush.msrb.mxu1 %v2604_v32  ;;  %3002 = vmatpush.msrb.mxu2 %v2204_v6  ;;  %v2452_v34 = vld [vmem:[#allocation17 + $0x9a0] sm:$0xff]  ;;  %v2629_v13 = vld [vmem:[#allocation17 + $0xf28] sm:$0xff] }
 0x4a8   :  { %3025 = vmatpush.msrb.mxu3 %v2308_v7  ;;  %3038 = vmatpush.msrb.mxu0 %v2492_v8  ;;  %v2556_v37 = vld [vmem:[#allocation17 + $0xce0] sm:$0xff]  ;;  %v2229_v57 = vld [vmem:[#allocation17 + $0x2a8] sm:$0xff] }
 0x4a9   :  { %3061 = vmatpush.msrb.mxu1 %v2596_v35  ;;  %3003 = vmatpush.msrb.mxu2 %v2196_v10  ;;  %v2156_v38 = vld [vmem:[#allocation17 + $0x60] sm:$0xff]  ;;  %v2333_v58 = vld [vmem:[#allocation17 + $0x5e8] sm:$0xff] }
 0x4aa   :  { %3026 = vmatpush.msrb.mxu3 %v2300_v4  ;;  %3039 = vmatpush.msrb.mxu0 %v2484_v11  ;;  %v2444_v39 = vld [vmem:[#allocation17 + $0x960] sm:$0xff]  ;;  %v2517_v59 = vld [vmem:[#allocation17 + $0xba8] sm:$0xff] }
 0x4ab   :  { %3062 = vmatpush.msrb.mxu1 %v2588_v12  ;;  %3004 = vmatpush.msrb.mxu2 %v2188_v16  ;;  %v2548_v41 = vld [vmem:[#allocation17 + $0xca0] sm:$0xff]  ;;  %v2621_v63 = vld [vmem:[#allocation17 + $0xee8] sm:$0xff] }
 0x4ac   :  { %3027 = vmatpush.msrb.mxu3 %v2292_v18  ;;  %3040 = vmatpush.msrb.mxu0 %v2476_v40  ;;  %v2148_v43 = vld [vmem:[#allocation17 + $0x20] sm:$0xff]  ;;  %v2221_v0 = vld [vmem:[#allocation17 + $0x268] sm:$0xff] }
 0x4ad   :  { %3063 = vmatpush.msrb.mxu1 %v2580_v19  ;;  %3005 = vmatpush.msrb.mxu2 %v2180_v60  ;;  %v2436_v44 = vld [vmem:[#allocation17 + $0x920] sm:$0xff]  ;;  %v2325_v1 = vld [vmem:[#allocation17 + $0x5a8] sm:$0xff] }
 0x4ae   :  { %3028 = vmatpush.msrb.mxu3 %v2284_v62  ;;  %3041 = vmatpush.msrb.mxu0 %v2468_v20  ;;  %v2540_v45 = vld [vmem:[#allocation17 + $0xc60] sm:$0xff]  ;;  %v2509_v5 = vld [vmem:[#allocation17 + $0xb68] sm:$0xff] }
 0x4af   :  { %3064 = vmatpush.msrb.mxu1 %v2572_v24  ;;  %3006 = vmatpush.msrb.mxu2 %v2172_v26  ;;  %v2428_v9 = vld [vmem:[#allocation17 + $0x8e0] sm:$0xff]  ;;  %v2613_v32 = vld [vmem:[#allocation17 + $0xea8] sm:$0xff] }
 0x4b0   :  { %3029 = vmatpush.msrb.mxu3 %v2276_v27  ;;  %3042 = vmatpush.msrb.mxu0 %v2460_v30  ;;  %v2532_v22 = vld [vmem:[#allocation17 + $0xc20] sm:$0xff]  ;;  %v2213_v6 = vld [vmem:[#allocation17 + $0x228] sm:$0xff] }
 0x4b1   :  { %3065 = vmatpush.msrb.mxu1 %v2564_v31  ;;  %3030 = vmatmul.f32.vlgmr.msrb.gmra.mxu3 %v4098_v14  ;;  %v2420_v50 = vld [vmem:[#allocation17 + $0x8a0] sm:$0xff]  ;;  %v2317_v7 = vld [vmem:[#allocation17 + $0x568] sm:$0xff] }
 0x4b2   :  { %3094 = vmatpush.msra.mxu3 %v2397_v61  ;;  %3007 = vmatpush.msrb.mxu2 %v2164_v33  ;;  %v2412_v28 = vld [vmem:[#allocation17 + $0x860] sm:$0xff]  ;;  %v2501_v8 = vld [vmem:[#allocation17 + $0xb28] sm:$0xff] }
 0x4b3   :  { %3043 = vmatpush.msrb.mxu0 %v2452_v34  ;;  %3066 = vmatpush.msrb.mxu1 %v2556_v37  ;;  %v2404_v54 = vld [vmem:[#allocation17 + $0x820] sm:$0xff]  ;;  %v2605_v35 = vld [vmem:[#allocation17 + $0xe68] sm:$0xff] }
 0x4b4   :  { %3095 = vmatpush.msra.mxu3 %v2389_v25  ;;  %3008 = vmatpush.msrb.mxu2 %v2156_v38  ;;  %v2205_v10 = vld [vmem:[#allocation17 + $0x1e8] sm:$0xff]  ;;  %v2398_v25 = vld [vmem:[#allocation17 + $0x7f0] sm:$0xff] }
 0x4b5   :  { %3044 = vmatpush.msrb.mxu0 %v2444_v39  ;;  %3067 = vmatpush.msrb.mxu1 %v2548_v41  ;;  %v2309_v4 = vld [vmem:[#allocation17 + $0x528] sm:$0xff] }
 0x4b6   :  { %3096 = vmatpush.msra.mxu3 %v2381_v42  ;;  %3009 = vmatpush.msrb.mxu2 %v2148_v43  ;;  %v2493_v11 = vld [vmem:[#allocation17 + $0xae8] sm:$0xff]  ;;  %v2390_v42 = vld [vmem:[#allocation17 + $0x7b0] sm:$0xff] }
 0x4b7   :  { %3045 = vmatpush.msrb.mxu0 %v2436_v44  ;;  %3068 = vmatpush.msrb.mxu1 %v2540_v45  ;;  %v2597_v12 = vld [vmem:[#allocation17 + $0xe28] sm:$0xff] }
 0x4b8   :  { %3010 = vmatmul.f32.vlgmr.msrb.gmra.mxu2 %v4101_v29  ;;  %3097 = vmatpush.msra.mxu3 %v2373_v46  ;;  %v2197_v16 = vld [vmem:[#allocation17 + $0x1a8] sm:$0xff]  ;;  %v2382_v46 = vld [vmem:[#allocation17 + $0x770] sm:$0xff] }
 0x4b9   :  { %3074 = vmatpush.msra.mxu2 %v2269_v3  ;;  %3046 = vmatpush.msrb.mxu0 %v2428_v9  ;;  %v2301_v18 = vld [vmem:[#allocation17 + $0x4e8] sm:$0xff] }
 0x4ba   :  { %3069 = vmatpush.msrb.mxu1 %v2532_v22  ;;  %3098 = vmatpush.msra.mxu3 %v2365_v23  ;;  %v2485_v40 = vld [vmem:[#allocation17 + $0xaa8] sm:$0xff]  ;;  %v2374_v23 = vld [vmem:[#allocation17 + $0x730] sm:$0xff] }
 0x4bb   :  { %3070 = vmatmul.f32.vlgmr.msrb.gmra.mxu1 %v4104_v36  ;;  %3075 = vmatpush.msra.mxu2 %v2261_v48  ;;  %v2589_v19 = vld [vmem:[#allocation17 + $0xde8] sm:$0xff]  ;;  %v2270_v48 = vld [vmem:[#allocation17 + $0x3f0] sm:$0xff] }
 0x4bc   :  { %3134 = vmatpush.msra.mxu1 %v2653_v49  ;;  %3047 = vmatpush.msrb.mxu0 %v2420_v50  ;;  %v2189_v60 = vld [vmem:[#allocation17 + $0x168] sm:$0xff] }
 0x4bd   :  { %3076 = vmatpush.msra.mxu2 %v2253_v51  ;;  %3099 = vmatpush.msra.mxu3 %v2357_v17  ;;  %v2293_v62 = vld [vmem:[#allocation17 + $0x4a8] sm:$0xff]  ;;  %v2366_v51 = vld [vmem:[#allocation17 + $0x6f0] sm:$0xff] }
 0x4be   :  { %3135 = vmatpush.msra.mxu1 %v2645_v15  ;;  %3048 = vmatpush.msrb.mxu0 %v2412_v28  ;;  %v2477_v20 = vld [vmem:[#allocation17 + $0xa68] sm:$0xff]  ;;  %v2262_v17 = vld [vmem:[#allocation17 + $0x3b0] sm:$0xff] }
 0x4bf   :  { %3077 = vmatpush.msra.mxu2 %v2245_v52  ;;  %3100 = vmatpush.msra.mxu3 %v2349_v53  ;;  %v2581_v24 = vld [vmem:[#allocation17 + $0xda8] sm:$0xff]  ;;  %v2654_v15 = vld [vmem:[#allocation17 + $0xff0] sm:$0xff] }
 0x4c0   :  { %3136 = vmatpush.msra.mxu1 %v2637_v2  ;;  %3049 = vmatpush.msrb.mxu0 %v2404_v54  ;;  %v2181_v26 = vld [vmem:[#allocation17 + $0x128] sm:$0xff]  ;;  %v2254_v52 = vld [vmem:[#allocation17 + $0x370] sm:$0xff] }
 0x4c1   :  { %3050 = vmatmul.f32.vlgmr.msrb.gmra.mxu0 %v4108_v47  ;;  %3078 = vmatpush.msra.mxu2 %v2237_v55  ;;  %v2285_v27 = vld [vmem:[#allocation17 + $0x468] sm:$0xff]  ;;  %v2358_v53 = vld [vmem:[#allocation17 + $0x6b0] sm:$0xff] }
 0x4c2   :  { %3101 = vmatpush.msra.mxu3 %v2341_v56  ;;  %3114 = vmatpush.msra.mxu0 %v2525_v21  ;;  %v2469_v30 = vld [vmem:[#allocation17 + $0xa28] sm:$0xff]  ;;  %v2646_v2 = vld [vmem:[#allocation17 + $0xfb0] sm:$0xff] }
 0x4c3   :  { %3137 = vmatpush.msra.mxu1 %v2629_v13  ;;  %3079 = vmatpush.msra.mxu2 %v2229_v57  ;;  %v2573_v31 = vld [vmem:[#allocation17 + $0xd68] sm:$0xff]  ;;  %v2246_v55 = vld [vmem:[#allocation17 + $0x330] sm:$0xff] }
 0x4c4   :  { %3102 = vmatpush.msra.mxu3 %v2333_v58  ;;  %3115 = vmatpush.msra.mxu0 %v2517_v59  ;;  %v2173_v61 = vld [vmem:[#allocation17 + $0xe8] sm:$0xff]  ;;  %v2350_v56 = vld [vmem:[#allocation17 + $0x670] sm:$0xff] }
 0x4c5   :  { %3138 = vmatpush.msra.mxu1 %v2621_v63  ;;  %3080 = vmatpush.msra.mxu2 %v2221_v0  ;;  %v2277_v33 = vld [vmem:[#allocation17 + $0x428] sm:$0xff]  ;;  %v2638_v21 = vld [vmem:[#allocation17 + $0xf70] sm:$0xff] }
 0x4c6   :  { %3103 = vmatpush.msra.mxu3 %v2325_v1  ;;  %3116 = vmatpush.msra.mxu0 %v2509_v5  ;;  %v2461_v34 = vld [vmem:[#allocation17 + $0x9e8] sm:$0xff]  ;;  %v2238_v57 = vld [vmem:[#allocation17 + $0x2f0] sm:$0xff] }
 0x4c7   :  { %3139 = vmatpush.msra.mxu1 %v2613_v32  ;;  %3081 = vmatpush.msra.mxu2 %v2213_v6  ;;  %v2565_v37 = vld [vmem:[#allocation17 + $0xd28] sm:$0xff]  ;;  %v2342_v58 = vld [vmem:[#allocation17 + $0x630] sm:$0xff] }
 0x4c8   :  { %3104 = vmatpush.msra.mxu3 %v2317_v7  ;;  %3117 = vmatpush.msra.mxu0 %v2501_v8  ;;  %v2165_v38 = vld [vmem:[#allocation17 + $0xa8] sm:$0xff]  ;;  %v2526_v59 = vld [vmem:[#allocation17 + $0xbf0] sm:$0xff] }
 0x4c9   :  { %3140 = vmatpush.msra.mxu1 %v2605_v35  ;;  %3082 = vmatpush.msra.mxu2 %v2205_v10  ;;  %v2453_v39 = vld [vmem:[#allocation17 + $0x9a8] sm:$0xff]  ;;  %v2630_v63 = vld [vmem:[#allocation17 + $0xf30] sm:$0xff] }
 0x4ca   :  { %3105 = vmatpush.msra.mxu3 %v2309_v4  ;;  %3118 = vmatpush.msra.mxu0 %v2493_v11  ;;  %v2557_v41 = vld [vmem:[#allocation17 + $0xce8] sm:$0xff]  ;;  %v2230_v0 = vld [vmem:[#allocation17 + $0x2b0] sm:$0xff] }
 0x4cb   :  { %3141 = vmatpush.msra.mxu1 %v2597_v12  ;;  %3083 = vmatpush.msra.mxu2 %v2197_v16  ;;  %v2157_v43 = vld [vmem:[#allocation17 + $0x68] sm:$0xff]  ;;  %v2334_v1 = vld [vmem:[#allocation17 + $0x5f0] sm:$0xff] }
 0x4cc   :  { %3106 = vmatpush.msra.mxu3 %v2301_v18  ;;  %3119 = vmatpush.msra.mxu0 %v2485_v40  ;;  %v2445_v44 = vld [vmem:[#allocation17 + $0x968] sm:$0xff]  ;;  %v2518_v5 = vld [vmem:[#allocation17 + $0xbb0] sm:$0xff] }
 0x4cd   :  { %3142 = vmatpush.msra.mxu1 %v2589_v19  ;;  %3084 = vmatpush.msra.mxu2 %v2189_v60  ;;  %v2549_v45 = vld [vmem:[#allocation17 + $0xca8] sm:$0xff]  ;;  %v2622_v32 = vld [vmem:[#allocation17 + $0xef0] sm:$0xff] }
 0x4ce   :  { %3107 = vmatpush.msra.mxu3 %v2293_v62  ;;  %3120 = vmatpush.msra.mxu0 %v2477_v20  ;;  %v2149_v3 = vld [vmem:[#allocation17 + $0x28] sm:$0xff]  ;;  %v2222_v6 = vld [vmem:[#allocation17 + $0x270] sm:$0xff] }
 0x4cf   :  { %3143 = vmatpush.msra.mxu1 %v2581_v24  ;;  %3085 = vmatpush.msra.mxu2 %v2181_v26  ;;  %v2437_v9 = vld [vmem:[#allocation17 + $0x928] sm:$0xff]  ;;  %v2326_v7 = vld [vmem:[#allocation17 + $0x5b0] sm:$0xff] }
 0x4d0   :  { %3108 = vmatpush.msra.mxu3 %v2285_v27  ;;  %3121 = vmatpush.msra.mxu0 %v2469_v30  ;;  %v2541_v22 = vld [vmem:[#allocation17 + $0xc68] sm:$0xff]  ;;  %v2510_v8 = vld [vmem:[#allocation17 + $0xb70] sm:$0xff] }
 0x4d1   :  { %3144 = vmatpush.msra.mxu1 %v2573_v31  ;;  %3086 = vmatpush.msra.mxu2 %v2173_v61  ;;  %v2429_v49 = vld [vmem:[#allocation17 + $0x8e8] sm:$0xff]  ;;  %v2614_v35 = vld [vmem:[#allocation17 + $0xeb0] sm:$0xff] }
 0x4d2   :  { %3109 = vmatpush.msra.mxu3 %v2277_v33  ;;  %3122 = vmatpush.msra.mxu0 %v2461_v34  ;;  %v2533_v50 = vld [vmem:[#allocation17 + $0xc28] sm:$0xff]  ;;  %v2214_v10 = vld [vmem:[#allocation17 + $0x230] sm:$0xff] }
 0x4d3   :  { %3145 = vmatpush.msra.mxu1 %v2565_v37  ;;  %3110 = vmatmul.f32.vlgmr.msra.gmra.mxu3 %v4098_v14  ;;  %v2421_v28 = vld [vmem:[#allocation17 + $0x8a8] sm:$0xff]  ;;  %v2318_v4 = vld [vmem:[#allocation17 + $0x570] sm:$0xff] }
 0x4d4   :  { %3174 = vmatpush.msrb.mxu3 %v2398_v25  ;;  %3087 = vmatpush.msra.mxu2 %v2165_v38  ;;  %v2413_v54 = vld [vmem:[#allocation17 + $0x868] sm:$0xff]  ;;  %v2502_v11 = vld [vmem:[#allocation17 + $0xb30] sm:$0xff] }
 0x4d5   :  { %3123 = vmatpush.msra.mxu0 %v2453_v39  ;;  %3146 = vmatpush.msra.mxu1 %v2557_v41  ;;  %v2405_v13 = vld [vmem:[#allocation17 + $0x828] sm:$0xff]  ;;  %v2606_v12 = vld [vmem:[#allocation17 + $0xe70] sm:$0xff] }
 0x4d6   :  { %3175 = vmatpush.msrb.mxu3 %v2390_v42  ;;  %3088 = vmatpush.msra.mxu2 %v2157_v43  ;;  %v2206_v16 = vld [vmem:[#allocation17 + $0x1f0] sm:$0xff]  ;;  %v2399_v42 = vld [vmem:[#allocation17 + $0x7f8] sm:$0xff] }
 0x4d7   :  { %3124 = vmatpush.msra.mxu0 %v2445_v44  ;;  %3147 = vmatpush.msra.mxu1 %v2549_v45  ;;  %v2310_v18 = vld [vmem:[#allocation17 + $0x530] sm:$0xff] }
 0x4d8   :  { %3176 = vmatpush.msrb.mxu3 %v2382_v46  ;;  %3089 = vmatpush.msra.mxu2 %v2149_v3  ;;  %v2494_v40 = vld [vmem:[#allocation17 + $0xaf0] sm:$0xff]  ;;  %v2391_v46 = vld [vmem:[#allocation17 + $0x7b8] sm:$0xff] }
 0x4d9   :  { %3125 = vmatpush.msra.mxu0 %v2437_v9  ;;  %3148 = vmatpush.msra.mxu1 %v2541_v22  ;;  %v2598_v19 = vld [vmem:[#allocation17 + $0xe30] sm:$0xff] }
 0x4da   :  { %3090 = vmatmul.f32.vlgmr.msra.gmra.mxu2 %v4101_v29  ;;  %3177 = vmatpush.msrb.mxu3 %v2374_v23  ;;  %v2198_v60 = vld [vmem:[#allocation17 + $0x1b0] sm:$0xff]  ;;  %v2383_v23 = vld [vmem:[#allocation17 + $0x778] sm:$0xff] }
 0x4db   :  { %3154 = vmatpush.msrb.mxu2 %v2270_v48  ;;  %3126 = vmatpush.msra.mxu0 %v2429_v49  ;;  %v2302_v62 = vld [vmem:[#allocation17 + $0x4f0] sm:$0xff] }
 0x4dc   :  { %3149 = vmatpush.msra.mxu1 %v2533_v50  ;;  %3178 = vmatpush.msrb.mxu3 %v2366_v51  ;;  %v2486_v20 = vld [vmem:[#allocation17 + $0xab0] sm:$0xff]  ;;  %v2375_v51 = vld [vmem:[#allocation17 + $0x738] sm:$0xff] }
 0x4dd   :  { %3150 = vmatmul.f32.vlgmr.msra.gmra.mxu1 %v4104_v36  ;;  %3155 = vmatpush.msrb.mxu2 %v2262_v17  ;;  %v2590_v24 = vld [vmem:[#allocation17 + $0xdf0] sm:$0xff]  ;;  %v2271_v17 = vld [vmem:[#allocation17 + $0x3f8] sm:$0xff] }
 0x4de   :  { %3214 = vmatpush.msrb.mxu1 %v2654_v15  ;;  %3127 = vmatpush.msra.mxu0 %v2421_v28  ;;  %v2190_v26 = vld [vmem:[#allocation17 + $0x170] sm:$0xff]  ;;  %v4131_v28 = vpop.f32.mrf.mxu2 }
 0x4df   :  { %3156 = vmatpush.msrb.mxu2 %v2254_v52  ;;  %3179 = vmatpush.msrb.mxu3 %v2358_v53  ;;  %v2294_v27 = vld [vmem:[#allocation17 + $0x4b0] sm:$0xff]  ;;  %v2367_v53 = vld [vmem:[#allocation17 + $0x6f8] sm:$0xff] }
 0x4e0   :  { %3215 = vmatpush.msrb.mxu1 %v2646_v2  ;;  %3128 = vmatpush.msra.mxu0 %v2413_v54  ;;  %v2478_v30 = vld [vmem:[#allocation17 + $0xa70] sm:$0xff]  ;;  %v2263_v2 = vld [vmem:[#allocation17 + $0x3b8] sm:$0xff] }
 0x4e1   :  { %3157 = vmatpush.msrb.mxu2 %v2246_v55  ;;  %3180 = vmatpush.msrb.mxu3 %v2350_v56  ;;  %v2582_v31 = vld [vmem:[#allocation17 + $0xdb0] sm:$0xff]  ;;  %v2655_v54 = vld [vmem:[#allocation17 + $0xff8] sm:$0xff] }
 0x4e2   :  { %3216 = vmatpush.msrb.mxu1 %v2638_v21  ;;  %3129 = vmatpush.msra.mxu0 %v2405_v13  ;;  %v2182_v61 = vld [vmem:[#allocation17 + $0x130] sm:$0xff]  ;;  %v2255_v56 = vld [vmem:[#allocation17 + $0x378] sm:$0xff] }
 0x4e3   :  { %3130 = vmatmul.f32.vlgmr.msra.gmra.mxu0 %v4108_v47  ;;  %3158 = vmatpush.msrb.mxu2 %v2238_v57  ;;  %v2286_v33 = vld [vmem:[#allocation17 + $0x470] sm:$0xff]  ;;  %v2359_v21 = vld [vmem:[#allocation17 + $0x6b8] sm:$0xff] }
 0x4e4   :  { %3181 = vmatpush.msrb.mxu3 %v2342_v58  ;;  %3194 = vmatpush.msrb.mxu0 %v2526_v59  ;;  %v2470_v34 = vld [vmem:[#allocation17 + $0xa30] sm:$0xff]  ;;  %v2647_v13 = vld [vmem:[#allocation17 + $0xfb8] sm:$0xff] }
 0x4e5   :  { %3217 = vmatpush.msrb.mxu1 %v2630_v63  ;;  %3159 = vmatpush.msrb.mxu2 %v2230_v0  ;;  %v2574_v37 = vld [vmem:[#allocation17 + $0xd70] sm:$0xff]  ;;  %v2247_v58 = vld [vmem:[#allocation17 + $0x338] sm:$0xff]  ;;  %v4135_v63 = vpop.f32.mrf.mxu3 }
 0x4e6   :  { %3182 = vmatpush.msrb.mxu3 %v2334_v1  ;;  %3195 = vmatpush.msrb.mxu0 %v2518_v5  ;;  %v2174_v25 = vld [vmem:[#allocation17 + $0xf0] sm:$0xff]  ;;  %v2351_v59 = vld [vmem:[#allocation17 + $0x678] sm:$0xff] }
 0x4e7   :  { %3218 = vmatpush.msrb.mxu1 %v2622_v32  ;;  %3160 = vmatpush.msrb.mxu2 %v2222_v6  ;;  %v2278_v38 = vld [vmem:[#allocation17 + $0x430] sm:$0xff]  ;;  %v2639_v0 = vld [vmem:[#allocation17 + $0xf78] sm:$0xff]  ;;  %v4137_v32 = vpop.f32.mrf.mxu0 }
 0x4e8   :  { %3183 = vmatpush.msrb.mxu3 %v2326_v7  ;;  %3196 = vmatpush.msrb.mxu0 %v2510_v8  ;;  %v2462_v39 = vld [vmem:[#allocation17 + $0x9f0] sm:$0xff]  ;;  %v2239_v5 = vld [vmem:[#allocation17 + $0x2f8] sm:$0xff] }
 0x4e9   :  { %3219 = vmatpush.msrb.mxu1 %v2614_v35  ;;  %3161 = vmatpush.msrb.mxu2 %v2214_v10  ;;  %v2566_v41 = vld [vmem:[#allocation17 + $0xd30] sm:$0xff]  ;;  %v2343_v6 = vld [vmem:[#allocation17 + $0x638] sm:$0xff]  ;;  %v4139_v10 = vpop.f32.mrf.mxu1 }
 0x4ea   :  { %3184 = vmatpush.msrb.mxu3 %v2318_v4  ;;  %3197 = vmatpush.msrb.mxu0 %v2502_v11  ;;  %v2166_v43 = vld [vmem:[#allocation17 + $0xb0] sm:$0xff]  ;;  %v2527_v7 = vld [vmem:[#allocation17 + $0xbf8] sm:$0xff]  ;;  %v2771_v4 = vpop.f32.mrf.mxu2 }
 0x4eb   :  { %3220 = vmatpush.msrb.mxu1 %v2606_v12  ;;  %3162 = vmatpush.msrb.mxu2 %v2206_v16  ;;  %v2454_v44 = vld [vmem:[#allocation17 + $0x9b0] sm:$0xff]  ;;  %v2631_v8 = vld [vmem:[#allocation17 + $0xf38] sm:$0xff] }
 0x4ec   :  { %3185 = vmatpush.msrb.mxu3 %v2310_v18  ;;  %3198 = vmatpush.msrb.mxu0 %v2494_v40  ;;  %v2558_v45 = vld [vmem:[#allocation17 + $0xcf0] sm:$0xff]  ;;  %v2231_v35 = vld [vmem:[#allocation17 + $0x2b8] sm:$0xff] }
 0x4ed   :  { %3221 = vmatpush.msrb.mxu1 %v2598_v19  ;;  %3163 = vmatpush.msrb.mxu2 %v2198_v60  ;;  %v2158_v3 = vld [vmem:[#allocation17 + $0x70] sm:$0xff]  ;;  %v2335_v11 = vld [vmem:[#allocation17 + $0x5f8] sm:$0xff] }
 0x4ee   :  { %3186 = vmatpush.msrb.mxu3 %v2302_v62  ;;  %3199 = vmatpush.msrb.mxu0 %v2486_v20  ;;  %v2446_v9 = vld [vmem:[#allocation17 + $0x970] sm:$0xff]  ;;  %v2519_v12 = vld [vmem:[#allocation17 + $0xbb8] sm:$0xff]  ;;  %v4142_v20 = vld [vmem:[#allocation19] sm:$0xff] }
 0x4ef   :  { %3222 = vmatpush.msrb.mxu1 %v2590_v24  ;;  %3164 = vmatpush.msrb.mxu2 %v2190_v26  ;;  %v2550_v22 = vld [vmem:[#allocation17 + $0xcb0] sm:$0xff]  ;;  %v2623_v16 = vld [vmem:[#allocation17 + $0xef8] sm:$0xff] }
 0x4f0   :  { %3187 = vmatpush.msrb.mxu3 %v2294_v27  ;;  %3200 = vmatpush.msrb.mxu0 %v2478_v30  ;;  %v2150_v48 = vld [vmem:[#allocation17 + $0x30] sm:$0xff]  ;;  %v2223_v18 = vld [vmem:[#allocation17 + $0x278] sm:$0xff]  ;;  %v2659_v27 = vperm.slane %v4142_v20, 1 }
 0x4f1   :  { %3223 = vmatpush.msrb.mxu1 %v2582_v31  ;;  %3165 = vmatpush.msrb.mxu2 %v2182_v61  ;;  %v2438_v49 = vld [vmem:[#allocation17 + $0x930] sm:$0xff]  ;;  %v2327_v40 = vld [vmem:[#allocation17 + $0x5b8] sm:$0xff]  ;;  %v2791_v61 = vpop.f32.mrf.mxu3 }
 0x4f2   :  { %3188 = vmatpush.msrb.mxu3 %v2286_v33  ;;  %3201 = vmatpush.msrb.mxu0 %v2470_v34  ;;  %v2542_v50 = vld [vmem:[#allocation17 + $0xc70] sm:$0xff]  ;;  %v2511_v19 = vld [vmem:[#allocation17 + $0xb78] sm:$0xff] }
 0x4f3   :  { %3224 = vmatpush.msrb.mxu1 %v2574_v37  ;;  %3166 = vmatpush.msrb.mxu2 %v2174_v25  ;;  %v2430_v15 = vld [vmem:[#allocation17 + $0x8f0] sm:$0xff]  ;;  %v2615_v60 = vld [vmem:[#allocation17 + $0xeb8] sm:$0xff]  ;;  %v2660_v37 = vperm.slane %v4142_v20, 2 }
 0x4f4   :  { %3189 = vmatpush.msrb.mxu3 %v2278_v38  ;;  %3202 = vmatpush.msrb.mxu0 %v2462_v39  ;;  %v2534_v52 = vld [vmem:[#allocation17 + $0xc30] sm:$0xff]  ;;  %v2215_v62 = vld [vmem:[#allocation17 + $0x238] sm:$0xff]  ;;  %v2811_v39 = vpop.f32.mrf.mxu0 }
 0x4f5   :  { %3225 = vmatpush.msrb.mxu1 %v2566_v41  ;;  %3190 = vmatmul.f32.vlgmr.msrb.gmra.mxu3 %v4098_v14  ;;  %v2422_v55 = vld [vmem:[#allocation17 + $0x8b0] sm:$0xff]  ;;  %v2319_v24 = vld [vmem:[#allocation17 + $0x578] sm:$0xff] }
 0x4f6   :  { %3254 = vmatpush.msra.mxu3 %v2399_v42  ;;  %3167 = vmatpush.msrb.mxu2 %v2166_v43  ;;  %v2414_v57 = vld [vmem:[#allocation17 + $0x870] sm:$0xff]  ;;  %v2503_v26 = vld [vmem:[#allocation17 + $0xb38] sm:$0xff] }
 0x4f7   :  { %3203 = vmatpush.msrb.mxu0 %v2454_v44  ;;  %3226 = vmatpush.msrb.mxu1 %v2558_v45  ;;  %v2406_v1 = vld [vmem:[#allocation17 + $0x830] sm:$0xff]  ;;  %v2607_v30 = vld [vmem:[#allocation17 + $0xe78] sm:$0xff]  ;;  %v2851_v41 = vpop.f32.mrf.mxu2  ;;  %v2772_v44 = vadd.f32 %v2771_v4, %v2659_v27 }
 0x4f8   :  { %3255 = vmatpush.msra.mxu3 %v2391_v46  ;;  %3168 = vmatpush.msrb.mxu2 %v2158_v3  ;;  %v2207_v31 = vld [vmem:[#allocation17 + $0x1f8] sm:$0xff]  ;;  %v2831_v3 = vpop.f32.mrf.mxu1 }
 0x4f9   :  { %3204 = vmatpush.msrb.mxu0 %v2446_v9  ;;  %3227 = vmatpush.msrb.mxu1 %v2550_v22  ;;  %v2311_v33 = vld [vmem:[#allocation17 + $0x538] sm:$0xff] }
 0x4fa   :  { %3256 = vmatpush.msra.mxu3 %v2383_v23  ;;  %3169 = vmatpush.msrb.mxu2 %v2150_v48  ;;  %v2495_v34 = vld [vmem:[#allocation17 + $0xaf8] sm:$0xff]  ;;  %v2658_v23 = vperm.slane %v4142_v20, 0  ;;  %v2852_v48 = vadd.f32 %v2851_v41, %v2660_v37 }
 0x4fb   :  { %3205 = vmatpush.msrb.mxu0 %v2438_v49  ;;  %3228 = vmatpush.msrb.mxu1 %v2542_v50  ;;  %v2599_v25 = vld [vmem:[#allocation17 + $0xe38] sm:$0xff] }
 0x4fc   :  { %3170 = vmatmul.f32.vlgmr.msrb.gmra.mxu2 %v4101_v29  ;;  %3257 = vmatpush.msra.mxu3 %v2375_v51  ;;  %v2199_v38 = vld [vmem:[#allocation17 + $0x1b8] sm:$0xff] }
 0x4fd   :  { %3234 = vmatpush.msra.mxu2 %v2271_v17  ;;  %3206 = vmatpush.msrb.mxu0 %v2430_v15  ;;  %v2303_v42 = vld [vmem:[#allocation17 + $0x4f8] sm:$0xff]  ;;  %v2792_v15 = vadd.f32 %v2791_v61, %v2772_v44 }
 0x4fe   :  { %3229 = vmatpush.msrb.mxu1 %v2534_v52  ;;  %3258 = vmatpush.msra.mxu3 %v2367_v53  ;;  %v2487_v43 = vld [vmem:[#allocation17 + $0xab8] sm:$0xff] }
 0x4ff   :  { %3230 = vmatmul.f32.vlgmr.msrb.gmra.mxu1 %v4104_v36  ;;  %3235 = vmatpush.msra.mxu2 %v2263_v2  ;;  %v2591_v45 = vld [vmem:[#allocation17 + $0xdf8] sm:$0xff]  ;;  %v2871_v2 = vpop.f32.mrf.mxu3 }
 0x500   :  { %3294 = vmatpush.msra.mxu1 %v2655_v54  ;;  %3207 = vmatpush.msrb.mxu0 %v2422_v55  ;;  %v2191_v46 = vld [vmem:[#allocation17 + $0x178] sm:$0xff] }
 0x501   :  { %3236 = vmatpush.msra.mxu2 %v2255_v56  ;;  %3259 = vmatpush.msra.mxu3 %v2359_v21  ;;  %v2295_v9 = vld [vmem:[#allocation17 + $0x4b8] sm:$0xff]  ;;  %v2692_v56 = vadd.f32 %v4131_v28, %v2658_v23  ;;  %v2872_v21 = vadd.f32 %v2871_v2, %v2852_v48  ;;  %v2664_v48 = vperm.slane %v4142_v20, 6 }
 0x502   :  { %3295 = vmatpush.msra.mxu1 %v2647_v13  ;;  %3208 = vmatpush.msrb.mxu0 %v2414_v57  ;;  %v2479_v22 = vld [vmem:[#allocation17 + $0xa78] sm:$0xff]  ;;  %v2891_v57 = vpop.f32.mrf.mxu0 }
 0x503   :  { %3237 = vmatpush.msra.mxu2 %v2247_v58  ;;  %3260 = vmatpush.msra.mxu3 %v2351_v59  ;;  %v2583_v49 = vld [vmem:[#allocation17 + $0xdb8] sm:$0xff] }
 0x504   :  { %3296 = vmatpush.msra.mxu1 %v2639_v0  ;;  %3209 = vmatpush.msrb.mxu0 %v2406_v1  ;;  %v2183_v50 = vld [vmem:[#allocation17 + $0x138] sm:$0xff]  ;;  %v2812_v0 = vadd.f32 %v2811_v39, %v2792_v15  ;;  %v2662_v15 = vperm.slane %v4142_v20, 4 }
 0x505   :  { %3210 = vmatmul.f32.vlgmr.msrb.gmra.mxu0 %v4108_v47  ;;  %3238 = vmatpush.msra.mxu2 %v2239_v5  ;;  %v2287_v51 = vld [vmem:[#allocation17 + $0x478] sm:$0xff]  ;;  %v2661_v5 = vperm.slane %v4142_v20, 3 }
 0x506   :  { %3261 = vmatpush.msra.mxu3 %v2343_v6  ;;  %3274 = vmatpush.msra.mxu0 %v2527_v7  ;;  %v2471_v17 = vld [vmem:[#allocation17 + $0xa38] sm:$0xff]  ;;  %v2911_v6 = vpop.f32.mrf.mxu1 }
 0x507   :  { %3297 = vmatpush.msra.mxu1 %v2631_v8  ;;  %3239 = vmatpush.msra.mxu2 %v2231_v35  ;;  %v2575_v52 = vld [vmem:[#allocation17 + $0xd78] sm:$0xff]  ;;  %v2712_v8 = vadd.f32 %v4135_v63, %v2692_v56  ;;  %v2892_v35 = vadd.f32 %v2891_v57, %v2872_v21 }
 0x508   :  { %3262 = vmatpush.msra.mxu3 %v2335_v11  ;;  %3275 = vmatpush.msra.mxu0 %v2519_v12  ;;  %v2175_v53 = vld [vmem:[#allocation17 + $0xf8] sm:$0xff] }
 0x509   :  { %3298 = vmatpush.msra.mxu1 %v2623_v16  ;;  %3240 = vmatpush.msra.mxu2 %v2223_v18  ;;  %v2279_v54 = vld [vmem:[#allocation17 + $0x438] sm:$0xff]  ;;  %v2832_v18 = vadd.f32 %v2831_v3, %v2812_v0 }
 0x50a   :  { %3263 = vmatpush.msra.mxu3 %v2327_v40  ;;  %3276 = vmatpush.msra.mxu0 %v2511_v19  ;;  %v2463_v55 = vld [vmem:[#allocation17 + $0x9f8] sm:$0xff] }
 0x50b   :  { %3299 = vmatpush.msra.mxu1 %v2615_v60  ;;  %3241 = vmatpush.msra.mxu2 %v2215_v62  ;;  %v2567_v13 = vld [vmem:[#allocation17 + $0xd38] sm:$0xff]  ;;  %v2732_v62 = vadd.f32 %v4137_v32, %v2712_v8  ;;  %3409 = vtanh.f32 %v2832_v18 }
 0x50c   :  { %3264 = vmatpush.msra.mxu3 %v2319_v24  ;;  %3277 = vmatpush.msra.mxu0 %v2503_v26  ;;  %v2167_v58 = vld [vmem:[#allocation17 + $0xb8] sm:$0xff]  ;;  %v2912_v24 = vadd.f32 %v2911_v6, %v2892_v35 }
 0x50d   :  { %3300 = vmatpush.msra.mxu1 %v2607_v30  ;;  %3242 = vmatpush.msra.mxu2 %v2207_v31  ;;  %v2455_v59 = vld [vmem:[#allocation17 + $0x9b8] sm:$0xff] }
 0x50e   :  { %3265 = vmatpush.msra.mxu3 %v2311_v33  ;;  %3278 = vmatpush.msra.mxu0 %v2495_v34  ;;  %v2559_v1 = vld [vmem:[#allocation17 + $0xcf8] sm:$0xff]  ;;  %v2752_v34 = vadd.f32 %v4139_v10, %v2732_v62  ;;  %3411 = vtanh.f32 %v2912_v24 }
 0x50f   :  { %3301 = vmatpush.msra.mxu1 %v2599_v25  ;;  %3243 = vmatpush.msra.mxu2 %v2199_v38  ;;  %v2159_v28 = vld [vmem:[#allocation17 + $0x78] sm:$0xff] }
 0x510   :  { %3266 = vmatpush.msra.mxu3 %v2303_v42  ;;  %3279 = vmatpush.msra.mxu0 %v2487_v43  ;;  %v2447_v7 = vld [vmem:[#allocation17 + $0x978] sm:$0xff] }
 0x511   :  { %3302 = vmatpush.msra.mxu1 %v2591_v45  ;;  %3244 = vmatpush.msra.mxu2 %v2191_v46  ;;  %v2551_v4 = vld [vmem:[#allocation17 + $0xcb8] sm:$0xff]  ;;  %v3410_v25 = vpop.eup %3409 }
 0x512   :  { %3267 = vmatpush.msra.mxu3 %v2295_v9  ;;  %3280 = vmatpush.msra.mxu0 %v2479_v22  ;;  %v2151_v11 = vld [vmem:[#allocation17 + $0x38] sm:$0xff]  ;;  %v2951_v60 = vpop.f32.mrf.mxu3  ;;  %v3330_v38 = vrot.slane %v3410_v25, 6  ;;  %v2663_v22 = vperm.slane %v4142_v20, 5 }
 0x513   :  { %3303 = vmatpush.msra.mxu1 %v2583_v49  ;;  %3245 = vmatpush.msra.mxu2 %v2183_v50  ;;  %v2439_v12 = vld [vmem:[#allocation17 + $0x938] sm:$0xff] }
 0x514   :  { %3268 = vmatpush.msra.mxu3 %v2287_v51  ;;  %3281 = vmatpush.msra.mxu0 %v2471_v17  ;;  %v2543_v40 = vld [vmem:[#allocation17 + $0xc78] sm:$0xff] }
 0x515   :  { %3304 = vmatpush.msra.mxu1 %v2575_v52  ;;  %3246 = vmatpush.msra.mxu2 %v2175_v53  ;;  %v2535_v63 = vld [vmem:[#allocation17 + $0xc38] sm:$0xff] }
 0x516   :  { %3269 = vmatpush.msra.mxu3 %v2279_v54  ;;  %3282 = vmatpush.msra.mxu0 %v2463_v55  ;;  %v2423_v27 = vld [vmem:[#allocation17 + $0x8b8] sm:$0xff]  ;;  %v2991_v61 = vpop.f32.mrf.mxu1 }
 0x517   :  { %3305 = vmatpush.msra.mxu1 %v2567_v13  ;;  %3270 = vmatmul.f32.vlgmr.msra.gmra.mxu3 %v4098_v14  ;;  %v2431_v14 = vld [vmem:[#allocation17 + $0x8f8] sm:$0xff]  ;;  %v2665_v13 = vperm.slane %v4142_v20, 7 }
 0x518   :  { %3247 = vmatpush.msra.mxu2 %v2167_v58  ;;  %3283 = vmatpush.msra.mxu0 %v2455_v59  ;;  %v2415_v33 = vld [vmem:[#allocation17 + $0x878] sm:$0xff] }
 0x519   :  { %3306 = vmatpush.msra.mxu1 %v2559_v1  ;;  %v2931_v16 = vpop.f32.mrf.mxu2  ;;  %v2407_v37 = vld [vmem:[#allocation17 + $0x838] sm:$0xff] }
 0x51a   :  { %3248 = vmatpush.msra.mxu2 %v2159_v28  ;;  %3284 = vmatpush.msra.mxu0 %v2447_v7  ;;  %v2932_v19 = vadd.f32 %v2931_v16, %v2661_v5 }
 0x51b   :  { %3307 = vmatpush.msra.mxu1 %v2551_v4 }
 0x51c   :  { %3249 = vmatpush.msra.mxu2 %v2151_v11  ;;  %3285 = vmatpush.msra.mxu0 %v2439_v12  ;;  %v2952_v26 = vadd.f32 %v2951_v60, %v2932_v19  ;;  %v2971_v30 = vpop.f32.mrf.mxu0 }
 0x51d   :  { %3308 = vmatpush.msra.mxu1 %v2543_v40  ;;  %3250 = vmatmul.f32.vlgmr.msra.gmra.mxu2 %v4101_v29  ;;  %v3412_v29 = vpop.eup %3411 }
 0x51e   :  { %3286 = vmatpush.msra.mxu0 %v2431_v14  ;;  %v2972_v31 = vadd.f32 %v2971_v30, %v2952_v26  ;;  %v3331_v41 = vrot.slane %v3412_v29, 4 }
 0x51f   :  { %3309 = vmatpush.msra.mxu1 %v2535_v63 }
 0x520   :  { %3310 = vmatmul.f32.vlgmr.msra.gmra.mxu1 %v4104_v36  ;;  %3287 = vmatpush.msra.mxu0 %v2423_v27  ;;  %v2992_v32 = vadd.f32 %v2991_v61, %v2972_v31 }
 0x522   :  { %3288 = vmatpush.msra.mxu0 %v2415_v33  ;;  %3413 = vtanh.f32 %v2992_v32 }
 0x523   :  { %3415 = vtanh.f32 %v2752_v34 }
 0x524   :  { %3289 = vmatpush.msra.mxu0 %v2407_v37 }
 0x525   :  { %3290 = vmatmul.f32.vlgmr.msra.gmra.mxu0 %v4108_v47 }
 0x528   :  { %v3414_v39 = vpop.eup %3413 }
 0x529   :  { %v3332_v10 = vrot.slane %v3414_v39, 2  ;;  %v3416_v42 = vpop.eup %3415 }
 0x52a   :  { %v3337_v36 = vsel %vm3336_vm8, %v3416_v42, %v3330_v38 }
 0x52b   :  { %v3339_v43 = vsel %vm3338_vm9, %v3331_v41, %v3332_v10 }
 0x52c   :  { %v3341_v44 = vsel %vm3340_vm10, %v3337_v36, %v3339_v43 }
 0x52d   :  { %3347 = vst [vmem:[#allocation21] sm:$0xff] %v3341_v44 }
 0x534   :  { %v3031_v45 = vpop.f32.mrf.mxu3 }
 0x538   :  { %v3071_v9 = vpop.f32.mrf.mxu1 }
 0x53b   :  { %v3011_v47 = vpop.f32.mrf.mxu2 }
 0x53c   :  { %v3012_v54 = vadd.f32 %v3011_v47, %v2662_v15 }
 0x53e   :  { %v3051_v46 = vpop.f32.mrf.mxu0  ;;  %v3032_v58 = vadd.f32 %v3031_v45, %v3012_v54 }
 0x540   :  { %v3052_v28 = vadd.f32 %v3051_v46, %v3032_v58 }
 0x542   :  { %v3072_v12 = vadd.f32 %v3071_v9, %v3052_v28 }
 0x556   :  { %v3111_v23 = vpop.f32.mrf.mxu3 }
 0x55a   :  { %v3151_v17 = vpop.f32.mrf.mxu1 }
 0x55d   :  { %v3091_v3 = vpop.f32.mrf.mxu2 }
 0x55e   :  { %v3092_v51 = vadd.f32 %v3091_v3, %v2663_v22 }
 0x560   :  { %v3131_v49 = vpop.f32.mrf.mxu0  ;;  %v3112_v53 = vadd.f32 %v3111_v23, %v3092_v51 }
 0x562   :  { %v3132_v21 = vadd.f32 %v3131_v49, %v3112_v53 }
 0x564   :  { %v3152_v1 = vadd.f32 %v3151_v17, %v3132_v21 }
 0x566   :  { %3417 = vtanh.f32 %v3152_v1 }
 0x56c   :  { %v3418_v18 = vpop.eup %3417 }
 0x56d   :  { %v3333_v40 = vrot.slane %v3418_v18, 6 }
 0x578   :  { %v3191_v2 = vpop.f32.mrf.mxu3 }
 0x57c   :  { %v3231_v57 = vpop.f32.mrf.mxu1 }
 0x57f   :  { %v3171_v50 = vpop.f32.mrf.mxu2 }
 0x580   :  { %v3172_v52 = vadd.f32 %v3171_v50, %v2664_v48 }
 0x582   :  { %v3192_v55 = vadd.f32 %v3191_v2, %v3172_v52  ;;  %v3211_v56 = vpop.f32.mrf.mxu0 }
 0x584   :  { %v3212_v59 = vadd.f32 %v3211_v56, %v3192_v55 }
 0x586   :  { %v3232_v7 = vadd.f32 %v3231_v57, %v3212_v59 }
 0x588   :  { %3419 = vtanh.f32 %v3232_v7 }
 0x58e   :  { %v3420_v20 = vpop.eup %3419 }
 0x58f   :  { %v3334_v60 = vrot.slane %v3420_v20, 4 }
 0x59a   :  { %v3271_v6 = vpop.f32.mrf.mxu3 }
 0x59d   :  { %v3311_v11 = vpop.f32.mrf.mxu1 }
 0x5a0   :  { %v3251_v0 = vpop.f32.mrf.mxu2 }
 0x5a1   :  { %v3252_v5 = vadd.f32 %v3251_v0, %v2665_v13 }
 0x5a2   :  { %v3291_v35 = vpop.f32.mrf.mxu0 }
 0x5a3   :  { %v3272_v8 = vadd.f32 %v3271_v6, %v3252_v5 }
 0x5a5   :  { %v3292_v4 = vadd.f32 %v3291_v35, %v3272_v8 }
 0x5a7   :  { %v3312_v16 = vadd.f32 %v3311_v11, %v3292_v4 }
 0x5a9   :  { %3421 = vtanh.f32 %v3312_v16 }
 0x5aa   :  { %3423 = vtanh.f32 %v3072_v12 }
 0x5af   :  { %v3422_v19 = vpop.eup %3421 }
 0x5b0   :  { %v3335_v14 = vrot.slane %v3422_v19, 2  ;;  %v3424_v62 = vpop.eup %3423 }
 0x5b1   :  { %v3342_v24 = vsel %vm3336_vm8, %v3424_v62, %v3333_v40 }
 0x5b2   :  { %v3343_v63 = vsel %vm3338_vm9, %v3334_v60, %v3335_v14 }
 0x5b3   :  { %v3344_v26 = vsel %vm3340_vm10, %v3342_v24, %v3343_v63 }
 0x5b4   :  { %3348 = vst [vmem:[#allocation21 + $0x8] sm:$0xff] %v3344_v26 }
 0x5b5   :  { %3370 = dma.vmem_to_hbm [thread:$0]  %s3366_s19, 256, %s3368_s24, [#allocation22]  }
 0x5b6   :  { %3757 = dma.done.wait [#allocation4], 32  }
 0x5b7   :  { %3758 = vsyncadd [#allocation4], 4294967264 }
 0x5b8   :  { %3759 = dma.done.wait [#allocation22], 256  }
 0x5b9   :  { %3760 = vsyncadd [#allocation22], 4294967040 }
 0x5ba   :  { %3379 = vsyncpa [#allocation3], 1 }
 0x5bb   :  { %3380 = vsyncpa [#allocation6], 1 }
 0x5bc   :  { %3381 = vsyncpa [#allocation9], 1 }
 0x5bd   :  { %3382 = vsyncpa [#allocation12], 1 }
 0x5be   :  { %3383 = vsyncpa [#allocation15], 1 }
 0x5bf   :  { %3384 = vsyncpa [#allocation18], 1 }
 0x5c0   :  { %3385 = vsyncpa [#allocation4], 1 }
 0x5c1   :  { %3386 = vsyncpa [#allocation22], 1 }

</bundles_post_ra>
